<compile_context>
chip_gen: v7x
topology: tpu7x:2x2x1
jax: 0.10.0
libtpu: 0.0.40
codegen_flags: <defaults>
</compile_context>

<pallas_src>
import numpy as np
import jax
import jax.numpy as jnp
from jax import lax
from jax.experimental import pallas as pl
from jax.experimental.pallas import tpu as pltpu


# ----------------------------- Pallas kernel --------------------------------

def _make_fused_kernel(shifts, guard, LL, Cin, Cmid, Cout):
    """Builds the fused conv1+BN+ReLU+conv2 kernel (all sizes/shifts static)."""

    def kernel(x_ref, w1_ref, b1_ref, w2_ref, b2_ref, mask_ref, o_ref,
               xg_ref, y1g_ref, xs_ref, ys_ref):
        # x_ref   : (1, Cin,  LL)    flattened (pre-dilated, pre-padded) frame(s)
        # w1_ref  : (Cmid, 9*Cin)   BN-folded, flipped, tap-stacked conv1 LHS
        # b1_ref  : (Cmid, 1)       BN-folded conv1 bias
        # w2_ref  : (Cout, 9*Cmid)  flipped, tap-stacked conv2 LHS
        # b2_ref  : (Cout, 1)
        # mask_ref: (1, LL)         1.0 on frame interior(s), 0.0 on border(s)
        # o_ref   : (1, Cout, LL)   conv2 output over the full frame(s)
        # xg_ref  : VMEM (Cin,  guard+LL+guard)  guard-extended input plane
        # y1g_ref : VMEM (Cmid, guard+LL+guard)  guard-extended conv1 output
        # xs_ref  : VMEM (9*Cin,  LL)            tap-stacked conv1 RHS
        # ys_ref  : VMEM (9*Cmid, LL)            tap-stacked conv2 RHS

        # Zero ONLY the guard bands (~4 KiB total); interiors are overwritten.
        xg_ref[:, :guard] = jnp.zeros((Cin, guard), jnp.float32)
        xg_ref[:, guard + LL:] = jnp.zeros((Cin, guard), jnp.float32)
        y1g_ref[:, :guard] = jnp.zeros((Cmid, guard), jnp.float32)
        y1g_ref[:, guard + LL:] = jnp.zeros((Cmid, guard), jnp.float32)

        # Stage the input into the guard-extended plane so every conv tap is a
        # contiguous static lane slice (in-VMEM "im2col"; nothing hits HBM).
        xg_ref[:, guard:guard + LL] = x_ref[0]

        # conv1 (transposed conv on the dilated plane) with BN folded in:
        # stack the 9 shifted slices along sublanes -> ONE matmul with K=9*Cin.
        for t, s in enumerate(shifts):
            xs_ref[t * Cin:(t + 1) * Cin, :] = xg_ref[:, guard + s:guard + s + LL]
        y1 = jnp.dot(w1_ref[...], xs_ref[...],
                     preferred_element_type=jnp.float32) + b1_ref[...]
        y1 = jnp.maximum(y1, 0.0) * mask_ref[...]
        # Dropout2d(p=0.2): identity in eval mode.

        # Stage Y1 (its zeroed frame border doubles as conv2's zero padding).
        y1g_ref[:, guard:guard + LL] = y1

        # conv2: same tap-stacking, ONE matmul with K=9*Cmid.
        for t, s in enumerate(shifts):
            ys_ref[t * Cmid:(t + 1) * Cmid, :] = y1g_ref[:, guard + s:guard + s + LL]
        o_ref[0] = jnp.dot(w2_ref[...], ys_ref[...],
                           preferred_element_type=jnp.float32) + b2_ref[...]

    return kernel


# ------------------------------- JAX glue ------------------------------------

def _tensorcores_per_device():
    """Best-effort count of TensorCores behind one JAX device (megacore)."""
    try:
        kind = jax.devices()[0].device_kind.lower()
    except Exception:
        return 1
    # v7x (and v4/v5p megacore) expose 2 TensorCores per device; v5e/v6e expose 1.
    if "v7" in kind or "7x" in kind or "v4" in kind or "v5p" in kind:
        return 2
    return 1


def ds_layer_forward(x_nchw, p, stride, output_padding):
    """Pallas-backed DS_layer forward (eval semantics). x: (N, in_d, H, W) NCHW."""
    eps = 1e-5
    k, pad = 3, 1
    s, op = stride, output_padding
    N, Cin, H, W = x_nchw.shape

    # ---- batch strategy: 1 TensorCore -> merge batch into the lane axis
    # (single grid step); 2 TensorCores -> parallel batch grid axis.
    n_tc = _tensorcores_per_device()
    if n_tc > 1 and N > 1 and N % n_tc == 0:
        G, NB = N, 1            # one image per grid step, "parallel" across cores
    else:
        G, NB = 1, N            # all images stacked on the lane axis

    # --- tiny wrapper prep: dilate+pad input in one lax.pad, fold BN, flip weights.
    lo, hi = k - 1 - pad, k - 1 - pad + op
    zero = jnp.zeros((), x_nchw.dtype)
    xp = lax.pad(x_nchw, zero,
                 ((0, 0, 0), (0, 0, 0), (lo, hi, s - 1), (lo, hi, s - 1)))
    Hp, Wp = xp.shape[2], xp.shape[3]        # frame = conv1 plane = conv2 padded plane
    Ho, Wo = Hp - (k - 1), Wp - (k - 1)
    L = Hp * Wp
    LL = NB * L
    if G == 1:
        # (N,Cin,Hp,Wp) -> (Cin, N*L) image-major on lanes -> (1, Cin, N*L)
        x_flat = jnp.transpose(xp, (1, 0, 2, 3)).reshape(1, Cin, LL)
    else:
        x_flat = xp.reshape(N, Cin, L)
    x_flat = x_flat.astype(jnp.float32)

    # Fold BatchNorm(inference) into conv1:  W1' = W1*scale,  b1' = (b1-mean)*scale+beta
    scale = p["gamma"] * lax.rsqrt(p["rvar"] + eps)
    # PyTorch ConvTranspose2d weight (Cin, Cout, kH, kW) -> flip spatial dims,
    # then stack the 9 taps along the contraction axis: K index = tap*Cin + cin.
    wf1 = jnp.flip(p["w1"], (2, 3)) * scale[None, :, None, None]   # (Cin, Cmid, 3, 3)
    Cmid = wf1.shape[1]
    w1s = jnp.transpose(wf1, (1, 2, 3, 0)).reshape(Cmid, k * k * Cin)
    b1s = ((p["b1"] - p["rmean"]) * scale + p["beta"]).reshape(Cmid, 1)
    wf2 = jnp.flip(p["w2"], (2, 3))                                 # (Cmid, Cout, 3, 3)
    Cout = wf2.shape[1]
    w2s = jnp.transpose(wf2, (1, 2, 3, 0)).reshape(Cout, k * k * Cmid)
    b2s = p["b2"].reshape(Cout, 1)

    # Interior mask of the (Hp, Wp) frame, tiled per stacked image (trace-time const).
    m = np.zeros((Hp, Wp), np.float32)
    m[1:1 + Ho, 1:1 + Wo] = 1.0
    mask = jnp.asarray(np.tile(m.reshape(1, L), (1, NB)))

    # Flat-frame shift for tap (dy, dx); guard just needs to cover max|shift|.
    shifts = tuple((dy - 1) * Wp + (dx - 1) for dy in range(k) for dx in range(k))
    max_shift = max(abs(v) for v in shifts)
    guard = ((max_shift + 7) // 8) * 8
    assert guard >= max_shift
    Lg = guard + LL + guard
    # Whole-frame-in-VMEM kernel (~1.2 MiB/step incl. staging); fine on every
    # generation incl. v7x's 64 MiB VMEM.  Larger H/W needs spatial tiling + halo.

    flops = 2 * N * L * (k * k * Cin * Cmid + k * k * Cmid * Cout)
    bytes_accessed = 4 * (N * Cin * L + N * Cout * L
                          + w1s.size + w2s.size + Cmid + Cout + LL)

    kernel = _make_fused_kernel(shifts, guard, LL, Cin, Cmid, Cout)
    out_flat = pl.pallas_call(
        kernel,
        out_shape=jax.ShapeDtypeStruct((G, Cout, LL), jnp.float32),
        grid=(G,),
        in_specs=[
            pl.BlockSpec((1, Cin, LL), lambda g: (g, 0, 0)),
            pl.BlockSpec((Cmid, k * k * Cin), lambda g: (0, 0)),
            pl.BlockSpec((Cmid, 1), lambda g: (0, 0)),
            pl.BlockSpec((Cout, k * k * Cmid), lambda g: (0, 0)),
            pl.BlockSpec((Cout, 1), lambda g: (0, 0)),
            pl.BlockSpec((1, LL), lambda g: (0, 0)),
        ],
        out_specs=pl.BlockSpec((1, Cout, LL), lambda g: (g, 0, 0)),
        scratch_shapes=[
            pltpu.VMEM((Cin, Lg), jnp.float32),
            pltpu.VMEM((Cmid, Lg), jnp.float32),
            pltpu.VMEM((k * k * Cin, LL), jnp.float32),
            pltpu.VMEM((k * k * Cmid, LL), jnp.float32),
        ],
        compiler_params=pltpu.CompilerParams(
            dimension_semantics=("parallel",)),
        cost_estimate=pl.CostEstimate(
            flops=flops, transcendentals=0, bytes_accessed=bytes_accessed),
    )(x_flat, w1s.astype(jnp.float32), b1s.astype(jnp.float32),
      w2s.astype(jnp.float32), b2s.astype(jnp.float32), mask)

    # Keep only the frame interior -> (N, n_class, Ho, Wo), NCHW.
    if G == 1:
        out = out_flat.reshape(Cout, N, Hp, Wp).transpose(1, 0, 2, 3)
    else:
        out = out_flat.reshape(N, Cout, Hp, Wp)
    return out[:, :, 1:1 + Ho, 1:1 + Wo]


def reference_forward(x_nchw, p, stride, output_padding):
    """Pure-JAX/XLA reference of the same math for verification."""
    eps = 1e-5
    op = output_padding
    x = jnp.transpose(x_nchw, (0, 2, 3, 1))
    wf1 = jnp.transpose(jnp.flip(p["w1"], axis=(2, 3)), (2, 3, 0, 1))
    y = lax.conv_general_dilated(
        x, wf1, window_strides=(1, 1),
        padding=((1, 1 + op), (1, 1 + op)), lhs_dilation=(stride, stride),
        dimension_numbers=("NHWC", "HWIO", "NHWC")) + p["b1"]
    y = (y - p["rmean"]) / jnp.sqrt(p["rvar"] + eps) * p["gamma"] + p["beta"]
    y = jnp.maximum(y, 0.0)
    wf2 = jnp.transpose(jnp.flip(p["w2"], axis=(2, 3)), (2, 3, 0, 1))
    y = lax.conv_general_dilated(
        y, wf2, window_strides=(1, 1), padding=((1, 1), (1, 1)),
        dimension_numbers=("NHWC", "HWIO", "NHWC")) + p["b2"]
    return jnp.transpose(y, (0, 3, 1, 2))


def init_params(key, in_d, out_d, n_class):
    ks = jax.random.split(key, 8)
    return {
        # PyTorch ConvTranspose2d weight layout: (in_channels, out_channels, kH, kW)
        "w1": 0.1 * jax.random.normal(ks[0], (in_d, out_d, 3, 3), jnp.float32),
        "b1": 0.1 * jax.random.normal(ks[1], (out_d,), jnp.float32),
        "gamma": 1.0 + 0.1 * jax.random.normal(ks[2], (out_d,), jnp.float32),
        "beta": 0.1 * jax.random.normal(ks[3], (out_d,), jnp.float32),
        "rmean": 0.1 * jax.random.normal(ks[4], (out_d,), jnp.float32),
        "rvar": jnp.abs(1.0 + 0.1 * jax.random.normal(ks[5], (out_d,), jnp.float32)),
        "w2": 0.1 * jax.random.normal(ks[6], (out_d, n_class, 3, 3), jnp.float32),
        "b2": 0.1 * jax.random.normal(ks[7], (n_class,), jnp.float32),
    }


if __name__ == "__main__":
    in_d, out_d, n_class = 4, 8, 3
    stride, output_padding = 2, 1
    N, H, W = 2, 16, 16

    key = jax.random.PRNGKey(0)
    kx, kp = jax.random.split(key)
    x = jax.random.normal(kx, (N, in_d, H, W), jnp.float32)   # NCHW, like PyTorch
    params = init_params(kp, in_d, out_d, n_class)

    fwd = jax.jit(ds_layer_forward, static_argnums=(2, 3))
    out = jax.block_until_ready(fwd(x, params, stride, output_padding))

    ref = jax.block_until_ready(reference_forward(x, params, stride, output_padding))
    assert out.shape == (N, n_class, H * stride, W * stride), out.shape
    np.testing.assert_allclose(np.asarray(out), np.asarray(ref), rtol=1e-4, atol=1e-4)

    print("KERNEL_OK")
</pallas_src>

<mosaic_0001>
module attributes {stable_mosaic.version = 11 : i64} {
  func.func @kernel(%arg0: i32, %arg1: memref<1x4x2312xf32, #tpu.memory_space<vmem>>, %arg2: memref<8x36xf32, #tpu.memory_space<vmem>>, %arg3: memref<8x1xf32, #tpu.memory_space<vmem>>, %arg4: memref<3x72xf32, #tpu.memory_space<vmem>>, %arg5: memref<3x1xf32, #tpu.memory_space<vmem>>, %arg6: memref<1x2312xf32, #tpu.memory_space<vmem>>, %arg7: memref<1x3x2312xf32, #tpu.memory_space<vmem>>, %arg8: memref<4x2392xf32, #tpu.memory_space<vmem>>, %arg9: memref<8x2392xf32, #tpu.memory_space<vmem>>, %arg10: memref<36x2312xf32, #tpu.memory_space<vmem>>, %arg11: memref<72x2312xf32, #tpu.memory_space<vmem>>) attributes {dimension_semantics = [#tpu.dimension_semantics<parallel>], iteration_bounds = array<i64: 1>, scalar_prefetch = 0 : i64, scratch_operands = 4 : i64, tpu.core_type = #tpu.core_type<tc>, window_params = [{transform_indices = @transform_0, window_bounds = array<i64: 1, 4, 2312>}, {pipeline_mode = #tpu.pipeline_mode<synchronous>, transform_indices = @transform_1, window_bounds = array<i64: 8, 36>}, {pipeline_mode = #tpu.pipeline_mode<synchronous>, transform_indices = @transform_2, window_bounds = array<i64: 8, 1>}, {pipeline_mode = #tpu.pipeline_mode<synchronous>, transform_indices = @transform_3, window_bounds = array<i64: 3, 72>}, {pipeline_mode = #tpu.pipeline_mode<synchronous>, transform_indices = @transform_4, window_bounds = array<i64: 3, 1>}, {pipeline_mode = #tpu.pipeline_mode<synchronous>, transform_indices = @transform_5, window_bounds = array<i64: 1, 2312>}, {transform_indices = @transform_6, window_bounds = array<i64: 1, 3, 2312>}]} {
    %cst = arith.constant 0.000000e+00 : f32
    %0 = vector.broadcast %cst : f32 to vector<4x40xf32>
    %c0 = arith.constant 0 : index
    %c0_0 = arith.constant 0 : index
    %1 = vector.load %arg8[%c0, %c0_0] : memref<4x2392xf32, #tpu.memory_space<vmem>>, vector<4x40xf32>
    tpu.vector_store %arg8[%c0, %c0_0], %0 {strides = array<i32>} : memref<4x2392xf32, #tpu.memory_space<vmem>>, vector<4x40xf32>,
    %cst_1 = arith.constant 0.000000e+00 : f32
    %2 = vector.broadcast %cst_1 : f32 to vector<4x40xf32>
    %c0_2 = arith.constant 0 : index
    %c2352 = arith.constant 2352 : index
    %3 = vector.load %arg8[%c0_2, %c2352] : memref<4x2392xf32, #tpu.memory_space<vmem>>, vector<4x40xf32>
    tpu.vector_store %arg8[%c0_2, %c2352], %2 {strides = array<i32>} : memref<4x2392xf32, #tpu.memory_space<vmem>>, vector<4x40xf32>,
    %cst_3 = arith.constant 0.000000e+00 : f32
    %4 = vector.broadcast %cst_3 : f32 to vector<8x40xf32>
    %c0_4 = arith.constant 0 : index
    %c0_5 = arith.constant 0 : index
    %5 = vector.load %arg9[%c0_4, %c0_5] : memref<8x2392xf32, #tpu.memory_space<vmem>>, vector<8x40xf32>
    tpu.vector_store %arg9[%c0_4, %c0_5], %4 {strides = array<i32>} : memref<8x2392xf32, #tpu.memory_space<vmem>>, vector<8x40xf32>,
    %cst_6 = arith.constant 0.000000e+00 : f32
    %6 = vector.broadcast %cst_6 : f32 to vector<8x40xf32>
    %c0_7 = arith.constant 0 : index
    %c2352_8 = arith.constant 2352 : index
    %7 = vector.load %arg9[%c0_7, %c2352_8] : memref<8x2392xf32, #tpu.memory_space<vmem>>, vector<8x40xf32>
    tpu.vector_store %arg9[%c0_7, %c2352_8], %6 {strides = array<i32>} : memref<8x2392xf32, #tpu.memory_space<vmem>>, vector<8x40xf32>,
    %c0_9 = arith.constant 0 : index
    %c0_10 = arith.constant 0 : index
    %c0_11 = arith.constant 0 : index
    %8 = vector.load %arg1[%c0_9, %c0_10, %c0_11] : memref<1x4x2312xf32, #tpu.memory_space<vmem>>, vector<1x4x2312xf32>
    %9 = vector.shape_cast %8 : vector<1x4x2312xf32> to vector<4x2312xf32>
    %c0_12 = arith.constant 0 : index
    %c40 = arith.constant 40 : index
    %10 = vector.load %arg8[%c0_12, %c40] : memref<4x2392xf32, #tpu.memory_space<vmem>>, vector<4x2312xf32>
    tpu.vector_store %arg8[%c0_12, %c40], %9 {strides = array<i32>} : memref<4x2392xf32, #tpu.memory_space<vmem>>, vector<4x2312xf32>,
    %c0_13 = arith.constant 0 : index
    %c5 = arith.constant 5 : index
    %11 = vector.load %arg8[%c0_13, %c5] : memref<4x2392xf32, #tpu.memory_space<vmem>>, vector<4x2312xf32>
    %c0_14 = arith.constant 0 : index
    %c0_15 = arith.constant 0 : index
    %12 = vector.load %arg10[%c0_14, %c0_15] : memref<36x2312xf32, #tpu.memory_space<vmem>>, vector<4x2312xf32>
    tpu.vector_store %arg10[%c0_14, %c0_15], %11 {strides = array<i32>} : memref<36x2312xf32, #tpu.memory_space<vmem>>, vector<4x2312xf32>,
    %c0_16 = arith.constant 0 : index
    %c6 = arith.constant 6 : index
    %13 = vector.load %arg8[%c0_16, %c6] : memref<4x2392xf32, #tpu.memory_space<vmem>>, vector<4x2312xf32>
    %c4 = arith.constant 4 : index
    %c0_17 = arith.constant 0 : index
    %14 = vector.load %arg10[%c4, %c0_17] : memref<36x2312xf32, #tpu.memory_space<vmem>>, vector<4x2312xf32>
    tpu.vector_store %arg10[%c4, %c0_17], %13 {strides = array<i32>} : memref<36x2312xf32, #tpu.memory_space<vmem>>, vector<4x2312xf32>,
    %c0_18 = arith.constant 0 : index
    %c7 = arith.constant 7 : index
    %15 = vector.load %arg8[%c0_18, %c7] : memref<4x2392xf32, #tpu.memory_space<vmem>>, vector<4x2312xf32>
    %c8 = arith.constant 8 : index
    %c0_19 = arith.constant 0 : index
    %16 = vector.load %arg10[%c8, %c0_19] : memref<36x2312xf32, #tpu.memory_space<vmem>>, vector<4x2312xf32>
    tpu.vector_store %arg10[%c8, %c0_19], %15 {strides = array<i32>} : memref<36x2312xf32, #tpu.memory_space<vmem>>, vector<4x2312xf32>,
    %c0_20 = arith.constant 0 : index
    %c39 = arith.constant 39 : index
    %17 = vector.load %arg8[%c0_20, %c39] : memref<4x2392xf32, #tpu.memory_space<vmem>>, vector<4x2312xf32>
    %c12 = arith.constant 12 : index
    %c0_21 = arith.constant 0 : index
    %18 = vector.load %arg10[%c12, %c0_21] : memref<36x2312xf32, #tpu.memory_space<vmem>>, vector<4x2312xf32>
    tpu.vector_store %arg10[%c12, %c0_21], %17 {strides = array<i32>} : memref<36x2312xf32, #tpu.memory_space<vmem>>, vector<4x2312xf32>,
    %c0_22 = arith.constant 0 : index
    %c40_23 = arith.constant 40 : index
    %19 = vector.load %arg8[%c0_22, %c40_23] : memref<4x2392xf32, #tpu.memory_space<vmem>>, vector<4x2312xf32>
    %c16 = arith.constant 16 : index
    %c0_24 = arith.constant 0 : index
    %20 = vector.load %arg10[%c16, %c0_24] : memref<36x2312xf32, #tpu.memory_space<vmem>>, vector<4x2312xf32>
    tpu.vector_store %arg10[%c16, %c0_24], %19 {strides = array<i32>} : memref<36x2312xf32, #tpu.memory_space<vmem>>, vector<4x2312xf32>,
    %c0_25 = arith.constant 0 : index
    %c41 = arith.constant 41 : index
    %21 = vector.load %arg8[%c0_25, %c41] : memref<4x2392xf32, #tpu.memory_space<vmem>>, vector<4x2312xf32>
    %c20 = arith.constant 20 : index
    %c0_26 = arith.constant 0 : index
    %22 = vector.load %arg10[%c20, %c0_26] : memref<36x2312xf32, #tpu.memory_space<vmem>>, vector<4x2312xf32>
    tpu.vector_store %arg10[%c20, %c0_26], %21 {strides = array<i32>} : memref<36x2312xf32, #tpu.memory_space<vmem>>, vector<4x2312xf32>,
    %c0_27 = arith.constant 0 : index
    %c73 = arith.constant 73 : index
    %23 = vector.load %arg8[%c0_27, %c73] : memref<4x2392xf32, #tpu.memory_space<vmem>>, vector<4x2312xf32>
    %c24 = arith.constant 24 : index
    %c0_28 = arith.constant 0 : index
    %24 = vector.load %arg10[%c24, %c0_28] : memref<36x2312xf32, #tpu.memory_space<vmem>>, vector<4x2312xf32>
    tpu.vector_store %arg10[%c24, %c0_28], %23 {strides = array<i32>} : memref<36x2312xf32, #tpu.memory_space<vmem>>, vector<4x2312xf32>,
    %c0_29 = arith.constant 0 : index
    %c74 = arith.constant 74 : index
    %25 = vector.load %arg8[%c0_29, %c74] : memref<4x2392xf32, #tpu.memory_space<vmem>>, vector<4x2312xf32>
    %c28 = arith.constant 28 : index
    %c0_30 = arith.constant 0 : index
    %26 = vector.load %arg10[%c28, %c0_30] : memref<36x2312xf32, #tpu.memory_space<vmem>>, vector<4x2312xf32>
    tpu.vector_store %arg10[%c28, %c0_30], %25 {strides = array<i32>} : memref<36x2312xf32, #tpu.memory_space<vmem>>, vector<4x2312xf32>,
    %c0_31 = arith.constant 0 : index
    %c75 = arith.constant 75 : index
    %27 = vector.load %arg8[%c0_31, %c75] : memref<4x2392xf32, #tpu.memory_space<vmem>>, vector<4x2312xf32>
    %c32 = arith.constant 32 : index
    %c0_32 = arith.constant 0 : index
    %28 = vector.load %arg10[%c32, %c0_32] : memref<36x2312xf32, #tpu.memory_space<vmem>>, vector<4x2312xf32>
    tpu.vector_store %arg10[%c32, %c0_32], %27 {strides = array<i32>} : memref<36x2312xf32, #tpu.memory_space<vmem>>, vector<4x2312xf32>,
    %c0_33 = arith.constant 0 : index
    %c0_34 = arith.constant 0 : index
    %29 = vector.load %arg2[%c0_33, %c0_34] : memref<8x36xf32, #tpu.memory_space<vmem>>, vector<8x36xf32>
    %c0_35 = arith.constant 0 : index
    %c0_36 = arith.constant 0 : index
    %30 = vector.load %arg10[%c0_35, %c0_36] : memref<36x2312xf32, #tpu.memory_space<vmem>>, vector<36x2312xf32>
    %cst_37 = arith.constant dense<0.000000e+00> : vector<8x2312xf32>
    %31 = tpu.matmul %29, %30, %cst_37 {dimension_numbers = #tpu.dot_dimension_numbers<[1], [0], [0], [1], [0, 0, 1, 1], [], []>} : vector<8x36xf32>, vector<36x2312xf32>, vector<8x2312xf32> -> vector<8x2312xf32>
    %c0_38 = arith.constant 0 : index
    %c0_39 = arith.constant 0 : index
    %32 = vector.load %arg3[%c0_38, %c0_39] : memref<8x1xf32, #tpu.memory_space<vmem>>, vector<8x1xf32>
    %33 = vector.broadcast %32 : vector<8x1xf32> to vector<8x2312xf32>
    %34 = arith.addf %31, %33 : vector<8x2312xf32>
    %cst_40 = arith.constant 0.000000e+00 : f32
    %35 = vector.broadcast %cst_40 : f32 to vector<8x2312xf32>
    %36 = arith.maximumf %34, %35 : vector<8x2312xf32>
    %c0_41 = arith.constant 0 : index
    %c0_42 = arith.constant 0 : index
    %37 = vector.load %arg6[%c0_41, %c0_42] : memref<1x2312xf32, #tpu.memory_space<vmem>>, vector<1x2312xf32>
    %38 = vector.broadcast %37 : vector<1x2312xf32> to vector<8x2312xf32>
    %39 = arith.mulf %36, %38 : vector<8x2312xf32>
    %c0_43 = arith.constant 0 : index
    %c40_44 = arith.constant 40 : index
    %40 = vector.load %arg9[%c0_43, %c40_44] : memref<8x2392xf32, #tpu.memory_space<vmem>>, vector<8x2312xf32>
    tpu.vector_store %arg9[%c0_43, %c40_44], %39 {strides = array<i32>} : memref<8x2392xf32, #tpu.memory_space<vmem>>, vector<8x2312xf32>,
    %c0_45 = arith.constant 0 : index
    %c5_46 = arith.constant 5 : index
    %41 = vector.load %arg9[%c0_45, %c5_46] : memref<8x2392xf32, #tpu.memory_space<vmem>>, vector<8x2312xf32>
    %c0_47 = arith.constant 0 : index
    %c0_48 = arith.constant 0 : index
    %42 = vector.load %arg11[%c0_47, %c0_48] : memref<72x2312xf32, #tpu.memory_space<vmem>>, vector<8x2312xf32>
    tpu.vector_store %arg11[%c0_47, %c0_48], %41 {strides = array<i32>} : memref<72x2312xf32, #tpu.memory_space<vmem>>, vector<8x2312xf32>,
    %c0_49 = arith.constant 0 : index
    %c6_50 = arith.constant 6 : index
    %43 = vector.load %arg9[%c0_49, %c6_50] : memref<8x2392xf32, #tpu.memory_space<vmem>>, vector<8x2312xf32>
    %c8_51 = arith.constant 8 : index
    %c0_52 = arith.constant 0 : index
    %44 = vector.load %arg11[%c8_51, %c0_52] : memref<72x2312xf32, #tpu.memory_space<vmem>>, vector<8x2312xf32>
    tpu.vector_store %arg11[%c8_51, %c0_52], %43 {strides = array<i32>} : memref<72x2312xf32, #tpu.memory_space<vmem>>, vector<8x2312xf32>,
    %c0_53 = arith.constant 0 : index
    %c7_54 = arith.constant 7 : index
    %45 = vector.load %arg9[%c0_53, %c7_54] : memref<8x2392xf32, #tpu.memory_space<vmem>>, vector<8x2312xf32>
    %c16_55 = arith.constant 16 : index
    %c0_56 = arith.constant 0 : index
    %46 = vector.load %arg11[%c16_55, %c0_56] : memref<72x2312xf32, #tpu.memory_space<vmem>>, vector<8x2312xf32>
    tpu.vector_store %arg11[%c16_55, %c0_56], %45 {strides = array<i32>} : memref<72x2312xf32, #tpu.memory_space<vmem>>, vector<8x2312xf32>,
    %c0_57 = arith.constant 0 : index
    %c39_58 = arith.constant 39 : index
    %47 = vector.load %arg9[%c0_57, %c39_58] : memref<8x2392xf32, #tpu.memory_space<vmem>>, vector<8x2312xf32>
    %c24_59 = arith.constant 24 : index
    %c0_60 = arith.constant 0 : index
    %48 = vector.load %arg11[%c24_59, %c0_60] : memref<72x2312xf32, #tpu.memory_space<vmem>>, vector<8x2312xf32>
    tpu.vector_store %arg11[%c24_59, %c0_60], %47 {strides = array<i32>} : memref<72x2312xf32, #tpu.memory_space<vmem>>, vector<8x2312xf32>,
    %c0_61 = arith.constant 0 : index
    %c40_62 = arith.constant 40 : index
    %49 = vector.load %arg9[%c0_61, %c40_62] : memref<8x2392xf32, #tpu.memory_space<vmem>>, vector<8x2312xf32>
    %c32_63 = arith.constant 32 : index
    %c0_64 = arith.constant 0 : index
    %50 = vector.load %arg11[%c32_63, %c0_64] : memref<72x2312xf32, #tpu.memory_space<vmem>>, vector<8x2312xf32>
    tpu.vector_store %arg11[%c32_63, %c0_64], %49 {strides = array<i32>} : memref<72x2312xf32, #tpu.memory_space<vmem>>, vector<8x2312xf32>,
    %c0_65 = arith.constant 0 : index
    %c41_66 = arith.constant 41 : index
    %51 = vector.load %arg9[%c0_65, %c41_66] : memref<8x2392xf32, #tpu.memory_space<vmem>>, vector<8x2312xf32>
    %c40_67 = arith.constant 40 : index
    %c0_68 = arith.constant 0 : index
    %52 = vector.load %arg11[%c40_67, %c0_68] : memref<72x2312xf32, #tpu.memory_space<vmem>>, vector<8x2312xf32>
    tpu.vector_store %arg11[%c40_67, %c0_68], %51 {strides = array<i32>} : memref<72x2312xf32, #tpu.memory_space<vmem>>, vector<8x2312xf32>,
    %c0_69 = arith.constant 0 : index
    %c73_70 = arith.constant 73 : index
    %53 = vector.load %arg9[%c0_69, %c73_70] : memref<8x2392xf32, #tpu.memory_space<vmem>>, vector<8x2312xf32>
    %c48 = arith.constant 48 : index
    %c0_71 = arith.constant 0 : index
    %54 = vector.load %arg11[%c48, %c0_71] : memref<72x2312xf32, #tpu.memory_space<vmem>>, vector<8x2312xf32>
    tpu.vector_store %arg11[%c48, %c0_71], %53 {strides = array<i32>} : memref<72x2312xf32, #tpu.memory_space<vmem>>, vector<8x2312xf32>,
    %c0_72 = arith.constant 0 : index
    %c74_73 = arith.constant 74 : index
    %55 = vector.load %arg9[%c0_72, %c74_73] : memref<8x2392xf32, #tpu.memory_space<vmem>>, vector<8x2312xf32>
    %c56 = arith.constant 56 : index
    %c0_74 = arith.constant 0 : index
    %56 = vector.load %arg11[%c56, %c0_74] : memref<72x2312xf32, #tpu.memory_space<vmem>>, vector<8x2312xf32>
    tpu.vector_store %arg11[%c56, %c0_74], %55 {strides = array<i32>} : memref<72x2312xf32, #tpu.memory_space<vmem>>, vector<8x2312xf32>,
    %c0_75 = arith.constant 0 : index
    %c75_76 = arith.constant 75 : index
    %57 = vector.load %arg9[%c0_75, %c75_76] : memref<8x2392xf32, #tpu.memory_space<vmem>>, vector<8x2312xf32>
    %c64 = arith.constant 64 : index
    %c0_77 = arith.constant 0 : index
    %58 = vector.load %arg11[%c64, %c0_77] : memref<72x2312xf32, #tpu.memory_space<vmem>>, vector<8x2312xf32>
    tpu.vector_store %arg11[%c64, %c0_77], %57 {strides = array<i32>} : memref<72x2312xf32, #tpu.memory_space<vmem>>, vector<8x2312xf32>,
    %c0_78 = arith.constant 0 : index
    %c0_79 = arith.constant 0 : index
    %59 = vector.load %arg4[%c0_78, %c0_79] : memref<3x72xf32, #tpu.memory_space<vmem>>, vector<3x72xf32>
    %c0_80 = arith.constant 0 : index
    %c0_81 = arith.constant 0 : index
    %60 = vector.load %arg11[%c0_80, %c0_81] : memref<72x2312xf32, #tpu.memory_space<vmem>>, vector<72x2312xf32>
    %cst_82 = arith.constant dense<0.000000e+00> : vector<3x2312xf32>
    %61 = tpu.matmul %59, %60, %cst_82 {dimension_numbers = #tpu.dot_dimension_numbers<[1], [0], [0], [1], [0, 0, 1, 1], [], []>} : vector<3x72xf32>, vector<72x2312xf32>, vector<3x2312xf32> -> vector<3x2312xf32>
    %c0_83 = arith.constant 0 : index
    %c0_84 = arith.constant 0 : index
    %62 = vector.load %arg5[%c0_83, %c0_84] : memref<3x1xf32, #tpu.memory_space<vmem>>, vector<3x1xf32>
    %63 = vector.broadcast %62 : vector<3x1xf32> to vector<3x2312xf32>
    %64 = arith.addf %61, %63 : vector<3x2312xf32>
    %c0_85 = arith.constant 0 : index
    %c0_86 = arith.constant 0 : index
    %c0_87 = arith.constant 0 : index
    %65 = vector.load %arg7[%c0_85, %c0_86, %c0_87] : memref<1x3x2312xf32, #tpu.memory_space<vmem>>, vector<1x3x2312xf32>
    %66 = vector.shape_cast %65 : vector<1x3x2312xf32> to vector<3x2312xf32>
    %67 = vector.shape_cast %64 : vector<3x2312xf32> to vector<1x3x2312xf32>
    tpu.vector_store %arg7[%c0_85, %c0_86, %c0_87], %67 {strides = array<i32>} : memref<1x3x2312xf32, #tpu.memory_space<vmem>>, vector<1x3x2312xf32>,
    return
  }
  func.func @transform_0(%arg0: i32) -> (i32, i32, i32) {
    %c0_i32 = arith.constant 0 : i32
    %c0_i32_0 = arith.constant 0 : i32
    %c0_i32_1 = arith.constant 0 : i32
    return %arg0, %c0_i32, %c0_i32_0 : i32, i32, i32
  }
  func.func @transform_1(%arg0: i32) -> (i32, i32) {
    %c0_i32 = arith.constant 0 : i32
    %c0_i32_0 = arith.constant 0 : i32
    %c0_i32_1 = arith.constant 0 : i32
    return %c0_i32, %c0_i32_0 : i32, i32
  }
  func.func @transform_2(%arg0: i32) -> (i32, i32) {
    %c0_i32 = arith.constant 0 : i32
    %c0_i32_0 = arith.constant 0 : i32
    %c0_i32_1 = arith.constant 0 : i32
    return %c0_i32, %c0_i32_0 : i32, i32
  }
  func.func @transform_3(%arg0: i32) -> (i32, i32) {
    %c0_i32 = arith.constant 0 : i32
    %c0_i32_0 = arith.constant 0 : i32
    %c0_i32_1 = arith.constant 0 : i32
    return %c0_i32, %c0_i32_0 : i32, i32
  }
  func.func @transform_4(%arg0: i32) -> (i32, i32) {
    %c0_i32 = arith.constant 0 : i32
    %c0_i32_0 = arith.constant 0 : i32
    %c0_i32_1 = arith.constant 0 : i32
    return %c0_i32, %c0_i32_0 : i32, i32
  }
  func.func @transform_5(%arg0: i32) -> (i32, i32) {
    %c0_i32 = arith.constant 0 : i32
    %c0_i32_0 = arith.constant 0 : i32
    %c0_i32_1 = arith.constant 0 : i32
    return %c0_i32, %c0_i32_0 : i32, i32
  }
  func.func @transform_6(%arg0: i32) -> (i32, i32, i32) {
    %c0_i32 = arith.constant 0 : i32
    %c0_i32_0 = arith.constant 0 : i32
    %c0_i32_1 = arith.constant 0 : i32
    return %arg0, %c0_i32, %c0_i32_0 : i32, i32, i32
  }
}

</mosaic_0001>

<bundles_post_ra>
// kernel: ds_layer_forward.1
= control target key start
LH: loop header
LB: loop body
LE: loop exit
PB: predicated region body
PF: predicated region fallthrough
CT: control target
= control target key end

     0   :  { %vm23_vm0 = vcmask 322560   ;;  %vm27_vm1 = vcmask 326656   ;;  %v4853_v2 = vmov 0.0   ;;  %s4854_s25 = smov 40   ;;  %vm25_vm2 = vcmask 716160   ;;  %s4856_s18 = smov 122   ;;  %s6778_s0 = inlined_call_operand.vmem [shape: f32[1,4,2312], index: 0, kind: input, shape index: {}]   ;;  %s6779_s1 = inlined_call_operand.vmem [shape: f32[8,36], index: 1, kind: input, shape index: {}]   ;;  %s6780_s2 = inlined_call_operand.vmem [shape: f32[8,1], index: 2, kind: input, shape index: {}]   ;;  %s6781_s5 = inlined_call_operand.vmem [shape: f32[1,2312], index: 5, kind: input, shape index: {}]   ;;  %s6782_s3 = inlined_call_operand.vmem [shape: f32[3,72], index: 3, kind: input, shape index: {}]   ;;  %s6783_s4 = inlined_call_operand.vmem [shape: f32[3,1], index: 4, kind: input, shape index: {}]   ;;  %s6784_s6 = inlined_call_operand.vmem [shape: f32[1,3,2312], index: 6, kind: output, shape index: {}]  }
   0x1   :  { %v31_v0 = vld [vmem:[%s6778_s0] sm:$0xff]  ;;  %v33_v1 = vld [vmem:[%s6778_s0 + $0x10] sm:$0xff]  ;;  %24 = vst.msk [vmem:[#allocation2] sm:$0xf] %vm23_vm0, %v4853_v2  ;;  %1472 = vmatprep.mubr.f32.mxu0 %v4853_v2  ;;  %1543 = vmatprep.mubr.f32.mxu1 %v4853_v2  ;;  %v32_v3 = vld [vmem:[%s6778_s0 + $0x8] sm:$0xff]  ;;  %vm109_vm3 = vcmask 1043776  }
   0x2   :  { %28 = vst.msk [vmem:[#allocation3] sm:$0xff] %vm27_vm1, %v4853_v2  ;;  %51 = vrot.lane.b32.xlu0 %v31_v0, %s4854_s25  ;;  %55 = vrot.lane.b32.xlu1 %v33_v1, %s4854_s25  ;;  %v34_v4 = vld [vmem:[%s6778_s0 + $0x18] sm:$0xff]  ;;  %v35_v5 = vld [vmem:[%s6778_s0 + $0x20] sm:$0xff]  ;;  %vm110_vm4 = vcmask 1047556   ;;  %vm81_vm6 = vcmask 1043456   ;;  %s4857_s19 = smov 121  }
   0x3   :  { %v36_v6 = vld [vmem:[%s6778_s0 + $0x28] sm:$0xff]  ;;  %v37_v7 = vld [vmem:[%s6778_s0 + $0x30] sm:$0xff]  ;;  %v38_v8 = vld [vmem:[%s6778_s0 + $0x38] sm:$0xff]  ;;  %26 = vst.msk [vmem:[#allocation2 + $0x48] sm:$0xf] %vm25_vm2, %v4853_v2  ;;  %s4858_s20 = smov 89  }
   0x4   :  { %v39_v9 = vld [vmem:[%s6778_s0 + $0x40] sm:$0xff]  ;;  %v40_v10 = vld [vmem:[%s6778_s0 + $0x48] sm:$0xf]  ;;  %vm111_vm5 = vmor %vm110_vm4, %vm109_vm3  ;;  %s4855_s0 = smov 123   ;;  %s4859_s21 = smov 88   ;;  %vm121_vm7 = vcmask 388096  }
   0x5   :  { %s4860_s22 = smov 55   ;;  %s4861_s23 = smov 87   ;;  %vm316_vm8 = vcmask 998400   ;;  %vm566_vm9 = vcmask 728064   ;;  %vm815_vm10 = vcmask 711680   ;;  %vm1064_vm11 = vcmask 441344  }
   0x6   :  { %53 = vrot.lane.b32.xlu0 %v32_v3, %s4854_s25  ;;  %57 = vrot.lane.b32.xlu1 %v34_v4, %s4854_s25  ;;  %s4862_s24 = smov 54   ;;  %s4863_s26 = smov 53   ;;  %vm190_vm12 = vcmask 1006592   ;;  %vm441_vm13 = vcmask 990208   ;;  %vm690_vm14 = vcmask 719872   ;;  %vm939_vm15 = vcmask 449536  }
   0x7   :  { %vm1188_vm0 = vcmask 433152   ;;  %vm1347_vm2 = vcmask 293888   ;;  %vm246_vm3 = vcmask 60416   ;;  %vm372_vm4 = vcmask 64516  }
   0xa   :  { %59 = vrot.lane.b32.xlu0 %v35_v5, %s4854_s25  ;;  %61 = vrot.lane.b32.xlu1 %v36_v6, %s4854_s25 }
   0xe   :  { %63 = vrot.lane.b32.xlu0 %v37_v7, %s4854_s25  ;;  %65 = vrot.lane.b32.xlu1 %v38_v8, %s4854_s25 }
  0x12   :  { %67 = vrot.lane.b32.xlu0 %v39_v9, %s4854_s25  ;;  %69 = vrot.lane.b32.xlu1 %v40_v10, %s4854_s25 }
  0x74   :  { %v52_v11 = vpop.permute.xlu0 %51  ;;  %v56_v12 = vpop.permute.xlu1 %55 }
  0x75   :  { %v71_v13 = vrot.slane %v52_v11, 4  ;;  %v73_v15 = vrot.slane %v56_v12, 4 }
  0x77   :  { %v80_v14 = vsel %vm27_vm1, %v71_v13, %v52_v11 }
  0x78   :  { %112 = vst.msk [vmem:[#allocation2] sm:$0xff] %vm111_vm5, %v80_v14  ;;  %v54_v16 = vpop.permute.xlu0 %53  ;;  %v58_v17 = vpop.permute.xlu1 %57  ;;  %vm4866_vm5 = vmmov 0  }
  0x79   :  { %v72_v18 = vrot.slane %v54_v16, 4  ;;  %v74_v19 = vrot.slane %v58_v17, 4 }
  0x7b   :  { %v82_v20 = vsel %vm81_vm6, %v71_v13, %v72_v18  ;;  %v84_v21 = vsel %vm81_vm6, %v72_v18, %v73_v15  ;;  %v86_v22 = vsel %vm81_vm6, %v73_v15, %v74_v19 }
  0x7c   :  { %v4953_v23 = vsel %vm27_vm1, %v82_v20, %v54_v16  ;;  %v4956_v24 = vsel %vm27_vm1, %v84_v21, %v56_v12  ;;  %v4959_v25 = vsel %vm27_vm1, %v86_v22, %v58_v17  ;;  %v60_v26 = vpop.permute.xlu0 %59  ;;  %v62_v27 = vpop.permute.xlu1 %61 }
  0x7d   :  { %156 = vrot.lane.b32.xlu1 %v4953_v23, %s4855_s0  ;;  %v75_v28 = vrot.slane %v60_v26, 4  ;;  %v76_v29 = vrot.slane %v62_v27, 4  ;;  %v269_v50 = vcombine.low %v4953_v23, %v4953_v23  ;;  %v270_v52 = vcombine.low %v4956_v24, %v4956_v24 }
  0x7e   :  { %v144_v53 = vcombine.high %v4953_v23, %v4953_v23  ;;  %v271_v54 = vcombine.low %v4959_v25, %v4959_v25  ;;  %v145_v55 = vcombine.high %v4956_v24, %v4956_v24  ;;  %v5101_v60 = vcombine.high %v4959_v25, %v4959_v25 }
  0x7f   :  { %v4963_v30 = vld [vmem:[#allocation2] sm:$0xff]  ;;  %v88_v31 = vsel %vm81_vm6, %v74_v19, %v75_v28  ;;  %v90_v33 = vsel %vm81_vm6, %v75_v28, %v76_v29 }
  0x80   :  { %280 = vrot.lane.b32.xlu0 %v4963_v30, %s4856_s18  ;;  %v4969_v32 = vsel %vm27_vm1, %v88_v31, %v60_v26  ;;  %v64_v34 = vpop.permute.xlu0 %63  ;;  %v66_v35 = vpop.permute.xlu1 %65  ;;  %v4975_v36 = vsel %vm27_vm1, %v90_v33, %v62_v27  ;;  %v268_v49 = vcombine.low %v4963_v30, %v4963_v30  ;;  %v143_v51 = vcombine.high %v4963_v30, %v4963_v30 }
  0x81   :  { %407 = vrot.lane.b32.xlu1 %v4953_v23, %s4857_s19  ;;  %v77_v37 = vrot.slane %v64_v34, 4  ;;  %v78_v38 = vrot.slane %v66_v35, 4  ;;  %v272_v4 = vcombine.low %v4969_v32, %v4969_v32  ;;  %v5138_v7 = vcombine.high %v4969_v32, %v4969_v32 }
  0x82   :  { %v5165_v14 = vcombine.low %v4975_v36, %v4975_v36 }
  0x83   :  { %v92_v39 = vsel %vm81_vm6, %v76_v29, %v77_v37  ;;  %v94_v40 = vsel %vm81_vm6, %v77_v37, %v78_v38 }
  0x84   :  { %530 = vrot.lane.b32.xlu0 %v4963_v30, %s4858_s20  ;;  %v4982_v41 = vsel %vm27_vm1, %v92_v39, %v64_v34  ;;  %v4985_v42 = vsel %vm27_vm1, %v94_v40, %v66_v35  ;;  %v68_v43 = vpop.permute.xlu0 %67  ;;  %v70_v45 = vpop.permute.xlu1 %69 }
  0x85   :  { %656 = vrot.lane.b32.xlu1 %v4953_v23, %s4859_s21  ;;  %119 = vst [vmem:[#allocation2 + $0x38] sm:$0xff] %v4985_v42  ;;  %v79_v44 = vrot.slane %v68_v43, 4 }
  0x87   :  { %v96_v46 = vsel %vm81_vm6, %v78_v38, %v79_v44  ;;  %v98_v47 = vsel %vm27_vm1, %v79_v44, %v70_v45 }
  0x88   :  { %152 = vrot.lane.b32.xlu0 %v4963_v30, %s4855_s0  ;;  %v4995_v48 = vsel %vm27_vm1, %v96_v46, %v68_v43  ;;  %122 = vst.msk [vmem:[#allocation2 + $0x48] sm:$0xf] %vm121_vm7, %v98_v47  ;;  %vm29_vm7 = vcmask 720256  }
  0x89   :  { %905 = vrot.lane.b32.xlu1 %v4953_v23, %s4860_s22  ;;  %120 = vst [vmem:[#allocation2 + $0x40] sm:$0xff] %v4995_v48  ;;  %30 = vst.msk [vmem:[#allocation3 + $0x90] sm:$0xff] %vm29_vm7, %v4853_v2 }
  0x8c   :  { %403 = vrot.lane.b32.xlu0 %v4963_v30, %s4857_s19 }
  0x8d   :  { %160 = vrot.lane.b32.xlu1 %v4956_v24, %s4855_s0 }
  0x90   :  { %779 = vrot.lane.b32.xlu0 %v4963_v30, %s4861_s23 }
  0x91   :  { %411 = vrot.lane.b32.xlu1 %v4956_v24, %s4857_s19 }
  0x94   :  { %1028 = vrot.lane.b32.xlu0 %v4963_v30, %s4862_s24 }
  0x95   :  { %164 = vrot.lane.b32.xlu1 %v4959_v25, %s4855_s0 }
  0x98   :  { %652 = vrot.lane.b32.xlu0 %v4963_v30, %s4859_s21 }
  0x99   :  { %415 = vrot.lane.b32.xlu1 %v4959_v25, %s4857_s19 }
  0x9c   :  { %901 = vrot.lane.b32.xlu0 %v4963_v30, %s4860_s22 }
  0x9d   :  { %1154 = vrot.lane.b32.xlu1 %v4953_v23, %s4863_s26 }
  0xa0   :  { %1150 = vrot.lane.b32.xlu0 %v4963_v30, %s4863_s26 }
  0xa1   :  { %660 = vrot.lane.b32.xlu1 %v4956_v24, %s4859_s21 }
  0xa4   :  { %284 = vrot.lane.b32.xlu0 %v4953_v23, %s4856_s18 }
  0xa5   :  { %909 = vrot.lane.b32.xlu1 %v4956_v24, %s4860_s22 }
  0xa8   :  { %534 = vrot.lane.b32.xlu0 %v4953_v23, %s4858_s20 }
  0xa9   :  { %787 = vrot.lane.b32.xlu1 %v4956_v24, %s4861_s23 }
  0xac   :  { %288 = vrot.lane.b32.xlu0 %v4956_v24, %s4856_s18 }
  0xad   :  { %278 = vrot.lane.b32.xlu1 %v268_v49, %s4856_s18 }
  0xb0   :  { %538 = vrot.lane.b32.xlu0 %v4956_v24, %s4858_s20 }
  0xb1   :  { %528 = vrot.lane.b32.xlu1 %v268_v49, %s4858_s20 }
  0xb4   :  { %783 = vrot.lane.b32.xlu0 %v4953_v23, %s4861_s23 }
  0xb5   :  { %777 = vrot.lane.b32.xlu1 %v268_v49, %s4861_s23 }
  0xb8   :  { %1032 = vrot.lane.b32.xlu0 %v4953_v23, %s4862_s24 }
  0xb9   :  { %1026 = vrot.lane.b32.xlu1 %v268_v49, %s4862_s24 }
  0xbc   :  { %664 = vrot.lane.b32.xlu0 %v4959_v25, %s4859_s21 }
  0xbd   :  { %282 = vrot.lane.b32.xlu1 %v269_v50, %s4856_s18 }
  0xc0   :  { %154 = vrot.lane.b32.xlu0 %v143_v51, %s4855_s0 }
  0xc1   :  { %532 = vrot.lane.b32.xlu1 %v269_v50, %s4858_s20 }
  0xc4   :  { %405 = vrot.lane.b32.xlu0 %v143_v51, %s4857_s19 }
  0xc5   :  { %781 = vrot.lane.b32.xlu1 %v269_v50, %s4861_s23 }
  0xc8   :  { %654 = vrot.lane.b32.xlu0 %v143_v51, %s4859_s21 }
  0xc9   :  { %1030 = vrot.lane.b32.xlu1 %v269_v50, %s4862_s24 }
  0xcc   :  { %903 = vrot.lane.b32.xlu0 %v143_v51, %s4860_s22 }
  0xcd   :  { %286 = vrot.lane.b32.xlu1 %v270_v52, %s4856_s18 }
  0xd0   :  { %1152 = vrot.lane.b32.xlu0 %v143_v51, %s4863_s26 }
  0xd1   :  { %536 = vrot.lane.b32.xlu1 %v270_v52, %s4858_s20 }
  0xd4   :  { %158 = vrot.lane.b32.xlu0 %v144_v53, %s4855_s0 }
  0xd5   :  { %290 = vrot.lane.b32.xlu1 %v271_v54, %s4856_s18 }
  0xd8   :  { %409 = vrot.lane.b32.xlu0 %v144_v53, %s4857_s19 }
  0xd9   :  { %540 = vrot.lane.b32.xlu1 %v271_v54, %s4858_s20 }
  0xdc   :  { %162 = vrot.lane.b32.xlu0 %v145_v55, %s4855_s0 }
  0xdd   :  { %785 = vrot.lane.b32.xlu1 %v270_v52, %s4861_s23 }
  0xe0   :  { %413 = vrot.lane.b32.xlu0 %v145_v55, %s4857_s19 }
  0xe1   :  { %1034 = vrot.lane.b32.xlu1 %v270_v52, %s4862_s24 }
  0xe4   :  { %658 = vrot.lane.b32.xlu0 %v144_v53, %s4859_s21 }
  0xe5   :  { %662 = vrot.lane.b32.xlu1 %v145_v55, %s4859_s21 }
  0xe8   :  { %907 = vrot.lane.b32.xlu0 %v144_v53, %s4860_s22 }
  0xe9   :  { %911 = vrot.lane.b32.xlu1 %v145_v55, %s4860_s22 }
  0xec   :  { %789 = vrot.lane.b32.xlu0 %v271_v54, %s4861_s23 }
  0xed   :  { %1036 = vrot.lane.b32.xlu1 %v4956_v24, %s4862_s24 }
  0xef   :  { %v5086_v56 = vpop.permute.xlu1 %156 }
  0xf0   :  { %913 = vrot.lane.b32.xlu0 %v4959_v25, %s4860_s22 }
  0xf1   :  { %1156 = vrot.lane.b32.xlu1 %v144_v53, %s4863_s26 }
  0xf2   :  { %v5091_v57 = vpop.permute.xlu0 %280 }
  0xf3   :  { %v5093_v58 = vpop.permute.xlu1 %407 }
  0xf4   :  { %1038 = vrot.lane.b32.xlu0 %v271_v54, %s4862_s24 }
  0xf5   :  { %1160 = vrot.lane.b32.xlu1 %v145_v55, %s4863_s26 }
  0xf6   :  { %v5097_v59 = vpop.permute.xlu0 %530 }
  0xf7   :  { %v5103_v61 = vpop.permute.xlu1 %656 }
  0xf8   :  { %1158 = vrot.lane.b32.xlu0 %v4956_v24, %s4863_s26 }
  0xf9   :  { %166 = vrot.lane.b32.xlu1 %v5101_v60, %s4855_s0 }
  0xfa   :  { %v5109_v62 = vpop.permute.xlu0 %152 }
  0xfb   :  { %v5111_v63 = vpop.permute.xlu1 %905 }
  0xfc   :  { %1162 = vrot.lane.b32.xlu0 %v4959_v25, %s4863_s26 }
  0xfd   :  { %292 = vrot.lane.b32.xlu1 %v4959_v25, %s4856_s18 }
  0xfe   :  { %v5117_v0 = vpop.permute.xlu0 %403 }
  0xff   :  { %v5119_v1 = vpop.permute.xlu1 %160 }
 0x100   :  { %168 = vrot.lane.b32.xlu0 %v4969_v32, %s4855_s0 }
 0x101   :  { %417 = vrot.lane.b32.xlu1 %v5101_v60, %s4857_s19 }
 0x102   :  { %v5125_v3 = vpop.permute.xlu0 %779 }
 0x103   :  { %v5129_v5 = vpop.permute.xlu1 %411 }
 0x104   :  { %294 = vrot.lane.b32.xlu0 %v272_v4, %s4856_s18 }
 0x105   :  { %542 = vrot.lane.b32.xlu1 %v4959_v25, %s4858_s20 }
 0x106   :  { %v5134_v6 = vpop.permute.xlu0 %1028 }
 0x107   :  { %v5140_v8 = vpop.permute.xlu1 %164 }
 0x108   :  { %419 = vrot.lane.b32.xlu0 %v4969_v32, %s4857_s19 }
 0x109   :  { %170 = vrot.lane.b32.xlu1 %v5138_v7, %s4855_s0 }
 0x10a   :  { %v5146_v9 = vpop.permute.xlu0 %652 }
 0x10b   :  { %v5148_v10 = vpop.permute.xlu1 %415 }
 0x10c   :  { %544 = vrot.lane.b32.xlu0 %v272_v4, %s4858_s20 }
 0x10d   :  { %296 = vrot.lane.b32.xlu1 %v4969_v32, %s4856_s18 }
 0x10e   :  { %v5153_v11 = vpop.permute.xlu0 %901 }
 0x10f   :  { %v5155_v12 = vpop.permute.xlu1 %1154 }
 0x110   :  { %172 = vrot.lane.b32.xlu0 %v4975_v36, %s4855_s0 }
 0x111   :  { %421 = vrot.lane.b32.xlu1 %v5138_v7, %s4857_s19 }
 0x112   :  { %v5161_v13 = vpop.permute.xlu0 %1150 }
 0x113   :  { %v5167_v15 = vpop.permute.xlu1 %660 }
 0x114   :  { %298 = vrot.lane.b32.xlu0 %v5165_v14, %s4856_s18 }
 0x115   :  { %546 = vrot.lane.b32.xlu1 %v4969_v32, %s4858_s20 }
 0x116   :  { %v5173_v16 = vpop.permute.xlu0 %284 }
 0x117   :  { %v5175_v17 = vpop.permute.xlu1 %909 }
 0x118   :  { %423 = vrot.lane.b32.xlu0 %v4975_v36, %s4857_s19 }
 0x119   :  { %666 = vrot.lane.b32.xlu1 %v5101_v60, %s4859_s21 }
 0x11a   :  { %v5181_v18 = vpop.permute.xlu0 %534 }
 0x11b   :  { %v5183_v19 = vpop.permute.xlu1 %787 }
 0x11c   :  { %548 = vrot.lane.b32.xlu0 %v5165_v14, %s4858_s20 }
 0x11d   :  { %791 = vrot.lane.b32.xlu1 %v4959_v25, %s4861_s23 }
 0x11e   :  { %v5189_v20 = vpop.permute.xlu0 %288 }
 0x11f   :  { %v279_v21 = vpop.permute.xlu1 %278 }
 0x120   :  { %668 = vrot.lane.b32.xlu0 %v4969_v32, %s4859_s21  ;;  %v317_v22 = vsel %vm316_vm8, %v279_v21, %v5091_v57 }
 0x121   :  { %354 = vst [vmem:[#allocation4] sm:$0xf0] %v317_v22  ;;  %915 = vrot.lane.b32.xlu1 %v5101_v60, %s4860_s22 }
 0x122   :  { %v5197_v23 = vpop.permute.xlu0 %538 }
 0x123   :  { %v529_v24 = vpop.permute.xlu1 %528 }
 0x124   :  { %793 = vrot.lane.b32.xlu0 %v272_v4, %s4861_s23  ;;  %v567_v26 = vsel %vm566_vm9, %v529_v24, %v5097_v59 }
 0x125   :  { %604 = vst [vmem:[#allocation4 + $0x98] sm:$0xf0] %v567_v26  ;;  %1040 = vrot.lane.b32.xlu1 %v4959_v25, %s4862_s24 }
 0x126   :  { %v5204_v27 = vpop.permute.xlu0 %783 }
 0x127   :  { %v778_v28 = vpop.permute.xlu1 %777 }
 0x128   :  { %917 = vrot.lane.b32.xlu0 %v4969_v32, %s4860_s22  ;;  %v816_v29 = vsel %vm815_vm10, %v778_v28, %v5125_v3 }
 0x129   :  { %853 = vst [vmem:[#allocation4 + $0x130] sm:$0xf0] %v816_v29  ;;  %670 = vrot.lane.b32.xlu1 %v5138_v7, %s4859_s21 }
 0x12a   :  { %v5212_v30 = vpop.permute.xlu0 %1032 }
 0x12b   :  { %v1027_v31 = vpop.permute.xlu1 %1026 }
 0x12c   :  { %1042 = vrot.lane.b32.xlu0 %v272_v4, %s4862_s24  ;;  %v1065_v25 = vsel %vm1064_vm11, %v1027_v31, %v5134_v6 }
 0x12d   :  { %1102 = vst [vmem:[#allocation4 + $0x1c8] sm:$0xf0] %v1065_v25  ;;  %795 = vrot.lane.b32.xlu1 %v4969_v32, %s4861_s23 }
 0x12e   :  { %v5219_v33 = vpop.permute.xlu0 %664 }
 0x12f   :  { %v283_v34 = vpop.permute.xlu1 %282 }
 0x130   :  { %672 = vrot.lane.b32.xlu0 %v4975_v36, %s4859_s21  ;;  %v318_v35 = vsel %vm316_vm8, %v5091_v57, %v283_v34  ;;  %v319_v37 = vsel %vm316_vm8, %v283_v34, %v5173_v16 }
 0x131   :  { %355 = vst [vmem:[#allocation4 + $0x8] sm:$0xf0] %v318_v35  ;;  %356 = vst [vmem:[#allocation4 + $0x10] sm:$0xf0] %v319_v37  ;;  %919 = vrot.lane.b32.xlu1 %v5138_v7, %s4860_s22 }
 0x132   :  { %v155_v38 = vpop.permute.xlu0 %154 }
 0x133   :  { %v191_v39 = vsel %vm190_vm12, %v5109_v62, %v155_v38  ;;  %v192_v40 = vsel %vm190_vm12, %v155_v38, %v5086_v56  ;;  %v533_v43 = vpop.permute.xlu1 %532 }
 0x134   :  { %228 = vst [vmem:[#allocation4] sm:$0xf] %v191_v39  ;;  %229 = vst [vmem:[#allocation4 + $0x8] sm:$0xf] %v192_v40  ;;  %797 = vrot.lane.b32.xlu0 %v5165_v14, %s4861_s23  ;;  %v568_v44 = vsel %vm566_vm9, %v5097_v59, %v533_v43  ;;  %v569_v45 = vsel %vm566_vm9, %v533_v43, %v5181_v18 }
 0x135   :  { %605 = vst [vmem:[#allocation4 + $0xa0] sm:$0xf0] %v568_v44  ;;  %606 = vst [vmem:[#allocation4 + $0xa8] sm:$0xf0] %v569_v45  ;;  %1044 = vrot.lane.b32.xlu1 %v4969_v32, %s4862_s24 }
 0x136   :  { %v406_v46 = vpop.permute.xlu0 %405 }
 0x137   :  { %v442_v47 = vsel %vm441_vm13, %v5117_v0, %v406_v46  ;;  %v443_v49 = vsel %vm441_vm13, %v406_v46, %v5093_v58  ;;  %v782_v50 = vpop.permute.xlu1 %781  ;;  %v5308_v46 = vcombine.low %v4982_v41, %v4982_v41 }
 0x138   :  { %479 = vst [vmem:[#allocation4 + $0x98] sm:$0xf] %v442_v47  ;;  %480 = vst [vmem:[#allocation4 + $0xa0] sm:$0xf] %v443_v49  ;;  %921 = vrot.lane.b32.xlu0 %v4975_v36, %s4860_s22  ;;  %v817_v51 = vsel %vm815_vm10, %v5125_v3, %v782_v50  ;;  %v818_v52 = vsel %vm815_vm10, %v782_v50, %v5204_v27  ;;  %v5267_v3 = vcombine.high %v4975_v36, %v4975_v36 }
 0x139   :  { %854 = vst [vmem:[#allocation4 + $0x138] sm:$0xf0] %v817_v51  ;;  %855 = vst [vmem:[#allocation4 + $0x140] sm:$0xf0] %v818_v52  ;;  %1164 = vrot.lane.b32.xlu1 %v5101_v60, %s4863_s26 }
 0x13a   :  { %v655_v53 = vpop.permute.xlu0 %654 }
 0x13b   :  { %v691_v54 = vsel %vm690_vm14, %v5146_v9, %v655_v53  ;;  %v692_v55 = vsel %vm690_vm14, %v655_v53, %v5103_v61  ;;  %v1031_v57 = vpop.permute.xlu1 %1030  ;;  %v1247_v0 = vld [vmem:[#allocation4 + $0x8] sm:$0xff]  ;;  %v1246_v21 = vld [vmem:[#allocation4] sm:$0xff] }
 0x13c   :  { %728 = vst [vmem:[#allocation4 + $0x130] sm:$0xf] %v691_v54  ;;  %729 = vst [vmem:[#allocation4 + $0x138] sm:$0xf] %v692_v55  ;;  %1046 = vrot.lane.b32.xlu0 %v5165_v14, %s4862_s24  ;;  %v1066_v59 = vsel %vm1064_vm11, %v5134_v6, %v1031_v57  ;;  %v1067_v60 = vsel %vm1064_vm11, %v1031_v57, %v5212_v30  ;;  %v5331_v54 = vcombine.high %v4982_v41, %v4982_v41 }
 0x13d   :  { %1103 = vst [vmem:[#allocation4 + $0x1d0] sm:$0xf0] %v1066_v59  ;;  %1104 = vst [vmem:[#allocation4 + $0x1d8] sm:$0xf0] %v1067_v60  ;;  %1168 = vrot.lane.b32.xlu1 %v5138_v7, %s4863_s26 }
 0x13e   :  { %v904_v62 = vpop.permute.xlu0 %903 }
 0x13f   :  { %v940_v4 = vsel %vm939_vm15, %v5153_v11, %v904_v62  ;;  %v941_v6 = vsel %vm939_vm15, %v904_v62, %v5111_v63  ;;  %v287_v9 = vpop.permute.xlu1 %286  ;;  %v1266_v14 = vld [vmem:[#allocation4 + $0xa0] sm:$0xff]  ;;  %v1265_v22 = vld [vmem:[#allocation4 + $0x98] sm:$0xff] }
 0x140   :  { %977 = vst [vmem:[#allocation4 + $0x1c8] sm:$0xf] %v940_v4  ;;  %978 = vst [vmem:[#allocation4 + $0x1d0] sm:$0xf] %v941_v6  ;;  %1166 = vrot.lane.b32.xlu0 %v4969_v32, %s4863_s26  ;;  %v320_v7 = vsel %vm316_vm8, %v5173_v16, %v287_v9  ;;  %v321_v24 = vsel %vm316_vm8, %v287_v9, %v5189_v20  ;;  %v4591_v11 = vpack.c.bf16 %v1266_v14, %v1247_v0 }
 0x141   :  { %v4593_v26 = vpack.c.bf16 %v1265_v22, %v1246_v21  ;;  %357 = vst [vmem:[#allocation4 + $0x18] sm:$0xf0] %v320_v7  ;;  %358 = vst [vmem:[#allocation4 + $0x20] sm:$0xf0] %v321_v24  ;;  %174 = vrot.lane.b32.xlu1 %v5267_v3, %s4855_s0 }
 0x142   :  { %v1153_v28 = vpop.permute.xlu0 %1152  ;;  %4592 = vmatprep.subr.bf16.mxu0 %v4591_v11 }
 0x143   :  { %v1189_v29 = vsel %vm1188_vm0, %v5161_v13, %v1153_v28  ;;  %v1190_v32 = vsel %vm1188_vm0, %v1153_v28, %v5155_v12  ;;  %4594 = vmatpush1.bf16.msra.mxu0 %v4593_v26  ;;  %v537_v16 = vpop.permute.xlu1 %536  ;;  %v1285_v34 = vld [vmem:[#allocation4 + $0x138] sm:$0xff] }
 0x144   :  { %1226 = vst [vmem:[#allocation4 + $0x260] sm:$0xf] %v1189_v29  ;;  %1227 = vst [vmem:[#allocation4 + $0x268] sm:$0xf] %v1190_v32  ;;  %1170 = vrot.lane.b32.xlu0 %v4975_v36, %s4863_s26  ;;  %v570_v31 = vsel %vm566_vm9, %v5181_v18, %v537_v16  ;;  %v571_v25 = vsel %vm566_vm9, %v537_v16, %v5197_v23  ;;  %v1284_v18 = vld [vmem:[#allocation4 + $0x130] sm:$0xff]  ;;  %v5373_v29 = vcombine.low %v4985_v42, %v4985_v42 }
 0x145   :  { %607 = vst [vmem:[#allocation4 + $0xb0] sm:$0xf0] %v570_v31  ;;  %608 = vst [vmem:[#allocation4 + $0xb8] sm:$0xf0] %v571_v25  ;;  %300 = vrot.lane.b32.xlu1 %v4975_v36, %s4856_s18 }
 0x146   :  { %v159_v13 = vpop.permute.xlu0 %158 }
 0x147   :  { %v193_v35 = vsel %vm190_vm12, %v5086_v56, %v159_v13  ;;  %v194_v37 = vsel %vm190_vm12, %v159_v13, %v5119_v1  ;;  %v5297_v38 = vpop.permute.xlu1 %290  ;;  %v1304_v39 = vld [vmem:[#allocation4 + $0x1d0] sm:$0xff]  ;;  %v1303_v40 = vld [vmem:[#allocation4 + $0x1c8] sm:$0xff] }
 0x148   :  { %230 = vst [vmem:[#allocation4 + $0x10] sm:$0xf] %v193_v35  ;;  %231 = vst [vmem:[#allocation4 + $0x18] sm:$0xf] %v194_v37  ;;  %176 = vrot.lane.b32.xlu0 %v4982_v41, %s4855_s0  ;;  %v322_v43 = vsel %vm316_vm8, %v5189_v20, %v5297_v38  ;;  %v4595_v44 = vpack.c.bf16 %v1304_v39, %v1285_v34  ;;  %v4597_v45 = vpack.c.bf16 %v1303_v40, %v1284_v18 }
 0x149   :  { %359 = vst [vmem:[#allocation4 + $0x28] sm:$0xf0] %v322_v43  ;;  %425 = vrot.lane.b32.xlu1 %v5267_v3, %s4857_s19 }
 0x14a   :  { %v410_v56 = vpop.permute.xlu0 %409  ;;  %4596 = vmatprep.subr.bf16.mxu0 %v4595_v44 }
 0x14b   :  { %v444_v47 = vsel %vm441_vm13, %v5093_v58, %v410_v56  ;;  %v445_v49 = vsel %vm441_vm13, %v410_v56, %v5129_v5  ;;  %4598 = vmatpush1.bf16.msra.mxu0 %v4597_v45  ;;  %v1323_v20 = vld [vmem:[#allocation4 + $0x268] sm:$0xf]  ;;  %v5314_v50 = vpop.permute.xlu1 %540  ;;  %v5327_v58 = vld [vmem:[%s6779_s1] sm:$0xff] }
 0x14c   :  { %481 = vst [vmem:[#allocation4 + $0xa8] sm:$0xf] %v444_v47  ;;  %482 = vst [vmem:[#allocation4 + $0xb0] sm:$0xf] %v445_v49  ;;  %302 = vrot.lane.b32.xlu0 %v5308_v46, %s4856_s18  ;;  %4502 = vmatprep.subr.msk.mxu0 %vm81_vm6, %v1323_v20  ;;  %v572_v51 = vsel %vm566_vm9, %v5197_v23, %v5314_v50  ;;  %v1322_v53 = vld [vmem:[#allocation4 + $0x260] sm:$0xf] }
 0x14d   :  { %609 = vst [vmem:[#allocation4 + $0xc0] sm:$0xf0] %v572_v51  ;;  %550 = vrot.lane.b32.xlu1 %v4975_v36, %s4858_s20 }
 0x14e   :  { %v163_v52 = vpop.permute.xlu0 %162 }
 0x14f   :  { %v195_v55 = vsel %vm190_vm12, %v5119_v1, %v163_v52  ;;  %v196_v23 = vsel %vm190_vm12, %v163_v52, %v5140_v8  ;;  %4503 = vmatpush1.msk.msra.mxu0 %vm81_vm6, %v1322_v53  ;;  %v786_v57 = vpop.permute.xlu1 %785  ;;  %v1249_v62 = vld [vmem:[#allocation4 + $0x18] sm:$0xff]  ;;  %v1248_v6 = vld [vmem:[#allocation4 + $0x10] sm:$0xff] }
 0x150   :  { %232 = vst [vmem:[#allocation4 + $0x20] sm:$0xf] %v195_v55  ;;  %233 = vst [vmem:[#allocation4 + $0x28] sm:$0xf] %v196_v23  ;;  %427 = vrot.lane.b32.xlu0 %v4982_v41, %s4857_s19  ;;  %v819_v59 = vsel %vm815_vm10, %v5204_v27, %v786_v57  ;;  %v820_v60 = vsel %vm815_vm10, %v786_v57, %v5183_v19  ;;  %4504 = vmatmul.mubr.msk.f32.vlgmr.msra.gmra.mrb[0].mxu0 %vm1347_vm2, %v5327_v58 }
 0x151   :  { %856 = vst [vmem:[#allocation4 + $0x148] sm:$0xf0] %v819_v59  ;;  %857 = vst [vmem:[#allocation4 + $0x150] sm:$0xf0] %v820_v60  ;;  %178 = vrot.lane.b32.xlu1 %v5331_v54, %s4855_s0  ;;  %1614 = vmatprep.mubr.f32.mxu0 %v4853_v2 }
 0x152   :  { %v414_v1 = vpop.permute.xlu0 %413 }
 0x153   :  { %v446_v0 = vsel %vm441_vm13, %v5129_v5, %v414_v1  ;;  %v447_v27 = vsel %vm441_vm13, %v414_v1, %v5148_v10  ;;  %v1268_v4 = vld [vmem:[#allocation4 + $0xb0] sm:$0xff]  ;;  %v1267_v9 = vld [vmem:[#allocation4 + $0xa8] sm:$0xff]  ;;  %v1035_v14 = vpop.permute.xlu1 %1034 }
 0x154   :  { %483 = vst [vmem:[#allocation4 + $0xb8] sm:$0xf] %v446_v0  ;;  %484 = vst [vmem:[#allocation4 + $0xc0] sm:$0xf] %v447_v27  ;;  %552 = vrot.lane.b32.xlu0 %v5308_v46, %s4858_s20  ;;  %v4599_v21 = vpack.c.bf16 %v1268_v4, %v1249_v62  ;;  %v4601_v22 = vpack.c.bf16 %v1267_v9, %v1248_v6  ;;  %v1068_v7 = vsel %vm1064_vm11, %v5212_v30, %v1035_v14 }
 0x155   :  { %1105 = vst [vmem:[#allocation4 + $0x1e0] sm:$0xf0] %v1068_v7  ;;  %304 = vrot.lane.b32.xlu1 %v4982_v41, %s4856_s18 }
 0x156   :  { %v659_v5 = vpop.permute.xlu0 %658  ;;  %4600 = vmatprep.subr.bf16.mxu1 %v4599_v21 }
 0x157   :  { %v693_v24 = vsel %vm690_vm14, %v5103_v61, %v659_v5  ;;  %v694_v11 = vsel %vm690_vm14, %v659_v5, %v5167_v15  ;;  %4602 = vmatpush1.bf16.msra.mxu1 %v4601_v22  ;;  %v663_v26 = vpop.permute.xlu1 %662  ;;  %v1251_v32 = vld [vmem:[#allocation4 + $0x28] sm:$0xff]  ;;  %v1250_v25 = vld [vmem:[#allocation4 + $0x20] sm:$0xff] }
 0x158   :  { %730 = vst [vmem:[#allocation4 + $0x140] sm:$0xf] %v693_v24  ;;  %731 = vst [vmem:[#allocation4 + $0x148] sm:$0xf] %v694_v11  ;;  %180 = vrot.lane.b32.xlu0 %v4985_v42, %s4855_s0  ;;  %v695_v30 = vsel %vm690_vm14, %v5167_v15, %v663_v26  ;;  %v696_v28 = vsel %vm690_vm14, %v663_v26, %v5219_v33 }
 0x159   :  { %732 = vst [vmem:[#allocation4 + $0x150] sm:$0xf] %v695_v30  ;;  %733 = vst [vmem:[#allocation4 + $0x158] sm:$0xf] %v696_v28  ;;  %429 = vrot.lane.b32.xlu1 %v5331_v54, %s4857_s19 }
 0x15a   :  { %v908_v61 = vpop.permute.xlu0 %907 }
 0x15b   :  { %v942_v16 = vsel %vm939_vm15, %v5111_v63, %v908_v61  ;;  %v943_v15 = vsel %vm939_vm15, %v908_v61, %v5175_v17  ;;  %v1270_v31 = vld [vmem:[#allocation4 + $0xc0] sm:$0xff]  ;;  %v1269_v13 = vld [vmem:[#allocation4 + $0xb8] sm:$0xff]  ;;  %v912_v34 = vpop.permute.xlu1 %911 }
 0x15c   :  { %979 = vst [vmem:[#allocation4 + $0x1d8] sm:$0xf] %v942_v16  ;;  %980 = vst [vmem:[#allocation4 + $0x1e0] sm:$0xf] %v943_v15  ;;  %306 = vrot.lane.b32.xlu0 %v5373_v29, %s4856_s18  ;;  %v4607_v35 = vpack.c.bf16 %v1270_v31, %v1251_v32  ;;  %v4609_v37 = vpack.c.bf16 %v1269_v13, %v1250_v25  ;;  %v944_v39 = vsel %vm939_vm15, %v5175_v17, %v912_v34 }
 0x15d   :  { %981 = vst [vmem:[#allocation4 + $0x1e8] sm:$0xf] %v944_v39  ;;  %554 = vrot.lane.b32.xlu1 %v4982_v41, %s4858_s20 }
 0x15e   :  { %v5385_v63 = vpop.permute.xlu0 %789  ;;  %4608 = vmatprep.subr.bf16.mxu0 %v4607_v35 }
 0x15f   :  { %v821_v18 = vsel %vm815_vm10, %v5183_v19, %v5385_v63  ;;  %4610 = vmatpush1.bf16.msra.mxu0 %v4609_v37  ;;  %v1037_v40 = vpop.permute.xlu1 %1036  ;;  %v1287_v44 = vld [vmem:[#allocation4 + $0x148] sm:$0xff]  ;;  %v1286_v19 = vld [vmem:[#allocation4 + $0x140] sm:$0xff] }
 0x160   :  { %858 = vst [vmem:[#allocation4 + $0x158] sm:$0xf0] %v821_v18  ;;  %431 = vrot.lane.b32.xlu0 %v4985_v42, %s4857_s19  ;;  %v1069_v43 = vsel %vm1064_vm11, %v1035_v14, %v1037_v40  ;;  %v1288_v21 = vld [vmem:[#allocation4 + $0x150] sm:$0xff] }
 0x161   :  { %1106 = vst [vmem:[#allocation4 + $0x1e8] sm:$0xf0] %v1069_v43  ;;  %674 = vrot.lane.b32.xlu1 %v5267_v3, %s4859_s21 }
 0x162   :  { %v5395_v17 = vpop.permute.xlu0 %913 }
 0x163   :  { %v945_v45 = vsel %vm939_vm15, %v912_v34, %v5395_v17  ;;  %v1306_v56 = vld [vmem:[#allocation4 + $0x1e0] sm:$0xff]  ;;  %v1305_v47 = vld [vmem:[#allocation4 + $0x1d8] sm:$0xff]  ;;  %v1157_v49 = vpop.permute.xlu1 %1156 }
 0x164   :  { %982 = vst [vmem:[#allocation4 + $0x1f0] sm:$0xf] %v945_v45  ;;  %556 = vrot.lane.b32.xlu0 %v5373_v29, %s4858_s20  ;;  %v4603_v20 = vpack.c.bf16 %v1306_v56, %v1287_v44  ;;  %v4605_v51 = vpack.c.bf16 %v1305_v47, %v1286_v19  ;;  %v1191_v52 = vsel %vm1188_vm0, %v5155_v12, %v1157_v49 }
 0x165   :  { %1228 = vst [vmem:[#allocation4 + $0x270] sm:$0xf] %v1191_v52  ;;  %799 = vrot.lane.b32.xlu1 %v4975_v36, %s4861_s23 }
 0x166   :  { %v5405_v53 = vpop.permute.xlu0 %1038  ;;  %4604 = vmatprep.subr.bf16.mxu1 %v4603_v20 }
 0x167   :  { %v1070_v55 = vsel %vm1064_vm11, %v1037_v40, %v5405_v53  ;;  %4606 = vmatpush1.bf16.msra.mxu1 %v4605_v51  ;;  %v1161_v23 = vpop.permute.xlu1 %1160  ;;  %v1289_v4 = vld [vmem:[#allocation4 + $0x158] sm:$0xff] }
 0x168   :  { %1107 = vst [vmem:[#allocation4 + $0x1f0] sm:$0xf0] %v1070_v55  ;;  %676 = vrot.lane.b32.xlu0 %v4982_v41, %s4859_s21  ;;  %v1307_v0 = vld [vmem:[#allocation4 + $0x1e8] sm:$0xff] }
 0x169   :  { %923 = vrot.lane.b32.xlu1 %v5267_v3, %s4860_s22  ;;  %v4613_v22 = vpack.c.bf16 %v1307_v0, %v1288_v21 }
 0x16a   :  { %v1159_v12 = vpop.permute.xlu0 %1158 }
 0x16b   :  { %v1192_v57 = vsel %vm1188_vm0, %v1157_v49, %v1159_v12  ;;  %v1193_v59 = vsel %vm1188_vm0, %v1159_v12, %v1161_v23  ;;  %v167_v60 = vpop.permute.xlu1 %166 }
 0x16c   :  { %1229 = vst [vmem:[#allocation4 + $0x278] sm:$0xf] %v1192_v57  ;;  %801 = vrot.lane.b32.xlu0 %v5308_v46, %s4861_s23  ;;  %1230 = vst [vmem:[#allocation4 + $0x280] sm:$0xf] %v1193_v59  ;;  %v197_v1 = vsel %vm190_vm12, %v5140_v8, %v167_v60  ;;  %v1324_v11 = vld [vmem:[#allocation4 + $0x270] sm:$0xf]  ;;  %v276_v59 = vcombine.low %v4995_v48, %v4995_v48 }
 0x16d   :  { %234 = vst [vmem:[#allocation4 + $0x30] sm:$0xf] %v197_v1  ;;  %1048 = vrot.lane.b32.xlu1 %v4975_v36, %s4862_s24 }
 0x16e   :  { %v5421_v62 = vpop.permute.xlu0 %1162 }
 0x16f   :  { %v1194_v27 = vsel %vm1188_vm0, %v1161_v23, %v5421_v62  ;;  %v1308_v6 = vld [vmem:[#allocation4 + $0x1f0] sm:$0xff]  ;;  %v293_v9 = vpop.permute.xlu1 %292 }
 0x170   :  { %1231 = vst [vmem:[#allocation4 + $0x288] sm:$0xf] %v1194_v27  ;;  %925 = vrot.lane.b32.xlu0 %v4982_v41, %s4860_s22  ;;  %v4611_v14 = vpack.c.bf16 %v1308_v6, %v1289_v4  ;;  %v323_v8 = vsel %vm316_vm8, %v5297_v38, %v293_v9  ;;  %v151_v4 = vcombine.high %v4995_v48, %v4995_v48 }
 0x171   :  { %360 = vst [vmem:[#allocation4 + $0x30] sm:$0xf0] %v323_v8  ;;  %678 = vrot.lane.b32.xlu1 %v5331_v54, %s4859_s21 }
 0x172   :  { %v169_v36 = vpop.permute.xlu0 %168  ;;  %4612 = vmatprep.subr.bf16.mxu0 %v4611_v14 }
 0x173   :  { %v198_v7 = vsel %vm190_vm12, %v167_v60, %v169_v36  ;;  %4614 = vmatpush1.bf16.msra.mxu0 %v4613_v22  ;;  %v1325_v5 = vld [vmem:[#allocation4 + $0x278] sm:$0xf]  ;;  %v418_v24 = vpop.permute.xlu1 %417 }
 0x174   :  { %235 = vst [vmem:[#allocation4 + $0x38] sm:$0xf] %v198_v7  ;;  %1050 = vrot.lane.b32.xlu0 %v5308_v46, %s4862_s24  ;;  %4505 = vmatprep.subr.msk.mxu1 %vm81_vm6, %v1325_v5  ;;  %v448_v38 = vsel %vm441_vm13, %v5148_v10, %v418_v24  ;;  %v1326_v10 = vld [vmem:[#allocation4 + $0x280] sm:$0xf] }
 0x175   :  { %4506 = vmatpush1.msk.msra.mxu1 %vm81_vm6, %v1324_v11  ;;  %485 = vst [vmem:[#allocation4 + $0xc8] sm:$0xf] %v448_v38  ;;  %803 = vrot.lane.b32.xlu1 %v4982_v41, %s4861_s23  ;;  %v132_v38 = vld [vmem:[#allocation2 + $0x48] sm:$0xf] }
 0x176   :  { %v295_v26 = vpop.permute.xlu0 %294  ;;  %4507 = vmatmul.mubr.msk.f32.vlgmr.msra.gmra.mrb[0].mxu1 %vm1347_vm2, %v5327_v58 }
 0x177   :  { %v324_v30 = vsel %vm316_vm8, %v293_v9, %v295_v26  ;;  %v1327_v28 = vld [vmem:[#allocation4 + $0x288] sm:$0xf]  ;;  %v543_v46 = vpop.permute.xlu1 %542  ;;  %1685 = vmatprep.mubr.f32.mxu1 %v4853_v2 }
 0x178   :  { %361 = vst [vmem:[#allocation4 + $0x38] sm:$0xf0] %v324_v30  ;;  %680 = vrot.lane.b32.xlu0 %v4985_v42, %s4859_s21  ;;  %4508 = vmatprep.subr.msk.mxu0 %vm81_vm6, %v1327_v28  ;;  %v573_v61 = vsel %vm566_vm9, %v5314_v50, %v543_v46  ;;  %v1252_v47 = vld [vmem:[#allocation4 + $0x30] sm:$0xff]  ;;  %v4864_v28 = vmov 0  }
 0x179   :  { %4509 = vmatpush1.msk.msra.mxu0 %vm81_vm6, %v1326_v10  ;;  %610 = vst [vmem:[#allocation4 + $0xc8] sm:$0xf0] %v573_v61  ;;  %927 = vrot.lane.b32.xlu1 %v5331_v54, %s4860_s22  ;;  %v4843_v10 = vld [vmem:[#allocation2 + $0x48] ss:$0 sps:$4 sm:$0xff]  }
 0x17a   :  { %v420_v32 = vpop.permute.xlu0 %419  ;;  %4510 = vmatmul.mubr.msk.f32.vlgmr.msra.gmra.mrb[2].mxu0 %vm1347_vm2, %v5327_v58  ;;  %4839 = vset.pattern.permute.xlu1 %v4864_v28 }
 0x17b   :  { %v449_v16 = vsel %vm441_vm13, %v418_v24, %v420_v32  ;;  %v171_v15 = vpop.permute.xlu1 %170  ;;  %1756 = vmatprep.mubr.f32.mxu0 %v4853_v2  ;;  %4840 = vset.pattern.permute.xlu0 %v4864_v28 }
 0x17c   :  { %486 = vst [vmem:[#allocation4 + $0xd0] sm:$0xf] %v449_v16  ;;  %805 = vrot.lane.b32.xlu0 %v5373_v29, %s4861_s23  ;;  %v199_v50 = vsel %vm190_vm12, %v169_v36, %v171_v15  ;;  %v4849_v16 = vld [vmem:[#allocation2 + $0x40] sm:$0xff] }
 0x17d   :  { %236 = vst [vmem:[#allocation4 + $0x40] sm:$0xf] %v199_v50  ;;  %1052 = vrot.lane.b32.xlu1 %v4982_v41, %s4862_s24 }
 0x17e   :  { %v545_v31 = vpop.permute.xlu0 %544 }
 0x17f   :  { %v574_v25 = vsel %vm566_vm9, %v543_v46, %v545_v31  ;;  %v297_v13 = vpop.permute.xlu1 %296  ;;  %v1253_v45 = vld [vmem:[#allocation4 + $0x38] sm:$0xff] }
 0x180   :  { %611 = vst [vmem:[#allocation4 + $0xd0] sm:$0xf0] %v574_v25  ;;  %929 = vrot.lane.b32.xlu0 %v4985_v42, %s4860_s22  ;;  %v325_v34 = vsel %vm316_vm8, %v295_v26, %v297_v13  ;;  %v1271_v43 = vld [vmem:[#allocation4 + $0xc8] sm:$0xff]  ;;  %v383_v25 = vld [vmem:[#allocation2 + $0x48] sm:$0xf] }
 0x181   :  { %362 = vst [vmem:[#allocation4 + $0x40] sm:$0xf0] %v325_v34  ;;  %1172 = vrot.lane.b32.xlu1 %v5267_v3, %s4863_s26  ;;  %v5480_v3 = vcombine.high %v4985_v42, %v4985_v42  ;;  %v4617_v49 = vpack.c.bf16 %v1271_v43, %v1252_v47 }
 0x182   :  { %v5467_v35 = vpop.permute.xlu0 %172 }
 0x183   :  { %v200_v37 = vsel %vm190_vm12, %v171_v15, %v5467_v35  ;;  %v422_v39 = vpop.permute.xlu1 %421 }
 0x184   :  { %237 = vst [vmem:[#allocation4 + $0x48] sm:$0xf] %v200_v37  ;;  %1054 = vrot.lane.b32.xlu0 %v5373_v29, %s4862_s24  ;;  %v450_v18 = vsel %vm441_vm13, %v420_v32, %v422_v39 }
 0x185   :  { %487 = vst [vmem:[#allocation4 + $0xd8] sm:$0xf] %v450_v18  ;;  %1176 = vrot.lane.b32.xlu1 %v5331_v54, %s4863_s26 }
 0x186   :  { %v5476_v40 = vpop.permute.xlu0 %298 }
 0x187   :  { %v326_v44 = vsel %vm316_vm8, %v297_v13, %v5476_v40  ;;  %v1272_v56 = vld [vmem:[#allocation4 + $0xd0] sm:$0xff]  ;;  %v547_v19 = vpop.permute.xlu1 %546 }
 0x188   :  { %363 = vst [vmem:[#allocation4 + $0x48] sm:$0xf0] %v326_v44  ;;  %1174 = vrot.lane.b32.xlu0 %v4982_v41, %s4863_s26  ;;  %v4615_v29 = vpack.c.bf16 %v1272_v56, %v1253_v45  ;;  %v575_v54 = vsel %vm566_vm9, %v545_v31, %v547_v19  ;;  %v4844_v56 = vld [vmem:[#allocation2 + $0x48] ss:$0 sps:$4 sm:$0xff]  }
 0x189   :  { %612 = vst [vmem:[#allocation4 + $0xd8] sm:$0xf0] %v575_v54  ;;  %182 = vrot.lane.b32.xlu1 %v5480_v3, %s4855_s0  ;;  %v4850_v54 = vld [vmem:[#allocation2 + $0x38] sm:$0xff] }
 0x18a   :  { %v5489_v20 = vpop.permute.xlu0 %423  ;;  %4616 = vmatprep.subr.bf16.mxu1 %v4615_v29 }
 0x18b   :  { %v451_v51 = vsel %vm441_vm13, %v422_v39, %v5489_v20  ;;  %4618 = vmatpush1.bf16.msra.mxu1 %v4617_v49  ;;  %v667_v52 = vpop.permute.xlu1 %666 }
 0x18c   :  { %488 = vst [vmem:[#allocation4 + $0xe0] sm:$0xf] %v451_v51  ;;  %1178 = vrot.lane.b32.xlu0 %v4985_v42, %s4863_s26  ;;  %v697_v41 = vsel %vm690_vm14, %v5219_v33, %v667_v52 }
 0x18d   :  { %734 = vst [vmem:[#allocation4 + $0x160] sm:$0xf] %v697_v41  ;;  %308 = vrot.lane.b32.xlu1 %v4985_v42, %s4856_s18 }
 0x18e   :  { %v5499_v55 = vpop.permute.xlu0 %548 }
 0x18f   :  { %v576_v23 = vsel %vm566_vm9, %v547_v19, %v5499_v55  ;;  %v792_v12 = vpop.permute.xlu1 %791  ;;  %v1255_v9 = vld [vmem:[#allocation4 + $0x48] sm:$0xff] }
 0x190   :  { %613 = vst [vmem:[#allocation4 + $0xe0] sm:$0xf0] %v576_v23  ;;  %184 = vrot.lane.b32.xlu0 %v4995_v48, %s4855_s0  ;;  %v822_v57 = vsel %vm815_vm10, %v5385_v63, %v792_v12  ;;  %v1273_v27 = vld [vmem:[#allocation4 + $0xd8] sm:$0xff] }
 0x191   :  { %859 = vst [vmem:[#allocation4 + $0x160] sm:$0xf0] %v822_v57  ;;  %433 = vrot.lane.b32.xlu1 %v5480_v3, %s4857_s19 }
 0x192   :  { %v669_v33 = vpop.permute.xlu0 %668 }
 0x193   :  { %v698_v60 = vsel %vm690_vm14, %v667_v52, %v669_v33  ;;  %v916_v1 = vpop.permute.xlu1 %915  ;;  %v5561_v52 = vld [vmem:[#allocation2 + $0x40] sm:$0xff] }
 0x194   :  { %735 = vst [vmem:[#allocation4 + $0x168] sm:$0xf] %v698_v60  ;;  %310 = vrot.lane.b32.xlu0 %v276_v59, %s4856_s18  ;;  %v946_v0 = vsel %vm939_vm15, %v5395_v17, %v916_v1  ;;  %v1254_v17 = vld [vmem:[#allocation4 + $0x40] sm:$0xff]  ;;  %v775_v23 = vcombine.low %v5561_v52, %v5561_v52 }
 0x195   :  { %983 = vst [vmem:[#allocation4 + $0x1f8] sm:$0xf] %v946_v0  ;;  %558 = vrot.lane.b32.xlu1 %v4985_v42, %s4858_s20  ;;  %v4625_v42 = vpack.c.bf16 %v1273_v27, %v1254_v17  ;;  %v5579_v0 = vcombine.high %v5561_v52, %v5561_v52 }
 0x196   :  { %v794_v63 = vpop.permute.xlu0 %793 }
 0x197   :  { %v823_v6 = vsel %vm815_vm10, %v792_v12, %v794_v63  ;;  %v1274_v14 = vld [vmem:[#allocation4 + $0xe0] sm:$0xff]  ;;  %v1041_v21 = vpop.permute.xlu1 %1040 }
 0x198   :  { %860 = vst [vmem:[#allocation4 + $0x168] sm:$0xf0] %v823_v6  ;;  %435 = vrot.lane.b32.xlu0 %v4995_v48, %s4857_s19  ;;  %v4623_v8 = vpack.c.bf16 %v1274_v14, %v1255_v9  ;;  %v1071_v22 = vsel %vm1064_vm11, %v5405_v53, %v1041_v21  ;;  %v1290_v18 = vld [vmem:[#allocation4 + $0x160] sm:$0xff] }
 0x199   :  { %1108 = vst [vmem:[#allocation4 + $0x1f8] sm:$0xf0] %v1071_v22  ;;  %186 = vrot.lane.b32.xlu1 %v151_v4, %s4855_s0 }
 0x19a   :  { %v918_v36 = vpop.permute.xlu0 %917  ;;  %4624 = vmatprep.subr.bf16.mxu0 %v4623_v8 }
 0x19b   :  { %v947_v7 = vsel %vm939_vm15, %v916_v1, %v918_v36  ;;  %4626 = vmatpush1.bf16.msra.mxu0 %v4625_v42  ;;  %v671_v5 = vpop.permute.xlu1 %670 }
 0x19c   :  { %984 = vst [vmem:[#allocation4 + $0x200] sm:$0xf] %v947_v7  ;;  %560 = vrot.lane.b32.xlu0 %v276_v59, %s4858_s20  ;;  %v699_v24 = vsel %vm690_vm14, %v669_v33, %v671_v5 }
 0x19d   :  { %736 = vst [vmem:[#allocation4 + $0x170] sm:$0xf] %v699_v24  ;;  %312 = vrot.lane.b32.xlu1 %v4995_v48, %s4856_s18  ;;  %v632_v24 = vld [vmem:[#allocation2 + $0x48] sm:$0xf] }
 0x19e   :  { %v1043_v53 = vpop.permute.xlu0 %1042 }
 0x19f   :  { %v1072_v11 = vsel %vm1064_vm11, %v1041_v21, %v1043_v53  ;;  %v796_v26 = vpop.permute.xlu1 %795  ;;  %v1291_v13 = vld [vmem:[#allocation4 + $0x168] sm:$0xff] }
 0x1a0   :  { %1109 = vst [vmem:[#allocation4 + $0x200] sm:$0xf0] %v1072_v11  ;;  %188 = vrot.lane.b32.xlu0 %v132_v38, %s4855_s0  ;;  %v824_v30 = vsel %vm815_vm10, %v794_v63, %v796_v26  ;;  %v1309_v50 = vld [vmem:[#allocation4 + $0x1f8] sm:$0xff] }
 0x1a1   :  { %861 = vst [vmem:[#allocation4 + $0x170] sm:$0xf0] %v824_v30  ;;  %437 = vrot.lane.b32.xlu1 %v151_v4, %s4857_s19  ;;  %v4621_v44 = vpack.c.bf16 %v1309_v50, %v1290_v18  ;;  %v4847_v30 = vld [vmem:[#allocation2 + $0x48] ss:$0 sps:$4 sm:$0xff]  }
 0x1a2   :  { %v5534_v46 = vpop.permute.xlu0 %672 }
 0x1a3   :  { %v700_v48 = vsel %vm690_vm14, %v671_v5, %v5534_v46  ;;  %v920_v61 = vpop.permute.xlu1 %919 }
 0x1a4   :  { %737 = vst [vmem:[#allocation4 + $0x178] sm:$0xf] %v700_v48  ;;  %314 = vrot.lane.b32.xlu0 %v4843_v10, %s4856_s18  ;;  %v948_v32 = vsel %vm939_vm15, %v918_v36, %v920_v61 }
 0x1a5   :  { %985 = vst [vmem:[#allocation4 + $0x208] sm:$0xf] %v948_v32  ;;  %562 = vrot.lane.b32.xlu1 %v4849_v16, %s4858_s20  ;;  %v881_v32 = vld [vmem:[#allocation2 + $0x48] sm:$0xf] }
 0x1a6   :  { %v5541_v15 = vpop.permute.xlu0 %797 }
 0x1a7   :  { %v825_v31 = vsel %vm815_vm10, %v796_v26, %v5541_v15  ;;  %v1310_v34 = vld [vmem:[#allocation4 + $0x200] sm:$0xff]  ;;  %v1045_v37 = vpop.permute.xlu1 %1044 }
 0x1a8   :  { %862 = vst [vmem:[#allocation4 + $0x178] sm:$0xf0] %v825_v31  ;;  %439 = vrot.lane.b32.xlu0 %v383_v25, %s4857_s19  ;;  %v4619_v39 = vpack.c.bf16 %v1310_v34, %v1291_v13  ;;  %v1073_v43 = vsel %vm1064_vm11, %v1043_v53, %v1045_v37  ;;  %v1292_v9 = vld [vmem:[#allocation4 + $0x170] sm:$0xff]  ;;  %v4848_v25 = vld [vmem:[#allocation2 + $0x48] ss:$0 sps:$4 sm:$0xff]  }
 0x1a9   :  { %1110 = vst [vmem:[#allocation4 + $0x208] sm:$0xf0] %v1073_v43  ;;  %682 = vrot.lane.b32.xlu1 %v5480_v3, %s4859_s21 }
 0x1aa   :  { %v5549_v45 = vpop.permute.xlu0 %921  ;;  %4620 = vmatprep.subr.bf16.mxu1 %v4619_v39 }
 0x1ab   :  { %v949_v19 = vsel %vm939_vm15, %v920_v61, %v5549_v45  ;;  %4622 = vmatpush1.bf16.msra.mxu1 %v4621_v44  ;;  %v1165_v29 = vpop.permute.xlu1 %1164 }
 0x1ac   :  { %986 = vst [vmem:[#allocation4 + $0x210] sm:$0xf] %v949_v19  ;;  %564 = vrot.lane.b32.xlu0 %v4844_v56, %s4858_s20  ;;  %v1195_v47 = vsel %vm1188_vm0, %v5421_v62, %v1165_v29 }
 0x1ad   :  { %1232 = vst [vmem:[#allocation4 + $0x290] sm:$0xf] %v1195_v47  ;;  %807 = vrot.lane.b32.xlu1 %v4850_v54, %s4861_s23 }
 0x1ae   :  { %v5557_v49 = vpop.permute.xlu0 %1046 }
 0x1af   :  { %v1074_v51 = vsel %vm1064_vm11, %v1045_v37, %v5557_v49  ;;  %v1169_v41 = vpop.permute.xlu1 %1168  ;;  %v1293_v27 = vld [vmem:[#allocation4 + $0x178] sm:$0xff] }
 0x1b0   :  { %1111 = vst [vmem:[#allocation4 + $0x210] sm:$0xf0] %v1074_v51  ;;  %684 = vrot.lane.b32.xlu0 %v5561_v52, %s4859_s21  ;;  %v1311_v1 = vld [vmem:[#allocation4 + $0x208] sm:$0xff] }
 0x1b1   :  { %931 = vrot.lane.b32.xlu1 %v5480_v3, %s4860_s22  ;;  %v4629_v21 = vpack.c.bf16 %v1311_v1, %v1292_v9 }
 0x1b2   :  { %v1167_v62 = vpop.permute.xlu0 %1166 }
 0x1b3   :  { %v1196_v12 = vsel %vm1188_vm0, %v1165_v29, %v1167_v62  ;;  %v1197_v57 = vsel %vm1188_vm0, %v1167_v62, %v1169_v41  ;;  %v175_v33 = vpop.permute.xlu1 %174 }
 0x1b4   :  { %1233 = vst [vmem:[#allocation4 + $0x298] sm:$0xf] %v1196_v12  ;;  %809 = vrot.lane.b32.xlu0 %v775_v23, %s4861_s23  ;;  %1234 = vst [vmem:[#allocation4 + $0x2a0] sm:$0xf] %v1197_v57  ;;  %v201_v59 = vsel %vm190_vm12, %v5467_v35, %v175_v33  ;;  %v1328_v36 = vld [vmem:[#allocation4 + $0x290] sm:$0xf] }
 0x1b5   :  { %238 = vst [vmem:[#allocation4 + $0x50] sm:$0xf] %v201_v59  ;;  %1056 = vrot.lane.b32.xlu1 %v4850_v54, %s4862_s24 }
 0x1b6   :  { %v5575_v60 = vpop.permute.xlu0 %1170 }
 0x1b7   :  { %v1198_v63 = vsel %vm1188_vm0, %v1169_v41, %v5575_v60  ;;  %v1312_v4 = vld [vmem:[#allocation4 + $0x210] sm:$0xff]  ;;  %v301_v6 = vpop.permute.xlu1 %300 }
 0x1b8   :  { %1235 = vst [vmem:[#allocation4 + $0x2a8] sm:$0xf] %v1198_v63  ;;  %933 = vrot.lane.b32.xlu0 %v5561_v52, %s4860_s22  ;;  %v4627_v35 = vpack.c.bf16 %v1312_v4, %v1293_v27  ;;  %v327_v14 = vsel %vm316_vm8, %v5476_v40, %v301_v6 }
 0x1b9   :  { %364 = vst [vmem:[#allocation4 + $0x50] sm:$0xf0] %v327_v14  ;;  %686 = vrot.lane.b32.xlu1 %v5579_v0, %s4859_s21 }
 0x1ba   :  { %v177_v8 = vpop.permute.xlu0 %176  ;;  %4628 = vmatprep.subr.bf16.mxu0 %v4627_v35 }
 0x1bb   :  { %v202_v17 = vsel %vm190_vm12, %v175_v33, %v177_v8  ;;  %4630 = vmatpush1.bf16.msra.mxu0 %v4629_v21  ;;  %v1329_v22 = vld [vmem:[#allocation4 + $0x298] sm:$0xf]  ;;  %v426_v42 = vpop.permute.xlu1 %425 }
 0x1bc   :  { %239 = vst [vmem:[#allocation4 + $0x58] sm:$0xf] %v202_v17  ;;  %1058 = vrot.lane.b32.xlu0 %v775_v23, %s4862_s24  ;;  %4511 = vmatprep.subr.msk.mxu1 %vm81_vm6, %v1329_v22  ;;  %v452_v40 = vsel %vm441_vm13, %v5489_v20, %v426_v42  ;;  %v1330_v20 = vld [vmem:[#allocation4 + $0x2a0] sm:$0xf]  ;;  %v1130_v23 = vld [vmem:[#allocation2 + $0x48] sm:$0xf] }
 0x1bd   :  { %4512 = vmatpush1.msk.msra.mxu1 %vm81_vm6, %v1328_v36  ;;  %489 = vst [vmem:[#allocation4 + $0xe8] sm:$0xf] %v452_v40  ;;  %811 = vrot.lane.b32.xlu1 %v5561_v52, %s4861_s23 }
 0x1be   :  { %v303_v7 = vpop.permute.xlu0 %302  ;;  %4513 = vmatmul.mubr.msk.f32.vlgmr.msra.gmra.mrb[2].mxu1 %vm1347_vm2, %v5327_v58 }
 0x1bf   :  { %v328_v5 = vsel %vm316_vm8, %v301_v6, %v303_v7  ;;  %v1331_v53 = vld [vmem:[#allocation4 + $0x2a8] sm:$0xf]  ;;  %v551_v11 = vpop.permute.xlu1 %550  ;;  %1827 = vmatprep.mubr.f32.mxu1 %v4853_v2 }
 0x1c0   :  { %365 = vst [vmem:[#allocation4 + $0x58] sm:$0xf0] %v328_v5  ;;  %688 = vrot.lane.b32.xlu0 %v632_v24, %s4859_s21  ;;  %4514 = vmatprep.subr.msk.mxu0 %vm81_vm6, %v1331_v53  ;;  %v577_v38 = vsel %vm566_vm9, %v5499_v55, %v551_v11  ;;  %v1256_v47 = vld [vmem:[#allocation4 + $0x50] sm:$0xff] }
 0x1c1   :  { %4515 = vmatpush1.msk.msra.mxu0 %vm81_vm6, %v1330_v20  ;;  %614 = vst [vmem:[#allocation4 + $0xe8] sm:$0xf0] %v577_v38  ;;  %935 = vrot.lane.b32.xlu1 %v5579_v0, %s4860_s22 }
 0x1c2   :  { %v428_v26 = vpop.permute.xlu0 %427  ;;  %4516 = vmatmul.mubr.msk.f32.vlgmr.msra.gmra.mrb[4].mxu0 %vm1347_vm2, %v5327_v58 }
 0x1c3   :  { %v453_v28 = vsel %vm441_vm13, %v426_v42, %v428_v26  ;;  %v179_v10 = vpop.permute.xlu1 %178  ;;  %1898 = vmatprep.mubr.f32.mxu0 %v4853_v2 }
 0x1c4   :  { %490 = vst [vmem:[#allocation4 + $0xf0] sm:$0xf] %v453_v28  ;;  %813 = vrot.lane.b32.xlu0 %v4847_v30, %s4861_s23  ;;  %v203_v55 = vsel %vm190_vm12, %v177_v8, %v179_v10 }
 0x1c5   :  { %240 = vst [vmem:[#allocation4 + $0x60] sm:$0xf] %v203_v55  ;;  %1060 = vrot.lane.b32.xlu1 %v5561_v52, %s4862_s24 }
 0x1c6   :  { %v553_v48 = vpop.permute.xlu0 %552 }
 0x1c7   :  { %v578_v61 = vsel %vm566_vm9, %v551_v11, %v553_v48  ;;  %v305_v16 = vpop.permute.xlu1 %304  ;;  %v1257_v44 = vld [vmem:[#allocation4 + $0x58] sm:$0xff] }
 0x1c8   :  { %615 = vst [vmem:[#allocation4 + $0xf0] sm:$0xf0] %v578_v61  ;;  %937 = vrot.lane.b32.xlu0 %v881_v32, %s4860_s22  ;;  %v329_v50 = vsel %vm316_vm8, %v303_v7, %v305_v16  ;;  %v1275_v18 = vld [vmem:[#allocation4 + $0xe8] sm:$0xff] }
 0x1c9   :  { %366 = vst [vmem:[#allocation4 + $0x60] sm:$0xf0] %v329_v50  ;;  %1180 = vrot.lane.b32.xlu1 %v5480_v3, %s4863_s26  ;;  %v1341_v3 = vld [vmem:[%s6780_s2] sm:$0xff]  ;;  %v4633_v51 = vpack.c.bf16 %v1275_v18, %v1256_v47 }
 0x1ca   :  { %v5621_v31 = vpop.permute.xlu0 %180 }
 0x1cb   :  { %v204_v13 = vsel %vm190_vm12, %v179_v10, %v5621_v31  ;;  %v430_v34 = vpop.permute.xlu1 %429 }
 0x1cc   :  { %241 = vst [vmem:[#allocation4 + $0x68] sm:$0xf] %v204_v13  ;;  %1062 = vrot.lane.b32.xlu0 %v4848_v25, %s4862_s24  ;;  %v454_v37 = vsel %vm441_vm13, %v428_v26, %v430_v34 }
 0x1cd   :  { %491 = vst [vmem:[#allocation4 + $0xf8] sm:$0xf] %v454_v37  ;;  %1184 = vrot.lane.b32.xlu1 %v5579_v0, %s4863_s26 }
 0x1ce   :  { %v5629_v39 = vpop.permute.xlu0 %306 }
 0x1cf   :  { %v330_v43 = vsel %vm316_vm8, %v305_v16, %v5629_v39  ;;  %v1276_v56 = vld [vmem:[#allocation4 + $0xf0] sm:$0xff]  ;;  %v555_v19 = vpop.permute.xlu1 %554 }
 0x1d0   :  { %367 = vst [vmem:[#allocation4 + $0x68] sm:$0xf0] %v330_v43  ;;  %1182 = vrot.lane.b32.xlu0 %v5561_v52, %s4863_s26  ;;  %v4631_v29 = vpack.c.bf16 %v1276_v56, %v1257_v44  ;;  %v579_v54 = vsel %vm566_vm9, %v553_v48, %v555_v19 }
 0x1d1   :  { %616 = vst [vmem:[#allocation4 + $0xf8] sm:$0xf0] %v579_v54  ;;  %1344 = vperm.xlu1 %4839, %v1341_v3  }
 0x1d2   :  { %v5639_v41 = vpop.permute.xlu0 %431  ;;  %4632 = vmatprep.subr.bf16.mxu1 %v4631_v29 }
 0x1d3   :  { %v455_v62 = vsel %vm441_vm13, %v430_v34, %v5639_v41  ;;  %4634 = vmatpush1.bf16.msra.mxu1 %v4633_v51  ;;  %v675_v12 = vpop.permute.xlu1 %674 }
 0x1d4   :  { %492 = vst [vmem:[#allocation4 + $0x100] sm:$0xf] %v455_v62  ;;  %1186 = vrot.lane.b32.xlu0 %v1130_v23, %s4863_s26  ;;  %v701_v52 = vsel %vm690_vm14, %v5534_v46, %v675_v12 }
 0x1d5   :  { %738 = vst [vmem:[#allocation4 + $0x180] sm:$0xf] %v701_v52 }
 0x1d6   :  { %v5646_v57 = vpop.permute.xlu0 %556 }
 0x1d7   :  { %v580_v33 = vsel %vm566_vm9, %v555_v19, %v5646_v57  ;;  %v800_v59 = vpop.permute.xlu1 %799  ;;  %v1259_v9 = vld [vmem:[#allocation4 + $0x68] sm:$0xff] }
 0x1d8   :  { %617 = vst [vmem:[#allocation4 + $0x100] sm:$0xf0] %v580_v33  ;;  %v826_v1 = vsel %vm815_vm10, %v5541_v15, %v800_v59  ;;  %v1277_v6 = vld [vmem:[#allocation4 + $0xf8] sm:$0xff]  ;;  %v1258_v15 = vld [vmem:[#allocation4 + $0x60] sm:$0xff] }
 0x1d9   :  { %863 = vst [vmem:[#allocation4 + $0x180] sm:$0xf0] %v826_v1  ;;  %v4641_v22 = vpack.c.bf16 %v1277_v6, %v1258_v15 }
 0x1da   :  { %v677_v0 = vpop.permute.xlu0 %676 }
 0x1db   :  { %v702_v63 = vsel %vm690_vm14, %v675_v12, %v677_v0  ;;  %v924_v27 = vpop.permute.xlu1 %923 }
 0x1dc   :  { %739 = vst [vmem:[#allocation4 + $0x188] sm:$0xf] %v702_v63  ;;  %v950_v46 = vsel %vm939_vm15, %v5549_v45, %v924_v27 }
 0x1dd   :  { %987 = vst [vmem:[#allocation4 + $0x218] sm:$0xf] %v950_v46 }
 0x1de   :  { %v802_v4 = vpop.permute.xlu0 %801 }
 0x1df   :  { %v827_v35 = vsel %vm815_vm10, %v800_v59, %v802_v4  ;;  %v1278_v14 = vld [vmem:[#allocation4 + $0x100] sm:$0xff]  ;;  %v1049_v21 = vpop.permute.xlu1 %1048 }
 0x1e0   :  { %864 = vst [vmem:[#allocation4 + $0x188] sm:$0xf0] %v827_v35  ;;  %v4639_v8 = vpack.c.bf16 %v1278_v14, %v1259_v9  ;;  %v1075_v17 = vsel %vm1064_vm11, %v5557_v49, %v1049_v21  ;;  %v1294_v32 = vld [vmem:[#allocation4 + $0x180] sm:$0xff] }
 0x1e1   :  { %1112 = vst [vmem:[#allocation4 + $0x218] sm:$0xf0] %v1075_v17 }
 0x1e2   :  { %v926_v42 = vpop.permute.xlu0 %925  ;;  %4640 = vmatprep.subr.bf16.mxu0 %v4639_v8 }
 0x1e3   :  { %v951_v45 = vsel %vm939_vm15, %v924_v27, %v926_v42  ;;  %4642 = vmatpush1.bf16.msra.mxu0 %v4641_v22  ;;  %v679_v36 = vpop.permute.xlu1 %678 }
 0x1e4   :  { %988 = vst [vmem:[#allocation4 + $0x220] sm:$0xf] %v951_v45  ;;  %v703_v40 = vsel %vm690_vm14, %v677_v0, %v679_v36 }
 0x1e5   :  { %740 = vst [vmem:[#allocation4 + $0x190] sm:$0xf] %v703_v40 }
 0x1e6   :  { %v1051_v7 = vpop.permute.xlu0 %1050 }
 0x1e7   :  { %v1076_v5 = vsel %vm1064_vm11, %v1049_v21, %v1051_v7  ;;  %v804_v24 = vpop.permute.xlu1 %803  ;;  %v1295_v10 = vld [vmem:[#allocation4 + $0x188] sm:$0xff] }
 0x1e8   :  { %1113 = vst [vmem:[#allocation4 + $0x220] sm:$0xf0] %v1076_v5  ;;  %v828_v53 = vsel %vm815_vm10, %v802_v4, %v804_v24  ;;  %v1313_v30 = vld [vmem:[#allocation4 + $0x218] sm:$0xff] }
 0x1e9   :  { %865 = vst [vmem:[#allocation4 + $0x190] sm:$0xf0] %v828_v53  ;;  %v4637_v50 = vpack.c.bf16 %v1313_v30, %v1294_v32 }
 0x1ea   :  { %v5662_v49 = vpop.permute.xlu0 %680 }
 0x1eb   :  { %v704_v11 = vsel %vm690_vm14, %v679_v36, %v5662_v49  ;;  %v928_v20 = vpop.permute.xlu1 %927 }
 0x1ec   :  { %741 = vst [vmem:[#allocation4 + $0x198] sm:$0xf] %v704_v11  ;;  %v952_v38 = vsel %vm939_vm15, %v926_v42, %v928_v20 }
 0x1ed   :  { %989 = vst [vmem:[#allocation4 + $0x228] sm:$0xf] %v952_v38 }
 0x1ee   :  { %v5667_v26 = vpop.permute.xlu0 %805 }
 0x1ef   :  { %v829_v28 = vsel %vm815_vm10, %v804_v24, %v5667_v26  ;;  %v1314_v55 = vld [vmem:[#allocation4 + $0x220] sm:$0xff]  ;;  %v1053_v48 = vpop.permute.xlu1 %1052 }
 0x1f0   :  { %866 = vst [vmem:[#allocation4 + $0x198] sm:$0xf0] %v829_v28  ;;  %v4635_v61 = vpack.c.bf16 %v1314_v55, %v1295_v10  ;;  %v1077_v16 = vsel %vm1064_vm11, %v1051_v7, %v1053_v48  ;;  %v1296_v33 = vld [vmem:[#allocation4 + $0x190] sm:$0xff] }
 0x1f1   :  { %1114 = vst [vmem:[#allocation4 + $0x228] sm:$0xf0] %v1077_v16 }
 0x1f2   :  { %v5672_v25 = vpop.permute.xlu0 %929  ;;  %4636 = vmatprep.subr.bf16.mxu1 %v4635_v61 }
 0x1f3   :  { %v953_v13 = vsel %vm939_vm15, %v928_v20, %v5672_v25  ;;  %4638 = vmatpush1.bf16.msra.mxu1 %v4637_v50  ;;  %v1173_v34 = vpop.permute.xlu1 %1172 }
 0x1f4   :  { %990 = vst [vmem:[#allocation4 + $0x230] sm:$0xf] %v953_v13  ;;  %v1199_v37 = vsel %vm1188_vm0, %v5575_v60, %v1173_v34 }
 0x1f5   :  { %1236 = vst [vmem:[#allocation4 + $0x2b0] sm:$0xf] %v1199_v37 }
 0x1f6   :  { %v5678_v18 = vpop.permute.xlu0 %1054 }
 0x1f7   :  { %v1078_v3 = vsel %vm1064_vm11, %v1053_v48, %v5678_v18  ;;  %v1177_v43 = vpop.permute.xlu1 %1176  ;;  %v1297_v62 = vld [vmem:[#allocation4 + $0x198] sm:$0xff] }
 0x1f8   :  { %1115 = vst [vmem:[#allocation4 + $0x230] sm:$0xf0] %v1078_v3  ;;  %v1315_v54 = vld [vmem:[#allocation4 + $0x228] sm:$0xff] }
 0x1f9   :  { %v4645_v1 = vpack.c.bf16 %v1315_v54, %v1296_v33 }
 0x1fa   :  { %v1175_v44 = vpop.permute.xlu0 %1174 }
 0x1fb   :  { %v1200_v56 = vsel %vm1188_vm0, %v1173_v34, %v1175_v44  ;;  %v1201_v19 = vsel %vm1188_vm0, %v1175_v44, %v1177_v43  ;;  %v183_v29 = vpop.permute.xlu1 %182 }
 0x1fc   :  { %1237 = vst [vmem:[#allocation4 + $0x2b8] sm:$0xf] %v1200_v56  ;;  %1238 = vst [vmem:[#allocation4 + $0x2c0] sm:$0xf] %v1201_v19  ;;  %v205_v47 = vsel %vm190_vm12, %v5621_v31, %v183_v29  ;;  %v1332_v46 = vld [vmem:[#allocation4 + $0x2b0] sm:$0xf] }
 0x1fd   :  { %242 = vst [vmem:[#allocation4 + $0x70] sm:$0xf] %v205_v47 }
 0x1fe   :  { %v5686_v60 = vpop.permute.xlu0 %1178 }
 0x1ff   :  { %v1202_v51 = vsel %vm1188_vm0, %v1177_v43, %v5686_v60  ;;  %v1316_v23 = vld [vmem:[#allocation4 + $0x230] sm:$0xff]  ;;  %v309_v12 = vpop.permute.xlu1 %308 }
 0x200   :  { %1239 = vst [vmem:[#allocation4 + $0x2c8] sm:$0xf] %v1202_v51  ;;  %v4643_v52 = vpack.c.bf16 %v1316_v23, %v1297_v62  ;;  %v331_v59 = vsel %vm316_vm8, %v5629_v39, %v309_v12 }
 0x201   :  { %368 = vst [vmem:[#allocation4 + $0x70] sm:$0xf0] %v331_v59 }
 0x202   :  { %v185_v0 = vpop.permute.xlu0 %184  ;;  %4644 = vmatprep.subr.bf16.mxu0 %v4643_v52 }
 0x203   :  { %v206_v31 = vsel %vm190_vm12, %v183_v29, %v185_v0  ;;  %4646 = vmatpush1.bf16.msra.mxu0 %v4645_v1  ;;  %v1333_v63 = vld [vmem:[#allocation4 + $0x2b8] sm:$0xf]  ;;  %v434_v27 = vpop.permute.xlu1 %433  ;;  %v1334_v14 = vld [vmem:[#allocation4 + $0x2c0] sm:$0xf] }
 0x204   :  { %243 = vst [vmem:[#allocation4 + $0x78] sm:$0xf] %v206_v31  ;;  %4517 = vmatprep.subr.msk.mxu1 %vm81_vm6, %v1333_v63  ;;  %v456_v4 = vsel %vm441_vm13, %v5639_v41, %v434_v27 }
 0x205   :  { %4518 = vmatpush1.msk.msra.mxu1 %vm81_vm6, %v1332_v46  ;;  %493 = vst [vmem:[#allocation4 + $0x108] sm:$0xf] %v456_v4 }
 0x206   :  { %v311_v39 = vpop.permute.xlu0 %310  ;;  %4519 = vmatmul.mubr.msk.f32.vlgmr.msra.gmra.mrb[4].mxu1 %vm1347_vm2, %v5327_v58  ;;  %v5708_v58 = vld [vmem:[%s6779_s1] sm:$0xff] }
 0x207   :  { %v332_v6 = vsel %vm316_vm8, %v309_v12, %v311_v39  ;;  %v1335_v35 = vld [vmem:[#allocation4 + $0x2c8] sm:$0xf]  ;;  %v559_v9 = vpop.permute.xlu1 %558  ;;  %1969 = vmatprep.mubr.f32.mxu1 %v4853_v2 }
 0x208   :  { %369 = vst [vmem:[#allocation4 + $0x78] sm:$0xf0] %v332_v6  ;;  %4520 = vmatprep.subr.msk.mxu0 %vm81_vm6, %v1335_v35  ;;  %v581_v41 = vsel %vm566_vm9, %v5646_v57, %v559_v9  ;;  %v1260_v10 = vld [vmem:[#allocation4 + $0x70] sm:$0xff] }
 0x209   :  { %4521 = vmatpush1.msk.msra.mxu0 %vm81_vm6, %v1334_v14  ;;  %618 = vst [vmem:[#allocation4 + $0x108] sm:$0xf0] %v581_v41 }
 0x20a   :  { %v436_v21 = vpop.permute.xlu0 %435  ;;  %4522 = vmatmul.mubr.msk.f32.vlgmr.msra.gmra.mrb[6].mxu0 %vm1347_vm2, %v5708_v58 }
 0x20b   :  { %v457_v8 = vsel %vm441_vm13, %v434_v27, %v436_v21  ;;  %v187_v15 = vpop.permute.xlu1 %186  ;;  %2040 = vmatprep.mubr.f32.mxu0 %v4853_v2 }
 0x20c   :  { %494 = vst [vmem:[#allocation4 + $0x110] sm:$0xf] %v457_v8  ;;  %v207_v57 = vsel %vm190_vm12, %v185_v0, %v187_v15 }
 0x20d   :  { %244 = vst [vmem:[#allocation4 + $0x80] sm:$0xf] %v207_v57 }
 0x20e   :  { %v561_v17 = vpop.permute.xlu0 %560 }
 0x20f   :  { %v582_v22 = vsel %vm566_vm9, %v559_v9, %v561_v17  ;;  %v313_v42 = vpop.permute.xlu1 %312  ;;  %v1261_v20 = vld [vmem:[#allocation4 + $0x78] sm:$0xff] }
 0x210   :  { %619 = vst [vmem:[#allocation4 + $0x110] sm:$0xf0] %v582_v22  ;;  %v333_v45 = vsel %vm316_vm8, %v311_v39, %v313_v42  ;;  %v1279_v53 = vld [vmem:[#allocation4 + $0x108] sm:$0xff] }
 0x211   :  { %370 = vst [vmem:[#allocation4 + $0x80] sm:$0xf0] %v333_v45  ;;  %v4649_v48 = vpack.c.bf16 %v1279_v53, %v1260_v10 }
 0x212   :  { %v189_v36 = vpop.permute.xlu0 %188 }
 0x213   :  { %247 = vst.msk [vmem:[#allocation4 + $0x90] sm:$0xf] %vm246_vm3, %v189_v36  ;;  %v208_v40 = vsel %vm190_vm12, %v187_v15, %v189_v36  ;;  %v438_v7 = vpop.permute.xlu1 %437 }
 0x214   :  { %245 = vst [vmem:[#allocation4 + $0x88] sm:$0xf] %v208_v40  ;;  %v458_v5 = vsel %vm441_vm13, %v436_v21, %v438_v7 }
 0x215   :  { %495 = vst [vmem:[#allocation4 + $0x118] sm:$0xf] %v458_v5 }
 0x216   :  { %v315_v24 = vpop.permute.xlu0 %314 }
 0x217   :  { %373 = vst.msk [vmem:[#allocation4 + $0x90] sm:$0xf0] %vm372_vm4, %v315_v24  ;;  %v334_v11 = vsel %vm316_vm8, %v313_v42, %v315_v24  ;;  %v1280_v38 = vld [vmem:[#allocation4 + $0x110] sm:$0xff]  ;;  %v563_v30 = vpop.permute.xlu1 %562 }
 0x218   :  { %371 = vst [vmem:[#allocation4 + $0x88] sm:$0xf0] %v334_v11  ;;  %v4647_v28 = vpack.c.bf16 %v1280_v38, %v1261_v20  ;;  %v583_v55 = vsel %vm566_vm9, %v561_v17, %v563_v30  ;;  %v1262_v52 = vld [vmem:[#allocation4 + $0x80] sm:$0xff] }
 0x219   :  { %620 = vst [vmem:[#allocation4 + $0x118] sm:$0xf0] %v583_v55 }
 0x21a   :  { %v440_v61 = vpop.permute.xlu0 %439  ;;  %4648 = vmatprep.subr.bf16.mxu1 %v4647_v28 }
 0x21b   :  { %497 = vst.msk [vmem:[#allocation4 + $0x128] sm:$0xf] %vm246_vm3, %v440_v61  ;;  %v459_v32 = vsel %vm441_vm13, %v438_v7, %v440_v61  ;;  %4650 = vmatpush1.bf16.msra.mxu1 %v4649_v48  ;;  %v683_v16 = vpop.permute.xlu1 %682 }
 0x21c   :  { %496 = vst [vmem:[#allocation4 + $0x120] sm:$0xf] %v459_v32  ;;  %v705_v50 = vsel %vm690_vm14, %v5662_v49, %v683_v16 }
 0x21d   :  { %742 = vst [vmem:[#allocation4 + $0x1a0] sm:$0xf] %v705_v50 }
 0x21e   :  { %v565_v13 = vpop.permute.xlu0 %564 }
 0x21f   :  { %622 = vst.msk [vmem:[#allocation4 + $0x128] sm:$0xf0] %vm372_vm4, %v565_v13  ;;  %v584_v34 = vsel %vm566_vm9, %v563_v30, %v565_v13  ;;  %v808_v37 = vpop.permute.xlu1 %807  ;;  %v1263_v62 = vld [vmem:[#allocation4 + $0x88] sm:$0xff]  ;;  %v2142_v30 = vlaneseq }
 0x220   :  { %621 = vst [vmem:[#allocation4 + $0x120] sm:$0xf0] %v584_v34  ;;  %v830_v3 = vsel %vm815_vm10, %v5667_v26, %v808_v37  ;;  %v1281_v54 = vld [vmem:[#allocation4 + $0x118] sm:$0xff] }
 0x221   :  { %867 = vst [vmem:[#allocation4 + $0x1a0] sm:$0xf0] %v830_v3  ;;  %v4657_v59 = vpack.c.bf16 %v1281_v54, %v1262_v52 }
 0x222   :  { %v685_v43 = vpop.permute.xlu0 %684 }
 0x223   :  { %v706_v44 = vsel %vm690_vm14, %v683_v16, %v685_v43  ;;  %v932_v56 = vpop.permute.xlu1 %931  ;;  %v5732_v19 = vpop.f32.mrb[0].mxu0  ;;  %v5761_v16 = vshrl.u32 %v2142_v30, 7 }
 0x224   :  { %743 = vst [vmem:[#allocation4 + $0x1a8] sm:$0xf] %v706_v44  ;;  %v954_v49 = vsel %vm939_vm15, %v5672_v25, %v932_v56  ;;  %v5736_v29 = vpop.f32.mrb[1].mxu0  ;;  %v1264_v44 = vld [vmem:[#allocation4 + $0x90] sm:$0xff] }
 0x225   :  { %991 = vst [vmem:[#allocation4 + $0x238] sm:$0xf] %v954_v49  ;;  %v2156_v52 = vsub.s32 3, %v5761_v16 }
 0x226   :  { %v810_v47 = vpop.permute.xlu0 %809  ;;  %v1283_v34 = vld [vmem:[#allocation4 + $0x128] sm:$0xff] }
 0x227   :  { %v831_v51 = vsel %vm815_vm10, %v808_v37, %v810_v47  ;;  %v1282_v26 = vld [vmem:[#allocation4 + $0x120] sm:$0xff]  ;;  %v1057_v23 = vpop.permute.xlu1 %1056  ;;  %v4664_v49 = vpack.c.bf16 %v1283_v34, %v1264_v44 }
 0x228   :  { %868 = vst [vmem:[#allocation4 + $0x1a8] sm:$0xf0] %v831_v51  ;;  %v4655_v12 = vpack.c.bf16 %v1282_v26, %v1263_v62  ;;  %v1079_v33 = vsel %vm1064_vm11, %v5678_v18, %v1057_v23  ;;  %v1298_v17 = vld [vmem:[#allocation4 + $0x1a0] sm:$0xff]  ;;  %v4865_v51 = vmov 0.0|0.0   ;;  %v5777_v26 = vsub.s32 0, %v5761_v16 }
 0x229   :  { %1116 = vst [vmem:[#allocation4 + $0x238] sm:$0xf0] %v1079_v33 }
 0x22a   :  { %v934_v1 = vpop.permute.xlu0 %933  ;;  %4656 = vmatprep.subr.bf16.mxu0 %v4655_v12 }
 0x22b   :  { %v955_v25 = vsel %vm939_vm15, %v932_v56, %v934_v1  ;;  %4658 = vmatpush1.bf16.msra.mxu0 %v4657_v59  ;;  %v687_v0 = vpop.permute.xlu1 %686  ;;  %v5765_v56 = vsub.s32 1, %v5761_v16 }
 0x22c   :  { %992 = vst [vmem:[#allocation4 + $0x240] sm:$0xf] %v955_v25  ;;  %v707_v31 = vsel %vm690_vm14, %v685_v43, %v687_v0 }
 0x22d   :  { %744 = vst [vmem:[#allocation4 + $0x1b0] sm:$0xf] %v707_v31 }
 0x22e   :  { %v1059_v63 = vpop.permute.xlu0 %1058 }
 0x22f   :  { %v1080_v27 = vsel %vm1064_vm11, %v1057_v23, %v1059_v63  ;;  %v812_v46 = vpop.permute.xlu1 %811  ;;  %v1299_v21 = vld [vmem:[#allocation4 + $0x1a8] sm:$0xff] }
 0x230   :  { %1117 = vst [vmem:[#allocation4 + $0x240] sm:$0xf0] %v1080_v27  ;;  %v832_v4 = vsel %vm815_vm10, %v810_v47, %v812_v46  ;;  %v1317_v14 = vld [vmem:[#allocation4 + $0x238] sm:$0xff] }
 0x231   :  { %869 = vst [vmem:[#allocation4 + $0x1b0] sm:$0xf0] %v832_v4  ;;  %v4653_v42 = vpack.c.bf16 %v1317_v14, %v1298_v17  ;;  %v5771_v47 = vld [vmem:[%s6781_s5] sm:$0xff]  ;;  %v2160_v4 = vsub.s32 4, %v5761_v16 }
 0x232   :  { %v689_v18 = vpop.permute.xlu0 %688  ;;  %v2149_v25 = vrot.slane %v5771_v47, %v5765_v56 }
 0x233   :  { %746 = vst.msk [vmem:[#allocation4 + $0x1c0] sm:$0xf] %vm246_vm3, %v689_v18  ;;  %v708_v39 = vsel %vm690_vm14, %v687_v0, %v689_v18  ;;  %v936_v6 = vpop.permute.xlu1 %935  ;;  %v5789_v0 = vsub.s32 2, %v5761_v16 }
 0x234   :  { %745 = vst [vmem:[#allocation4 + $0x1b8] sm:$0xf] %v708_v39  ;;  %v956_v35 = vsel %vm939_vm15, %v934_v1, %v936_v6  ;;  %v2145_v39 = vrot.slane %v5771_v47, %v5777_v26 }
 0x235   :  { %993 = vst [vmem:[#allocation4 + $0x248] sm:$0xf] %v956_v35 }
 0x236   :  { %v814_v9 = vpop.permute.xlu0 %813 }
 0x237   :  { %871 = vst.msk [vmem:[#allocation4 + $0x1c0] sm:$0xf0] %vm372_vm4, %v814_v9  ;;  %v833_v41 = vsel %vm815_vm10, %v812_v46, %v814_v9  ;;  %v1318_v8 = vld [vmem:[#allocation4 + $0x240] sm:$0xff]  ;;  %v1061_v15 = vpop.permute.xlu1 %1060  ;;  %v2157_v9 = vrot.slane %v5771_v47, %v2156_v52 }
 0x238   :  { %870 = vst [vmem:[#allocation4 + $0x1b8] sm:$0xf0] %v833_v41  ;;  %v4651_v57 = vpack.c.bf16 %v1318_v8, %v1299_v21  ;;  %v1081_v22 = vsel %vm1064_vm11, %v1059_v63, %v1061_v15  ;;  %v1300_v32 = vld [vmem:[#allocation4 + $0x1b0] sm:$0xff] }
 0x239   :  { %1118 = vst [vmem:[#allocation4 + $0x248] sm:$0xf0] %v1081_v22 }
 0x23a   :  { %v938_v45 = vpop.permute.xlu0 %937  ;;  %4652 = vmatprep.subr.bf16.mxu1 %v4651_v57 }
 0x23b   :  { %995 = vst.msk [vmem:[#allocation4 + $0x258] sm:$0xf] %vm246_vm3, %v938_v45  ;;  %v957_v36 = vsel %vm939_vm15, %v936_v6, %v938_v45  ;;  %4654 = vmatpush1.bf16.msra.mxu1 %v4653_v42  ;;  %v1181_v40 = vpop.permute.xlu1 %1180  ;;  %v2164_v6 = vsub.s32 5, %v5761_v16 }
 0x23c   :  { %994 = vst [vmem:[#allocation4 + $0x250] sm:$0xf] %v957_v36  ;;  %v1203_v7 = vsel %vm1188_vm0, %v5686_v60, %v1181_v40 }
 0x23d   :  { %1240 = vst [vmem:[#allocation4 + $0x2d0] sm:$0xf] %v1203_v7  ;;  %v2165_v45 = vrot.slane %v5771_v47, %v2164_v6  ;;  %v2161_v7 = vrot.slane %v5771_v47, %v2160_v4 }
 0x23e   :  { %v1063_v5 = vpop.permute.xlu0 %1062  ;;  %v1302_v59 = vld [vmem:[#allocation4 + $0x1c0] sm:$0xff] }
 0x23f   :  { %1120 = vst.msk [vmem:[#allocation4 + $0x258] sm:$0xf0] %vm372_vm4, %v1063_v5  ;;  %v1082_v24 = vsel %vm1064_vm11, %v1061_v15, %v1063_v5  ;;  %v1185_v11 = vpop.permute.xlu1 %1184  ;;  %v1301_v55 = vld [vmem:[#allocation4 + $0x1b8] sm:$0xff] }
 0x240   :  { %1119 = vst [vmem:[#allocation4 + $0x250] sm:$0xf0] %v1082_v24  ;;  %v1319_v10 = vld [vmem:[#allocation4 + $0x248] sm:$0xff] }
 0x241   :  { %v4661_v50 = vpack.c.bf16 %v1319_v10, %v1300_v32 }
 0x242   :  { %v1183_v53 = vpop.permute.xlu0 %1182 }
 0x243   :  { %v1204_v20 = vsel %vm1188_vm0, %v1181_v40, %v1183_v53  ;;  %v1205_v38 = vsel %vm1188_vm0, %v1183_v53, %v1185_v11  ;;  %v2172_v53 = vsub.s32 7, %v5761_v16 }
 0x244   :  { %1241 = vst [vmem:[#allocation4 + $0x2d8] sm:$0xf] %v1204_v20  ;;  %1242 = vst [vmem:[#allocation4 + $0x2e0] sm:$0xf] %v1205_v38  ;;  %v1336_v43 = vld [vmem:[#allocation4 + $0x2d0] sm:$0xf] }
 0x245   :  { %v2173_v10 = vrot.slane %v5771_v47, %v2172_v53 }
 0x246   :  { %v1187_v28 = vpop.permute.xlu0 %1186  ;;  %v1321_v62 = vld [vmem:[#allocation4 + $0x258] sm:$0xff] }
 0x247   :  { %1244 = vst.msk [vmem:[#allocation4 + $0x2f0] sm:$0xf] %vm246_vm3, %v1187_v28  ;;  %v1206_v60 = vsel %vm1188_vm0, %v1185_v11, %v1187_v28  ;;  %v1320_v48 = vld [vmem:[#allocation4 + $0x250] sm:$0xff]  ;;  %v4667_v31 = vpack.c.bf16 %v1321_v62, %v1302_v59  ;;  %vm2502_vm3 = vcmask 64512  }
 0x248   :  { %1243 = vst [vmem:[#allocation4 + $0x2e8] sm:$0xf] %v1206_v60  ;;  %v4659_v61 = vpack.c.bf16 %v1320_v48, %v1301_v55  ;;  %v5842_v60 = vld [vmem:[%s6781_s5 + $0x8] sm:$0xff] }
 0x249   :  { %v1545_v13 = vpop.f32.mrb[0].mxu1 }
 0x24a   :  { %4660 = vmatprep.subr.bf16.mxu0 %v4659_v61  ;;  %v1547_v37 = vpop.f32.mrb[1].mxu1 }
 0x24b   :  { %4662 = vmatpush1.bf16.msra.mxu0 %v4661_v50  ;;  %v1337_v3 = vld [vmem:[#allocation4 + $0x2d8] sm:$0xf]  ;;  %v1338_v33 = vld [vmem:[#allocation4 + $0x2e0] sm:$0xf] }
 0x24c   :  { %4523 = vmatprep.subr.msk.mxu1 %vm81_vm6, %v1337_v3 }
 0x24d   :  { %4524 = vmatpush1.msk.msra.mxu1 %vm81_vm6, %v1336_v43  ;;  %v1616_v54 = vpop.f32.mrb[2].mxu0  ;;  %v2181_v43 = vrot.slane %v5842_v60, %v5765_v56 }
 0x24e   :  { %4525 = vmatmul.mubr.msk.f32.vlgmr.msra.gmra.mrb[6].mxu1 %vm1347_vm2, %v5708_v58  ;;  %4663 = vmatprep.subr.bf16.mxu1 %v4865_v51  ;;  %v1618_v23 = vpop.f32.mrb[3].mxu0  ;;  %v1340_v57 = vld [vmem:[#allocation4 + $0x2f0] sm:$0xf] }
 0x24f   :  { %4665 = vmatpush3.bf16.msra.mxu1 %v4664_v49  ;;  %v1339_v12 = vld [vmem:[#allocation4 + $0x2e8] sm:$0xf]  ;;  %4567 = vmatprep.mubr.msk.f32.mxu1 %vm4866_vm5, %v4853_v2 }
 0x250   :  { %4526 = vmatprep.subr.msk.mxu0 %vm81_vm6, %v1339_v12  ;;  %4666 = vmatprep.subr.bf16.mxu1 %v4865_v51  ;;  %v5784_v1 = vpop.permute.xlu1 %1344 }
 0x251   :  { %4527 = vmatpush1.msk.msra.mxu0 %vm81_vm6, %v1338_v33  ;;  %v1477_v63 = vadd.f32 %v5736_v29, %v5784_v1  ;;  %v1546_v27 = vadd.f32 %v1545_v13, %v5784_v1  ;;  %v1548_v46 = vadd.f32 %v1547_v37, %v5784_v1  ;;  %v1475_v18 = vadd.f32 %v5732_v19, %v5784_v1 }
 0x252   :  { %4528 = vmatmul.mubr.msk.f32.vlgmr.msra.gmra.mrb[8].mxu0 %vm1347_vm2, %v5708_v58  ;;  %v1619_v14 = vadd.f32 %v1618_v23, %v5784_v1  ;;  %v2153_v19 = vrot.slane %v5771_v47, %v5789_v0  ;;  %v1617_v21 = vadd.f32 %v1616_v54, %v5784_v1  ;;  %v2177_v13 = vrot.slane %v5842_v60, %v5777_v26 }
 0x253   :  { %4668 = vmatpush3.bf16.msra.mxu1 %v4667_v31  ;;  %v2118_v35 = vmax.f32 %v1477_v63, 0.0  ;;  %v2120_v29 = vmax.f32 %v1548_v46, 0.0  ;;  %3806 = vmatprep.mubr.f32.mxu0 %v4853_v2  ;;  %v2119_v41 = vmax.f32 %v1546_v27, 0.0  ;;  %v2117_v8 = vmax.f32 %v1475_v18, 0.0 }
 0x254   :  { %4565 = vmatprep.subr.mxu1 %v4853_v2  ;;  %v2122_v42 = vmax.f32 %v1619_v14, 0.0  ;;  %v2121_v40 = vmax.f32 %v1617_v21, 0.0 }
 0x255   :  { %v2238_v15 = vmul.f32 %v2149_v25, %v2118_v35  ;;  %v2237_v17 = vmul.f32 %v2145_v39, %v2117_v8  ;;  %v2240_v22 = vmul.f32 %v2157_v9, %v2120_v29  ;;  %v2239_v36 = vmul.f32 %v2153_v19, %v2119_v41 }
 0x256   :  { %v2242_v5 = vmul.f32 %v2165_v45, %v2122_v42  ;;  %v2241_v24 = vmul.f32 %v2161_v7, %v2121_v40  ;;  %v2185_v29 = vrot.slane %v5842_v60, %v5789_v0  ;;  %v2189_v41 = vrot.slane %v5842_v60, %v2156_v52 }
 0x257   :  { %4566 = vmatpush3.msk.msra.mxu1 %vm81_vm6, %v1340_v57  ;;  %2277 = vrot.lane.b32.xlu1 %v2238_v15, %s4854_s25  ;;  %vm2350_vm6 = vcmask 1047872  }
 0x258   :  { %4568 = vmatmul.mubr.msk.f32.vlgmr.msra.gmra.mrb[8].mxu1 %vm1347_vm2, %v5708_v58  ;;  %2275 = vrot.lane.b32.xlu0 %v2237_v17, %s4854_s25  ;;  %v2168_v58 = vsub.s32 6, %v5761_v16  ;;  %v2193_v17 = vrot.slane %v5842_v60, %v2160_v4  ;;  %vm2369_vm2 = vcmask 392192  }
 0x259   :  { %3877 = vmatprep.mubr.f32.mxu1 %v4853_v2 }
 0x25a   :  { %v2169_v38 = vrot.slane %v5771_v47, %v2168_v58 }
 0x25b   :  { %2281 = vrot.lane.b32.xlu1 %v2240_v22, %s4854_s25 }
 0x25c   :  { %2279 = vrot.lane.b32.xlu0 %v2239_v36, %s4854_s25  ;;  %v2197_v36 = vrot.slane %v5842_v60, %v2164_v6 }
 0x25f   :  { %2285 = vrot.lane.b32.xlu1 %v2242_v5, %s4854_s25 }
 0x260   :  { %2283 = vrot.lane.b32.xlu0 %v2241_v24, %s4854_s25 }
 0x291   :  { %v1687_v11 = vpop.f32.mrb[2].mxu1 }
 0x292   :  { %v1688_v20 = vadd.f32 %v1687_v11, %v5784_v1  ;;  %v1689_v30 = vpop.f32.mrb[3].mxu1 }
 0x293   :  { %v1690_v28 = vadd.f32 %v1689_v30, %v5784_v1 }
 0x294   :  { %v2123_v55 = vmax.f32 %v1688_v20, 0.0 }
 0x295   :  { %v2124_v48 = vmax.f32 %v1690_v28, 0.0  ;;  %v1758_v61 = vpop.f32.mrb[4].mxu0 }
 0x296   :  { %v2243_v32 = vmul.f32 %v2169_v38, %v2123_v55  ;;  %v1759_v50 = vadd.f32 %v1758_v61, %v5784_v1  ;;  %v1760_v34 = vpop.f32.mrb[5].mxu0 }
 0x297   :  { %v2244_v37 = vmul.f32 %v2173_v10, %v2124_v48  ;;  %v1761_v3 = vadd.f32 %v1760_v34, %v5784_v1  ;;  %v2201_v48 = vrot.slane %v5842_v60, %v2168_v58 }
 0x298   :  { %v2125_v44 = vmax.f32 %v1759_v50, 0.0  ;;  %2287 = vrot.lane.b32.xlu0 %v2243_v32, %s4854_s25  ;;  %v2205_v50 = vrot.slane %v5842_v60, %v2172_v53 }
 0x299   :  { %v2126_v49 = vmax.f32 %v1761_v3, 0.0  ;;  %2289 = vrot.lane.b32.xlu1 %v2244_v37, %s4854_s25 }
 0x29a   :  { %v2245_v47 = vmul.f32 %v2177_v13, %v2125_v44  ;;  %v2138_v13 = vld [vmem:[%s6781_s5 + $0x10] sm:$0x7] }
 0x29b   :  { %v2246_v54 = vmul.f32 %v2181_v43, %v2126_v49  ;;  %v2209_v44 = vrot.slane %v2138_v13, %v5777_v26  ;;  %v2213_v53 = vrot.slane %v2138_v13, %v5765_v56 }
 0x29c   :  { %2291 = vrot.lane.b32.xlu0 %v2245_v47, %s4854_s25 }
 0x29d   :  { %2293 = vrot.lane.b32.xlu1 %v2246_v54, %s4854_s25 }
 0x2c9   :  { %v2278_v62 = vpop.permute.xlu1 %2277 }
 0x2ca   :  { %v2276_v23 = vpop.permute.xlu0 %2275 }
 0x2cb   :  { %v5855_v12 = vsel %vm27_vm1, %v2276_v23, %v2278_v62  ;;  %2351 = vst.msk [vmem:[#allocation3] sm:$0xff] %vm2350_vm6, %v2276_v23 }
 0x2cd   :  { %v2282_v33 = vpop.permute.xlu1 %2281 }
 0x2ce   :  { %v2280_v59 = vpop.permute.xlu0 %2279 }
 0x2cf   :  { %v5858_v25 = vsel %vm27_vm1, %v2278_v62, %v2280_v59  ;;  %v5861_v31 = vsel %vm27_vm1, %v2280_v59, %v2282_v33 }
 0x2d1   :  { %v2286_v63 = vpop.permute.xlu1 %2285 }
 0x2d2   :  { %v2284_v27 = vpop.permute.xlu0 %2283  ;;  %v2371_v56 = vld [vmem:[#allocation3] sm:$0xff] }
 0x2d3   :  { %v5864_v46 = vsel %vm27_vm1, %v2282_v33, %v2284_v27  ;;  %v5867_v18 = vsel %vm27_vm1, %v2284_v27, %v2286_v63 }
 0x2d9   :  { %v1829_v39 = vpop.f32.mrb[4].mxu1 }
 0x2da   :  { %v1830_v35 = vadd.f32 %v1829_v39, %v5784_v1  ;;  %v1831_v9 = vpop.f32.mrb[5].mxu1 }
 0x2db   :  { %v1832_v14 = vadd.f32 %v1831_v9, %v5784_v1 }
 0x2dc   :  { %v2127_v19 = vmax.f32 %v1830_v35, 0.0 }
 0x2dd   :  { %v2128_v21 = vmax.f32 %v1832_v14, 0.0  ;;  %v1900_v8 = vpop.f32.mrb[6].mxu0 }
 0x2de   :  { %v2247_v15 = vmul.f32 %v2185_v29, %v2127_v19  ;;  %v1901_v57 = vadd.f32 %v1900_v8, %v5784_v1  ;;  %v1902_v22 = vpop.f32.mrb[7].mxu0 }
 0x2df   :  { %v2248_v42 = vmul.f32 %v2189_v41, %v2128_v21  ;;  %v1903_v45 = vadd.f32 %v1902_v22, %v5784_v1 }
 0x2e0   :  { %v2129_v40 = vmax.f32 %v1901_v57, 0.0  ;;  %2295 = vrot.lane.b32.xlu0 %v2247_v15, %s4854_s25 }
 0x2e1   :  { %v2130_v52 = vmax.f32 %v1903_v45, 0.0  ;;  %2297 = vrot.lane.b32.xlu1 %v2248_v42, %s4854_s25 }
 0x2e2   :  { %v2249_v7 = vmul.f32 %v2193_v17, %v2129_v40 }
 0x2e3   :  { %v2250_v5 = vmul.f32 %v2197_v36, %v2130_v52 }
 0x2e4   :  { %2299 = vrot.lane.b32.xlu0 %v2249_v7, %s4854_s25 }
 0x2e5   :  { %2301 = vrot.lane.b32.xlu1 %v2250_v5, %s4854_s25 }
 0x30a   :  { %v2288_v4 = vpop.permute.xlu0 %2287 }
 0x30b   :  { %v2290_v24 = vpop.permute.xlu1 %2289  ;;  %v5889_v11 = vsel %vm27_vm1, %v2286_v63, %v2288_v4  ;;  %v2217_v63 = vrot.slane %v2138_v13, %v5789_v0 }
 0x30c   :  { %v5892_v20 = vsel %vm27_vm1, %v2288_v4, %v2290_v24 }
 0x30e   :  { %v2292_v6 = vpop.permute.xlu0 %2291 }
 0x30f   :  { %v2294_v38 = vpop.permute.xlu1 %2293  ;;  %v5895_v30 = vsel %vm27_vm1, %v2290_v24, %v2292_v6 }
 0x310   :  { %v5898_v28 = vsel %vm27_vm1, %v2292_v6, %v2294_v38 }
 0x321   :  { %v1971_v10 = vpop.f32.mrb[6].mxu1 }
 0x322   :  { %v1972_v55 = vadd.f32 %v1971_v10, %v5784_v1  ;;  %v1973_v61 = vpop.f32.mrb[7].mxu1 }
 0x323   :  { %v1974_v32 = vadd.f32 %v1973_v61, %v5784_v1 }
 0x324   :  { %v2131_v34 = vmax.f32 %v1972_v55, 0.0 }
 0x325   :  { %v2132_v37 = vmax.f32 %v1974_v32, 0.0  ;;  %v2042_v3 = vpop.f32.mrb[8].mxu0 }
 0x326   :  { %v2251_v43 = vmul.f32 %v2201_v48, %v2131_v34  ;;  %v2043_v58 = vadd.f32 %v2042_v3, %v5784_v1  ;;  %v2044_v49 = vpop.f32.mrb[9].mxu0 }
 0x327   :  { %v2252_v47 = vmul.f32 %v2205_v50, %v2132_v37  ;;  %v2045_v16 = vadd.f32 %v2044_v49, %v5784_v1 }
 0x328   :  { %v2133_v60 = vmax.f32 %v2043_v58, 0.0  ;;  %2303 = vrot.lane.b32.xlu0 %v2251_v43, %s4854_s25 }
 0x329   :  { %v2134_v54 = vmax.f32 %v2045_v16, 0.0  ;;  %2305 = vrot.lane.b32.xlu1 %v2252_v47, %s4854_s25 }
 0x32a   :  { %v2253_v62 = vmul.f32 %v2209_v44, %v2133_v60 }
 0x32b   :  { %v2254_v23 = vmul.f32 %v2213_v53, %v2134_v54  ;;  %v2113_v33 = vpop.f32.mrb[8].mxu1 }
 0x32c   :  { %v2114_v59 = vadd.f32 %v2113_v33, %v5784_v1  ;;  %v4569_v26 = vpop.f32.mrb[9].mxu1  ;;  %2307 = vrot.lane.b32.xlu0 %v2253_v62, %s4854_s25 }
 0x32d   :  { %2309 = vrot.lane.b32.xlu1 %v2254_v23, %s4854_s25 }
 0x32e   :  { %v2135_v27 = vmax.f32 %v2114_v59, 0.0 }
 0x330   :  { %v2255_v39 = vmul.f32 %v2217_v63, %v2135_v27 }
 0x331   :  { %2409 = vrot.lane.b32.xlu1 %v2371_v56, %s4855_s0 }
 0x332   :  { %2311 = vrot.lane.b32.xlu0 %v2255_v39, %s4854_s25 }
 0x335   :  { %2674 = vrot.lane.b32.xlu1 %v2371_v56, %s4857_s19 }
 0x336   :  { %2542 = vrot.lane.b32.xlu0 %v2371_v56, %s4856_s18 }
 0x339   :  { %2938 = vrot.lane.b32.xlu1 %v2371_v56, %s4859_s21 }
 0x33a   :  { %2806 = vrot.lane.b32.xlu0 %v2371_v56, %s4858_s20 }
 0x33d   :  { %3202 = vrot.lane.b32.xlu1 %v2371_v56, %s4860_s22 }
 0x33e   :  { %3070 = vrot.lane.b32.xlu0 %v2371_v56, %s4861_s23 }
 0x341   :  { %3466 = vrot.lane.b32.xlu1 %v2371_v56, %s4863_s26 }
 0x342   :  { %3334 = vrot.lane.b32.xlu0 %v2371_v56, %s4862_s24 }
 0x345   :  { %2411 = vrot.lane.b32.xlu1 %v5855_v12, %s4855_s0 }
 0x346   :  { %2413 = vrot.lane.b32.xlu0 %v5858_v25, %s4855_s0 }
 0x349   :  { %2544 = vrot.lane.b32.xlu1 %v5855_v12, %s4856_s18 }
 0x34a   :  { %2546 = vrot.lane.b32.xlu0 %v5858_v25, %s4856_s18 }
 0x34d   :  { %2415 = vrot.lane.b32.xlu1 %v5861_v31, %s4855_s0 }
 0x34e   :  { %2678 = vrot.lane.b32.xlu0 %v5858_v25, %s4857_s19 }
 0x351   :  { %2548 = vrot.lane.b32.xlu1 %v5861_v31, %s4856_s18 }
 0x352   :  { %2810 = vrot.lane.b32.xlu0 %v5858_v25, %s4858_s20  ;;  %v2296_v1 = vpop.permute.xlu0 %2295 }
 0x353   :  { %v5949_v0 = vsel %vm27_vm1, %v2294_v38, %v2296_v1  ;;  %v2298_v35 = vpop.permute.xlu1 %2297 }
 0x354   :  { %v5952_v29 = vsel %vm27_vm1, %v2296_v1, %v2298_v35 }
 0x355   :  { %2676 = vrot.lane.b32.xlu1 %v5855_v12, %s4857_s19 }
 0x356   :  { %2942 = vrot.lane.b32.xlu0 %v5858_v25, %s4859_s21  ;;  %v2300_v9 = vpop.permute.xlu0 %2299 }
 0x357   :  { %v5959_v14 = vsel %vm27_vm1, %v2298_v35, %v2300_v9  ;;  %v2302_v41 = vpop.permute.xlu1 %2301 }
 0x358   :  { %v5962_v19 = vsel %vm27_vm1, %v2300_v9, %v2302_v41 }
 0x359   :  { %2364 = vst [vmem:[#allocation3 + $0x68] sm:$0xff] %v5962_v19  ;;  %2808 = vrot.lane.b32.xlu1 %v5855_v12, %s4858_s20 }
 0x35a   :  { %3074 = vrot.lane.b32.xlu0 %v5858_v25, %s4861_s23 }
 0x35d   :  { %2680 = vrot.lane.b32.xlu1 %v5861_v31, %s4857_s19 }
 0x35e   :  { %3206 = vrot.lane.b32.xlu0 %v5858_v25, %s4860_s22 }
 0x361   :  { %2812 = vrot.lane.b32.xlu1 %v5861_v31, %s4858_s20 }
 0x362   :  { %3338 = vrot.lane.b32.xlu0 %v5858_v25, %s4862_s24 }
 0x365   :  { %2940 = vrot.lane.b32.xlu1 %v5855_v12, %s4859_s21 }
 0x366   :  { %3470 = vrot.lane.b32.xlu0 %v5858_v25, %s4863_s26 }
 0x369   :  { %3072 = vrot.lane.b32.xlu1 %v5855_v12, %s4861_s23 }
 0x36a   :  { %3472 = vrot.lane.b32.xlu0 %v5861_v31, %s4863_s26 }
 0x36d   :  { %2944 = vrot.lane.b32.xlu1 %v5861_v31, %s4859_s21 }
 0x36e   :  { %2417 = vrot.lane.b32.xlu0 %v5864_v46, %s4855_s0 }
 0x371   :  { %3076 = vrot.lane.b32.xlu1 %v5861_v31, %s4861_s23 }
 0x372   :  { %2550 = vrot.lane.b32.xlu0 %v5864_v46, %s4856_s18 }
 0x375   :  { %3204 = vrot.lane.b32.xlu1 %v5855_v12, %s4860_s22 }
 0x376   :  { %2682 = vrot.lane.b32.xlu0 %v5864_v46, %s4857_s19 }
 0x379   :  { %3336 = vrot.lane.b32.xlu1 %v5855_v12, %s4862_s24 }
 0x37a   :  { %2814 = vrot.lane.b32.xlu0 %v5864_v46, %s4858_s20 }
 0x37d   :  { %3208 = vrot.lane.b32.xlu1 %v5861_v31, %s4860_s22 }
 0x37e   :  { %2946 = vrot.lane.b32.xlu0 %v5864_v46, %s4859_s21 }
 0x381   :  { %3340 = vrot.lane.b32.xlu1 %v5861_v31, %s4862_s24 }
 0x382   :  { %3078 = vrot.lane.b32.xlu0 %v5864_v46, %s4861_s23 }
 0x385   :  { %3468 = vrot.lane.b32.xlu1 %v5855_v12, %s4863_s26 }
 0x386   :  { %3210 = vrot.lane.b32.xlu0 %v5864_v46, %s4860_s22 }
 0x389   :  { %3474 = vrot.lane.b32.xlu1 %v5864_v46, %s4863_s26 }
 0x38a   :  { %3342 = vrot.lane.b32.xlu0 %v5864_v46, %s4862_s24 }
 0x38d   :  { %2419 = vrot.lane.b32.xlu1 %v5867_v18, %s4855_s0 }
 0x38e   :  { %2421 = vrot.lane.b32.xlu0 %v5889_v11, %s4855_s0 }
 0x391   :  { %2552 = vrot.lane.b32.xlu1 %v5867_v18, %s4856_s18 }
 0x392   :  { %2554 = vrot.lane.b32.xlu0 %v5889_v11, %s4856_s18 }
 0x395   :  { %2686 = vrot.lane.b32.xlu1 %v5889_v11, %s4857_s19 }
 0x396   :  { %2423 = vrot.lane.b32.xlu0 %v5892_v20, %s4855_s0 }
 0x399   :  { %2818 = vrot.lane.b32.xlu1 %v5889_v11, %s4858_s20 }
 0x39a   :  { %2556 = vrot.lane.b32.xlu0 %v5892_v20, %s4856_s18  ;;  %v2304_v12 = vpop.permute.xlu0 %2303 }
 0x39b   :  { %v6034_v25 = vsel %vm27_vm1, %v2302_v41, %v2304_v12  ;;  %v2306_v31 = vpop.permute.xlu1 %2305 }
 0x39c   :  { %2365 = vst [vmem:[#allocation3 + $0x70] sm:$0xff] %v6034_v25  ;;  %v6038_v46 = vsel %vm27_vm1, %v2304_v12, %v2306_v31 }
 0x39d   :  { %2366 = vst [vmem:[#allocation3 + $0x78] sm:$0xff] %v6038_v46  ;;  %2950 = vrot.lane.b32.xlu1 %v5889_v11, %s4859_s21 }
 0x39e   :  { %2684 = vrot.lane.b32.xlu0 %v5867_v18, %s4857_s19  ;;  %v2308_v21 = vpop.permute.xlu0 %2307 }
 0x39f   :  { %v6046_v8 = vsel %vm27_vm1, %v2306_v31, %v2308_v21  ;;  %v2310_v15 = vpop.permute.xlu1 %2309 }
 0x3a0   :  { %2367 = vst [vmem:[#allocation3 + $0x80] sm:$0xff] %v6046_v8  ;;  %v2329_v57 = vsel %vm27_vm1, %v2308_v21, %v2310_v15 }
 0x3a1   :  { %2368 = vst [vmem:[#allocation3 + $0x88] sm:$0xff] %v2329_v57  ;;  %3082 = vrot.lane.b32.xlu1 %v5889_v11, %s4861_s23 }
 0x3a2   :  { %2816 = vrot.lane.b32.xlu0 %v5867_v18, %s4858_s20 }
 0x3a3   :  { %v2410_v17 = vpop.permute.xlu1 %2409 }
 0x3a4   :  { %v2312_v22 = vpop.permute.xlu0 %2311 }
 0x3a5   :  { %v2330_v42 = vsel %vm27_vm1, %v2310_v15, %v2312_v22  ;;  %3214 = vrot.lane.b32.xlu1 %v5889_v11, %s4860_s22  ;;  %vm3738_vm1 = vcmask 588800  }
 0x3a6   :  { %2370 = vst.msk [vmem:[#allocation3 + $0x90] sm:$0xff] %vm2369_vm2, %v2330_v42  ;;  %2688 = vrot.lane.b32.xlu0 %v5892_v20, %s4857_s19 }
 0x3a7   :  { %v2675_v45 = vpop.permute.xlu1 %2674 }
 0x3a8   :  { %v2543_v36 = vpop.permute.xlu0 %2542 }
 0x3a9   :  { %3346 = vrot.lane.b32.xlu1 %v5889_v11, %s4862_s24 }
 0x3aa   :  { %2820 = vrot.lane.b32.xlu0 %v5892_v20, %s4858_s20 }
 0x3ab   :  { %v6063_v40 = vpop.permute.xlu1 %2938 }
 0x3ac   :  { %v2807_v52 = vpop.permute.xlu0 %2806 }
 0x3ad   :  { %3478 = vrot.lane.b32.xlu1 %v5889_v11, %s4863_s26 }
 0x3ae   :  { %2948 = vrot.lane.b32.xlu0 %v5867_v18, %s4859_s21 }
 0x3af   :  { %v6069_v7 = vpop.permute.xlu1 %3202 }
 0x3b0   :  { %v6071_v5 = vpop.permute.xlu0 %3070 }
 0x3b1   :  { %2425 = vrot.lane.b32.xlu1 %v5895_v30, %s4855_s0 }
 0x3b2   :  { %3080 = vrot.lane.b32.xlu0 %v5867_v18, %s4861_s23 }
 0x3b3   :  { %v6077_v4 = vpop.permute.xlu1 %3466 }
 0x3b4   :  { %v6079_v24 = vpop.permute.xlu0 %3334 }
 0x3b5   :  { %2558 = vrot.lane.b32.xlu1 %v5895_v30, %s4856_s18 }
 0x3b6   :  { %2952 = vrot.lane.b32.xlu0 %v5892_v20, %s4859_s21 }
 0x3b7   :  { %v2412_v11 = vpop.permute.xlu1 %2411 }
 0x3b8   :  { %v2447_v6 = vsel %vm190_vm12, %v2410_v17, %v2412_v11  ;;  %v2414_v38 = vpop.permute.xlu0 %2413 }
 0x3b9   :  { %v2448_v10 = vsel %vm190_vm12, %v2412_v11, %v2414_v38  ;;  %2690 = vrot.lane.b32.xlu1 %v5895_v30, %s4857_s19 }
 0x3ba   :  { %3084 = vrot.lane.b32.xlu0 %v5892_v20, %s4861_s23 }
 0x3bb   :  { %v2545_v55 = vpop.permute.xlu1 %2544 }
 0x3bc   :  { %v2580_v48 = vsel %vm316_vm8, %v2543_v36, %v2545_v55  ;;  %v2547_v61 = vpop.permute.xlu0 %2546 }
 0x3bd   :  { %v2581_v32 = vsel %vm316_vm8, %v2545_v55, %v2547_v61  ;;  %2822 = vrot.lane.b32.xlu1 %v5895_v30, %s4858_s20  ;;  %v4671_v34 = vpack.c.bf16 %v2580_v48, %v2447_v6 }
 0x3be   :  { %3212 = vrot.lane.b32.xlu0 %v5867_v18, %s4860_s22  ;;  %v4669_v50 = vpack.c.bf16 %v2581_v32, %v2448_v10 }
 0x3bf   :  { %v2416_v13 = vpop.permute.xlu1 %2415 }
 0x3c0   :  { %v6098_v37 = vsel %vm190_vm12, %v2414_v38, %v2416_v13  ;;  %v2679_v3 = vpop.permute.xlu0 %2678  ;;  %4670 = vmatprep.subr.bf16.mxu0 %v4669_v50 }
 0x3c1   :  { %2954 = vrot.lane.b32.xlu1 %v5895_v30, %s4859_s21  ;;  %4672 = vmatpush1.bf16.msra.mxu0 %v4671_v34 }
 0x3c2   :  { %3344 = vrot.lane.b32.xlu0 %v5867_v18, %s4862_s24 }
 0x3c3   :  { %v2549_v43 = vpop.permute.xlu1 %2548 }
 0x3c4   :  { %v6105_v58 = vsel %vm316_vm8, %v2547_v61, %v2549_v43  ;;  %v2811_v44 = vpop.permute.xlu0 %2810 }
 0x3c5   :  { %3086 = vrot.lane.b32.xlu1 %v5895_v30, %s4861_s23  ;;  %v4687_v38 = vpack.c.bf16 %v6105_v58, %v6098_v37 }
 0x3c6   :  { %3216 = vrot.lane.b32.xlu0 %v5892_v20, %s4860_s22 }
 0x3c7   :  { %v2677_v49 = vpop.permute.xlu1 %2676 }
 0x3c8   :  { %v2712_v47 = vsel %vm441_vm13, %v2675_v45, %v2677_v49  ;;  %v2713_v16 = vsel %vm441_vm13, %v2677_v49, %v2679_v3  ;;  %v2943_v53 = vpop.permute.xlu0 %2942 }
 0x3c9   :  { %3218 = vrot.lane.b32.xlu1 %v5895_v30, %s4860_s22 }
 0x3ca   :  { %3348 = vrot.lane.b32.xlu0 %v5892_v20, %s4862_s24 }
 0x3cb   :  { %v2809_v60 = vpop.permute.xlu1 %2808 }
 0x3cc   :  { %v2844_v54 = vsel %vm566_vm9, %v2807_v52, %v2809_v60  ;;  %v2845_v62 = vsel %vm566_vm9, %v2809_v60, %v2811_v44  ;;  %v3075_v23 = vpop.permute.xlu0 %3074 }
 0x3cd   :  { %3350 = vrot.lane.b32.xlu1 %v5895_v30, %s4862_s24  ;;  %v4673_v33 = vpack.c.bf16 %v2845_v62, %v2713_v16  ;;  %v4675_v59 = vpack.c.bf16 %v2844_v54, %v2712_v47 }
 0x3ce   :  { %3476 = vrot.lane.b32.xlu0 %v5867_v18, %s4863_s26 }
 0x3cf   :  { %v2681_v63 = vpop.permute.xlu1 %2680  ;;  %4674 = vmatprep.subr.bf16.mxu0 %v4673_v33 }
 0x3d0   :  { %v6124_v26 = vsel %vm441_vm13, %v2679_v3, %v2681_v63  ;;  %v6126_v27 = vpop.permute.xlu0 %3206  ;;  %4676 = vmatpush1.bf16.msra.mxu0 %v4675_v59 }
 0x3d1   :  { %3482 = vrot.lane.b32.xlu1 %v5895_v30, %s4863_s26 }
 0x3d2   :  { %3480 = vrot.lane.b32.xlu0 %v5892_v20, %s4863_s26 }
 0x3d3   :  { %v2813_v56 = vpop.permute.xlu1 %2812 }
 0x3d4   :  { %v6133_v39 = vsel %vm566_vm9, %v2811_v44, %v2813_v56  ;;  %v6135_v1 = vpop.permute.xlu0 %3338 }
 0x3d5   :  { %2429 = vrot.lane.b32.xlu1 %v5949_v0, %s4855_s0 }
 0x3d6   :  { %2427 = vrot.lane.b32.xlu0 %v5898_v28, %s4855_s0 }
 0x3d7   :  { %v2941_v18 = vpop.permute.xlu1 %2940 }
 0x3d8   :  { %v2976_v35 = vsel %vm690_vm14, %v6063_v40, %v2941_v18  ;;  %v2977_v30 = vsel %vm690_vm14, %v2941_v18, %v2943_v53  ;;  %v6144_v9 = vpop.permute.xlu0 %3470 }
 0x3d9   :  { %2562 = vrot.lane.b32.xlu1 %v5949_v0, %s4856_s18 }
 0x3da   :  { %2560 = vrot.lane.b32.xlu0 %v5898_v28, %s4856_s18 }
 0x3db   :  { %v3073_v20 = vpop.permute.xlu1 %3072 }
 0x3dc   :  { %v3108_v41 = vsel %vm815_vm10, %v6071_v5, %v3073_v20  ;;  %v3109_v12 = vsel %vm815_vm10, %v3073_v20, %v3075_v23  ;;  %v6153_v31 = vpop.permute.xlu0 %3472 }
 0x3dd   :  { %v6158_v21 = vsel %vm1188_vm0, %v6144_v9, %v6153_v31  ;;  %2694 = vrot.lane.b32.xlu1 %v5949_v0, %s4857_s19  ;;  %v4677_v15 = vpack.c.bf16 %v3109_v12, %v2977_v30  ;;  %v4679_v57 = vpack.c.bf16 %v3108_v41, %v2976_v35 }
 0x3de   :  { %2431 = vrot.lane.b32.xlu0 %v5952_v29, %s4855_s0 }
 0x3df   :  { %v2945_v17 = vpop.permute.xlu1 %2944  ;;  %4678 = vmatprep.subr.bf16.mxu0 %v4677_v15 }
 0x3e0   :  { %v6165_v22 = vsel %vm690_vm14, %v2943_v53, %v2945_v17  ;;  %v6167_v42 = vpop.permute.xlu0 %2417  ;;  %4680 = vmatpush1.bf16.msra.mxu0 %v4679_v57 }
 0x3e1   :  { %v2450_v45 = vsel %vm190_vm12, %v2416_v13, %v6167_v42  ;;  %2826 = vrot.lane.b32.xlu1 %v5949_v0, %s4858_s20 }
 0x3e2   :  { %2564 = vrot.lane.b32.xlu0 %v5952_v29, %s4856_s18 }
 0x3e3   :  { %v3077_v36 = vpop.permute.xlu1 %3076 }
 0x3e4   :  { %v3110_v40 = vsel %vm815_vm10, %v3075_v23, %v3077_v36  ;;  %v6176_v52 = vpop.permute.xlu0 %2550 }
 0x3e5   :  { %v2583_v5 = vsel %vm316_vm8, %v2549_v43, %v6176_v52  ;;  %2958 = vrot.lane.b32.xlu1 %v5949_v0, %s4859_s21 }
 0x3e6   :  { %2692 = vrot.lane.b32.xlu0 %v5898_v28, %s4857_s19  ;;  %v4685_v11 = vpack.c.bf16 %v2583_v5, %v2450_v45 }
 0x3e7   :  { %v3205_v6 = vpop.permute.xlu1 %3204 }
 0x3e8   :  { %v3240_v10 = vsel %vm939_vm15, %v6069_v7, %v3205_v6  ;;  %v3241_v55 = vsel %vm939_vm15, %v3205_v6, %v6126_v27  ;;  %v6190_v48 = vpop.permute.xlu0 %2682  ;;  %4686 = vmatprep.subr.bf16.mxu1 %v4685_v11 }
 0x3e9   :  { %v2715_v61 = vsel %vm441_vm13, %v2681_v63, %v6190_v48  ;;  %3090 = vrot.lane.b32.xlu1 %v5949_v0, %s4861_s23  ;;  %4688 = vmatpush1.bf16.msra.mxu1 %v4687_v38 }
 0x3ea   :  { %2824 = vrot.lane.b32.xlu0 %v5898_v28, %s4858_s20 }
 0x3eb   :  { %v3337_v32 = vpop.permute.xlu1 %3336 }
 0x3ec   :  { %v3372_v7 = vsel %vm1064_vm11, %v6079_v24, %v3337_v32  ;;  %v3373_v50 = vsel %vm1064_vm11, %v3337_v32, %v6135_v1  ;;  %v6202_v13 = vpop.permute.xlu0 %2814  ;;  %v4691_v24 = vpack.c.bf16 %v6133_v39, %v6124_v26  ;;  %v4695_v26 = vpack.c.bf16 %v3110_v40, %v6165_v22 }
 0x3ed   :  { %v2847_v34 = vsel %vm566_vm9, %v2813_v56, %v6202_v13  ;;  %3222 = vrot.lane.b32.xlu1 %v5949_v0, %s4860_s22  ;;  %v4681_v37 = vpack.c.bf16 %v3373_v50, %v3241_v55  ;;  %v4683_v3 = vpack.c.bf16 %v3372_v7, %v3240_v10 }
 0x3ee   :  { %2696 = vrot.lane.b32.xlu0 %v5952_v29, %s4857_s19  ;;  %v4689_v43 = vpack.c.bf16 %v2847_v34, %v2715_v61 }
 0x3ef   :  { %v3209_v58 = vpop.permute.xlu1 %3208  ;;  %4682 = vmatprep.subr.bf16.mxu0 %v4681_v37 }
 0x3f0   :  { %v3242_v44 = vsel %vm939_vm15, %v6126_v27, %v3209_v58  ;;  %v6214_v49 = vpop.permute.xlu0 %2946  ;;  %4684 = vmatpush1.bf16.msra.mxu0 %v4683_v3  ;;  %4690 = vmatprep.subr.bf16.mxu1 %v4689_v43 }
 0x3f1   :  { %v2979_v47 = vsel %vm690_vm14, %v2945_v17, %v6214_v49  ;;  %3354 = vrot.lane.b32.xlu1 %v5949_v0, %s4862_s24  ;;  %4692 = vmatpush1.bf16.msra.mxu1 %v4691_v24 }
 0x3f2   :  { %2828 = vrot.lane.b32.xlu0 %v5952_v29, %s4858_s20 }
 0x3f3   :  { %v3341_v16 = vpop.permute.xlu1 %3340 }
 0x3f4   :  { %v3374_v53 = vsel %vm1064_vm11, %v6135_v1, %v3341_v16  ;;  %v6224_v60 = vpop.permute.xlu0 %3078 }
 0x3f5   :  { %v3111_v54 = vsel %vm815_vm10, %v3077_v36, %v6224_v60  ;;  %3486 = vrot.lane.b32.xlu1 %v5949_v0, %s4863_s26  ;;  %v6246_v0 = vld [vmem:[%s6782_s3] sm:$0x7]  ;;  %v4699_v30 = vpack.c.bf16 %v3374_v53, %v3242_v44 }
 0x3f6   :  { %2956 = vrot.lane.b32.xlu0 %v5898_v28, %s4859_s21  ;;  %v4693_v62 = vpack.c.bf16 %v3111_v54, %v2979_v47 }
 0x3f7   :  { %v3469_v23 = vpop.permute.xlu1 %3468 }
 0x3f8   :  { %v3504_v33 = vsel %vm1188_vm0, %v6077_v4, %v3469_v23  ;;  %v3505_v59 = vsel %vm1188_vm0, %v3469_v23, %v6144_v9  ;;  %v6236_v63 = vpop.permute.xlu0 %3210  ;;  %4694 = vmatprep.subr.bf16.mxu1 %v4693_v62 }
 0x3f9   :  { %v3243_v27 = vsel %vm939_vm15, %v3209_v58, %v6236_v63  ;;  %2433 = vrot.lane.b32.xlu1 %v5959_v14, %s4855_s0  ;;  %3758 = vmatprep.subr.mxu0 %v3505_v59 }
 0x3fa   :  { %3088 = vrot.lane.b32.xlu0 %v5898_v28, %s4861_s23  ;;  %4696 = vmatpush1.bf16.msra.mxu1 %v4695_v26 }
 0x3fb   :  { %v6250_v4 = vpop.permute.xlu1 %3474  ;;  %3759 = vmatpush1.msra.mxu0 %v3504_v33 }
 0x3fc   :  { %v3507_v56 = vsel %vm1188_vm0, %v6153_v31, %v6250_v4  ;;  %v6255_v39 = vpop.permute.xlu0 %3342  ;;  %4531 = vmatmul.mubr.msk.f32.vlgmr.msra.gmra.mrb[10].mxu0 %vm3738_vm1, %v6246_v0 }
 0x3fd   :  { %v3375_v1 = vsel %vm1064_vm11, %v3341_v16, %v6255_v39  ;;  %2566 = vrot.lane.b32.xlu1 %v5959_v14, %s4856_s18  ;;  %3948 = vmatprep.mubr.f32.mxu0 %v4853_v2 }
 0x3fe   :  { %2960 = vrot.lane.b32.xlu0 %v5952_v29, %s4859_s21  ;;  %v4697_v18 = vpack.c.bf16 %v3375_v1, %v3243_v27 }
 0x3ff   :  { %v2420_v35 = vpop.permute.xlu1 %2419 }
 0x400   :  { %v2451_v9 = vsel %vm190_vm12, %v6167_v42, %v2420_v35  ;;  %v2422_v20 = vpop.permute.xlu0 %2421  ;;  %4698 = vmatprep.subr.bf16.mxu1 %v4697_v18 }
 0x401   :  { %v2452_v41 = vsel %vm190_vm12, %v2420_v35, %v2422_v20  ;;  %2698 = vrot.lane.b32.xlu1 %v5959_v14, %s4857_s19  ;;  %4700 = vmatpush1.bf16.msra.mxu1 %v4699_v30 }
 0x402   :  { %3092 = vrot.lane.b32.xlu0 %v5952_v29, %s4861_s23  ;;  %3829 = vmatprep.subr.mxu1 %v3507_v56 }
 0x403   :  { %v2553_v12 = vpop.permute.xlu1 %2552 }
 0x404   :  { %v2584_v31 = vsel %vm316_vm8, %v6176_v52, %v2553_v12  ;;  %v2555_v15 = vpop.permute.xlu0 %2554 }
 0x405   :  { %v2585_v57 = vsel %vm316_vm8, %v2553_v12, %v2555_v15  ;;  %2830 = vrot.lane.b32.xlu1 %v5959_v14, %s4858_s20  ;;  %3830 = vmatpush1.msra.mxu1 %v6158_v21  ;;  %v4703_v42 = vpack.c.bf16 %v2584_v31, %v2451_v9  ;;  %v6373_v12 = vld [vmem:[#allocation3 + $0x68] sm:$0xff] }
 0x406   :  { %3220 = vrot.lane.b32.xlu0 %v5898_v28, %s4860_s22  ;;  %v4701_v17 = vpack.c.bf16 %v2585_v57, %v2452_v41  ;;  %4532 = vmatmul.mubr.msk.f32.vlgmr.msra.gmra.mrb[10].mxu1 %vm3738_vm1, %v6246_v0 }
 0x407   :  { %v2687_v22 = vpop.permute.xlu1 %2686  ;;  %4019 = vmatprep.mubr.f32.mxu1 %v4853_v2 }
 0x408   :  { %v2424_v45 = vpop.permute.xlu0 %2423  ;;  %4702 = vmatprep.subr.bf16.mxu0 %v4701_v17 }
 0x409   :  { %v6285_v36 = vsel %vm190_vm12, %v2422_v20, %v2424_v45  ;;  %2962 = vrot.lane.b32.xlu1 %v5959_v14, %s4859_s21  ;;  %4704 = vmatpush1.bf16.msra.mxu0 %v4703_v42 }
 0x40a   :  { %3352 = vrot.lane.b32.xlu0 %v5898_v28, %s4862_s24 }
 0x40b   :  { %v2819_v21 = vpop.permute.xlu1 %2818 }
 0x40c   :  { %v2557_v40 = vpop.permute.xlu0 %2556 }
 0x40d   :  { %v2586_v52 = vsel %vm316_vm8, %v2555_v15, %v2557_v40  ;;  %3094 = vrot.lane.b32.xlu1 %v5959_v14, %s4861_s23 }
 0x40e   :  { %3224 = vrot.lane.b32.xlu0 %v5952_v29, %s4860_s22  ;;  %v4719_v27 = vpack.c.bf16 %v2586_v52, %v6285_v36 }
 0x40f   :  { %v2951_v5 = vpop.permute.xlu1 %2950 }
 0x410   :  { %v2685_v11 = vpop.permute.xlu0 %2684 }
 0x411   :  { %v2716_v6 = vsel %vm441_vm13, %v6190_v48, %v2685_v11  ;;  %v2717_v38 = vsel %vm441_vm13, %v2685_v11, %v2687_v22  ;;  %3226 = vrot.lane.b32.xlu1 %v5959_v14, %s4860_s22 }
 0x412   :  { %3356 = vrot.lane.b32.xlu0 %v5952_v29, %s4862_s24 }
 0x413   :  { %v3083_v10 = vpop.permute.xlu1 %3082 }
 0x414   :  { %v2817_v55 = vpop.permute.xlu0 %2816 }
 0x415   :  { %v2848_v61 = vsel %vm566_vm9, %v6202_v13, %v2817_v55  ;;  %v2849_v32 = vsel %vm566_vm9, %v2817_v55, %v2819_v21  ;;  %3358 = vrot.lane.b32.xlu1 %v5959_v14, %s4862_s24 }
 0x416   :  { %3484 = vrot.lane.b32.xlu0 %v5898_v28, %s4863_s26  ;;  %v4705_v48 = vpack.c.bf16 %v2849_v32, %v2717_v38  ;;  %v4707_v7 = vpack.c.bf16 %v2848_v61, %v2716_v6  ;;  %v6413_v61 = vld [vmem:[#allocation3 + $0x70] sm:$0xff] }
 0x417   :  { %v6310_v50 = vpop.permute.xlu1 %3214 }
 0x418   :  { %v2689_v34 = vpop.permute.xlu0 %2688  ;;  %4706 = vmatprep.subr.bf16.mxu0 %v4705_v48 }
 0x419   :  { %v2718_v37 = vsel %vm441_vm13, %v2687_v22, %v2689_v34  ;;  %2437 = vrot.lane.b32.xlu1 %v6034_v25, %s4855_s0  ;;  %4708 = vmatpush1.bf16.msra.mxu0 %v4707_v7 }
 0x41a   :  { %2435 = vrot.lane.b32.xlu0 %v5962_v19, %s4855_s0 }
 0x41b   :  { %v6317_v13 = vpop.permute.xlu1 %3346 }
 0x41c   :  { %v2821_v3 = vpop.permute.xlu0 %2820 }
 0x41d   :  { %v2850_v28 = vsel %vm566_vm9, %v2819_v21, %v2821_v3  ;;  %2570 = vrot.lane.b32.xlu1 %v6034_v25, %s4856_s18 }
 0x41e   :  { %2568 = vrot.lane.b32.xlu0 %v5962_v19, %s4856_s18 }
 0x41f   :  { %v6324_v43 = vpop.permute.xlu1 %3478 }
 0x420   :  { %v2949_v58 = vpop.permute.xlu0 %2948 }
 0x421   :  { %v2980_v24 = vsel %vm690_vm14, %v6214_v49, %v2949_v58  ;;  %v2981_v44 = vsel %vm690_vm14, %v2949_v58, %v2951_v5  ;;  %3490 = vrot.lane.b32.xlu1 %v5959_v14, %s4863_s26 }
 0x422   :  { %2439 = vrot.lane.b32.xlu0 %v6038_v46, %s4855_s0 }
 0x423   :  { %v6333_v47 = vpop.permute.xlu1 %2425 }
 0x424   :  { %v2454_v16 = vsel %vm190_vm12, %v2424_v45, %v6333_v47  ;;  %v3081_v53 = vpop.permute.xlu0 %3080 }
 0x425   :  { %v3112_v54 = vsel %vm815_vm10, %v6224_v60, %v3081_v53  ;;  %v3113_v62 = vsel %vm815_vm10, %v3081_v53, %v3083_v10  ;;  %2441 = vrot.lane.b32.xlu1 %v6046_v8, %s4855_s0 }
 0x426   :  { %2572 = vrot.lane.b32.xlu0 %v6038_v46, %s4856_s18  ;;  %v4709_v14 = vpack.c.bf16 %v3113_v62, %v2981_v44  ;;  %v4711_v49 = vpack.c.bf16 %v3112_v54, %v2980_v24 }
 0x427   :  { %v6344_v23 = vpop.permute.xlu1 %2558 }
 0x428   :  { %v2587_v33 = vsel %vm316_vm8, %v2557_v40, %v6344_v23  ;;  %v2953_v59 = vpop.permute.xlu0 %2952  ;;  %4710 = vmatprep.subr.bf16.mxu0 %v4709_v14 }
 0x429   :  { %v2982_v26 = vsel %vm690_vm14, %v2951_v5, %v2953_v59  ;;  %2574 = vrot.lane.b32.xlu1 %v6046_v8, %s4856_s18  ;;  %4712 = vmatpush1.bf16.msra.mxu0 %v4711_v49  ;;  %v4717_v60 = vpack.c.bf16 %v2587_v33, %v2454_v16 }
 0x42a   :  { %3488 = vrot.lane.b32.xlu0 %v5952_v29, %s4863_s26 }
 0x42b   :  { %v6354_v56 = vpop.permute.xlu1 %2690  ;;  %4718 = vmatprep.subr.bf16.mxu1 %v4717_v60 }
 0x42c   :  { %v2719_v1 = vsel %vm441_vm13, %v2689_v34, %v6354_v56  ;;  %v3085_v18 = vpop.permute.xlu0 %3084  ;;  %4720 = vmatpush1.bf16.msra.mxu1 %v4719_v27 }
 0x42d   :  { %v3114_v35 = vsel %vm815_vm10, %v3083_v10, %v3085_v18  ;;  %2702 = vrot.lane.b32.xlu1 %v6034_v25, %s4857_s19 }
 0x42e   :  { %2700 = vrot.lane.b32.xlu0 %v5962_v19, %s4857_s19  ;;  %v4723_v19 = vpack.c.bf16 %v2850_v28, %v2718_v37  ;;  %v4727_v5 = vpack.c.bf16 %v3114_v35, %v2982_v26  ;;  %v6425_v37 = vld [vmem:[#allocation3 + $0x80] sm:$0xff] }
 0x42f   :  { %v6363_v30 = vpop.permute.xlu1 %2822 }
 0x430   :  { %v2851_v29 = vsel %vm566_vm9, %v2821_v3, %v6363_v30  ;;  %v3213_v9 = vpop.permute.xlu0 %3212  ;;  %v6435_v3 = vld [vmem:[#allocation3 + $0x78] sm:$0xff] }
 0x431   :  { %v3244_v20 = vsel %vm939_vm15, %v6236_v63, %v3213_v9  ;;  %v3245_v41 = vsel %vm939_vm15, %v3213_v9, %v6310_v50  ;;  %2834 = vrot.lane.b32.xlu1 %v6034_v25, %s4858_s20  ;;  %v4721_v31 = vpack.c.bf16 %v2851_v29, %v2719_v1  ;;  %v6476_v9 = vld [vmem:[#allocation3 + $0x90] sm:$0xff] }
 0x432   :  { %2832 = vrot.lane.b32.xlu0 %v6373_v12, %s4858_s20 }
 0x433   :  { %v6377_v15 = vpop.permute.xlu1 %2954  ;;  %4722 = vmatprep.subr.bf16.mxu1 %v4721_v31 }
 0x434   :  { %v2983_v57 = vsel %vm690_vm14, %v2953_v59, %v6377_v15  ;;  %v3345_v63 = vpop.permute.xlu0 %3344  ;;  %4724 = vmatpush1.bf16.msra.mxu1 %v4723_v19 }
 0x435   :  { %v3376_v17 = vsel %vm1064_vm11, %v6255_v39, %v3345_v63  ;;  %v3377_v22 = vsel %vm1064_vm11, %v3345_v63, %v6317_v13  ;;  %2706 = vrot.lane.b32.xlu1 %v6046_v8, %s4857_s19 }
 0x436   :  { %2704 = vrot.lane.b32.xlu0 %v6038_v46, %s4857_s19  ;;  %v4713_v42 = vpack.c.bf16 %v3377_v22, %v3245_v41  ;;  %v4715_v45 = vpack.c.bf16 %v3376_v17, %v3244_v20 }
 0x437   :  { %v6389_v36 = vpop.permute.xlu1 %3086 }
 0x438   :  { %v3115_v21 = vsel %vm815_vm10, %v3085_v18, %v6389_v36  ;;  %v3217_v40 = vpop.permute.xlu0 %3216  ;;  %4714 = vmatprep.subr.bf16.mxu0 %v4713_v42 }
 0x439   :  { %v3246_v39 = vsel %vm939_vm15, %v6310_v50, %v3217_v40  ;;  %2838 = vrot.lane.b32.xlu1 %v6046_v8, %s4858_s20  ;;  %4716 = vmatpush1.bf16.msra.mxu0 %v4715_v45  ;;  %v4725_v52 = vpack.c.bf16 %v3115_v21, %v2983_v57 }
 0x43a   :  { %2836 = vrot.lane.b32.xlu0 %v6038_v46, %s4858_s20 }
 0x43b   :  { %v6399_v11 = vpop.permute.xlu1 %3218  ;;  %4726 = vmatprep.subr.bf16.mxu1 %v4725_v52 }
 0x43c   :  { %v3247_v6 = vsel %vm939_vm15, %v3217_v40, %v6399_v11  ;;  %v3349_v38 = vpop.permute.xlu0 %3348  ;;  %4728 = vmatpush1.bf16.msra.mxu1 %v4727_v5 }
 0x43d   :  { %v3378_v10 = vsel %vm1064_vm11, %v6317_v13, %v3349_v38  ;;  %2966 = vrot.lane.b32.xlu1 %v6034_v25, %s4859_s21 }
 0x43e   :  { %2964 = vrot.lane.b32.xlu0 %v6373_v12, %s4859_s21  ;;  %v4731_v7 = vpack.c.bf16 %v3378_v10, %v3246_v39 }
 0x43f   :  { %v6409_v8 = vpop.permute.xlu1 %3350 }
 0x440   :  { %v3379_v46 = vsel %vm1064_vm11, %v3349_v38, %v6409_v8  ;;  %v3477_v55 = vpop.permute.xlu0 %3476 }
 0x441   :  { %v3508_v32 = vsel %vm1188_vm0, %v6250_v4, %v3477_v55  ;;  %v3509_v48 = vsel %vm1188_vm0, %v3477_v55, %v6324_v43  ;;  %3098 = vrot.lane.b32.xlu1 %v6413_v61, %s4861_s23  ;;  %v4729_v25 = vpack.c.bf16 %v3379_v46, %v3247_v6 }
 0x442   :  { %3096 = vrot.lane.b32.xlu0 %v6373_v12, %s4861_s23  ;;  %3900 = vmatprep.subr.mxu0 %v3509_v48 }
 0x443   :  { %v6423_v50 = vpop.permute.xlu1 %3482  ;;  %3901 = vmatpush1.msra.mxu0 %v3508_v32  ;;  %4730 = vmatprep.subr.bf16.mxu1 %v4729_v25 }
 0x444   :  { %v3481_v34 = vpop.permute.xlu0 %3480  ;;  %4732 = vmatpush1.bf16.msra.mxu1 %v4731_v7  ;;  %4533 = vmatmul.mubr.msk.f32.vlgmr.msra.gmra.mrb[12].mxu0 %vm3738_vm1, %v6246_v0 }
 0x445   :  { %v3510_v4 = vsel %vm1188_vm0, %v6324_v43, %v3481_v34  ;;  %v3511_v13 = vsel %vm1188_vm0, %v3481_v34, %v6423_v50  ;;  %2970 = vrot.lane.b32.xlu1 %v6425_v37, %s4859_s21  ;;  %4090 = vmatprep.mubr.f32.mxu0 %v4853_v2 }
 0x446   :  { %2968 = vrot.lane.b32.xlu0 %v6435_v3, %s4859_s21  ;;  %3971 = vmatprep.subr.mxu1 %v3511_v13 }
 0x447   :  { %v2430_v28 = vpop.permute.xlu1 %2429 }
 0x448   :  { %v2428_v58 = vpop.permute.xlu0 %2427  ;;  %3972 = vmatpush1.msra.mxu1 %v3510_v4 }
 0x449   :  { %v2455_v43 = vsel %vm190_vm12, %v6333_v47, %v2428_v58  ;;  %v2456_v24 = vsel %vm190_vm12, %v2428_v58, %v2430_v28  ;;  %3102 = vrot.lane.b32.xlu1 %v6425_v37, %s4861_s23  ;;  %4534 = vmatmul.mubr.msk.f32.vlgmr.msra.gmra.mrb[12].mxu1 %vm3738_vm1, %v6246_v0 }
 0x44a   :  { %3100 = vrot.lane.b32.xlu0 %v6435_v3, %s4861_s23  ;;  %4161 = vmatprep.mubr.f32.mxu1 %v4853_v2 }
 0x44b   :  { %v2563_v44 = vpop.permute.xlu1 %2562 }
 0x44c   :  { %v2561_v16 = vpop.permute.xlu0 %2560 }
 0x44d   :  { %v2588_v53 = vsel %vm316_vm8, %v6344_v23, %v2561_v16  ;;  %v2589_v47 = vsel %vm316_vm8, %v2561_v16, %v2563_v44  ;;  %3230 = vrot.lane.b32.xlu1 %v6413_v61, %s4860_s22 }
 0x44e   :  { %3228 = vrot.lane.b32.xlu0 %v6373_v12, %s4860_s22  ;;  %v4733_v54 = vpack.c.bf16 %v2589_v47, %v2456_v24  ;;  %v4735_v62 = vpack.c.bf16 %v2588_v53, %v2455_v43 }
 0x44f   :  { %v2695_v14 = vpop.permute.xlu1 %2694 }
 0x450   :  { %v2432_v49 = vpop.permute.xlu0 %2431  ;;  %4734 = vmatprep.subr.bf16.mxu0 %v4733_v54 }
 0x451   :  { %v6458_v33 = vsel %vm190_vm12, %v2430_v28, %v2432_v49  ;;  %3362 = vrot.lane.b32.xlu1 %v6413_v61, %s4862_s24  ;;  %4736 = vmatpush1.bf16.msra.mxu0 %v4735_v62 }
 0x452   :  { %3360 = vrot.lane.b32.xlu0 %v6373_v12, %s4862_s24 }
 0x453   :  { %v2827_v23 = vpop.permute.xlu1 %2826 }
 0x454   :  { %v2565_v59 = vpop.permute.xlu0 %2564 }
 0x455   :  { %v2590_v26 = vsel %vm316_vm8, %v2563_v44, %v2565_v59  ;;  %3234 = vrot.lane.b32.xlu1 %v6425_v37, %s4860_s22 }
 0x456   :  { %3232 = vrot.lane.b32.xlu0 %v6435_v3, %s4860_s22  ;;  %v4751_v48 = vpack.c.bf16 %v2590_v26, %v6458_v33 }
 0x457   :  { %v2959_v60 = vpop.permute.xlu1 %2958 }
 0x458   :  { %v2693_v27 = vpop.permute.xlu0 %2692 }
 0x459   :  { %v2720_v1 = vsel %vm441_vm13, %v6354_v56, %v2693_v27  ;;  %v2721_v18 = vsel %vm441_vm13, %v2693_v27, %v2695_v14  ;;  %3366 = vrot.lane.b32.xlu1 %v6425_v37, %s4862_s24  ;;  %v6483_v56 = vld [vmem:[#allocation3 + $0x88] sm:$0xff] }
 0x45a   :  { %3364 = vrot.lane.b32.xlu0 %v6435_v3, %s4862_s24 }
 0x45b   :  { %v3091_v35 = vpop.permute.xlu1 %3090 }
 0x45c   :  { %v2825_v29 = vpop.permute.xlu0 %2824 }
 0x45d   :  { %v2852_v20 = vsel %vm566_vm9, %v6363_v30, %v2825_v29  ;;  %v2853_v41 = vsel %vm566_vm9, %v2825_v29, %v2827_v23  ;;  %2445 = vrot.lane.b32.xlu1 %v6476_v9, %s4855_s0 }
 0x45e   :  { %2443 = vrot.lane.b32.xlu0 %v6483_v56, %s4855_s0  ;;  %v4737_v31 = vpack.c.bf16 %v2853_v41, %v2721_v18  ;;  %v4739_v19 = vpack.c.bf16 %v2852_v20, %v2720_v1 }
 0x45f   :  { %v6487_v57 = vpop.permute.xlu1 %3222 }
 0x460   :  { %v2697_v63 = vpop.permute.xlu0 %2696  ;;  %4738 = vmatprep.subr.bf16.mxu0 %v4737_v31 }
 0x461   :  { %v2722_v17 = vsel %vm441_vm13, %v2695_v14, %v2697_v63  ;;  %2578 = vrot.lane.b32.xlu1 %v6476_v9, %s4856_s18  ;;  %4740 = vmatpush1.bf16.msra.mxu0 %v4739_v19 }
 0x462   :  { %2576 = vrot.lane.b32.xlu0 %v6483_v56, %s4856_s18 }
 0x463   :  { %v6494_v30 = vpop.permute.xlu1 %3354 }
 0x464   :  { %v2829_v22 = vpop.permute.xlu0 %2828 }
 0x465   :  { %v2854_v42 = vsel %vm566_vm9, %v2827_v23, %v2829_v22  ;;  %3494 = vrot.lane.b32.xlu1 %v6413_v61, %s4863_s26 }
 0x466   :  { %3492 = vrot.lane.b32.xlu0 %v6373_v12, %s4863_s26  ;;  %v4755_v24 = vpack.c.bf16 %v2854_v42, %v2722_v17 }
 0x467   :  { %v6501_v45 = vpop.permute.xlu1 %3486 }
 0x468   :  { %v2957_v21 = vpop.permute.xlu0 %2956 }
 0x469   :  { %v2984_v40 = vsel %vm690_vm14, %v6377_v15, %v2957_v21  ;;  %v2985_v39 = vsel %vm690_vm14, %v2957_v21, %v2959_v60  ;;  %3498 = vrot.lane.b32.xlu1 %v6425_v37, %s4863_s26 }
 0x46a   :  { %3496 = vrot.lane.b32.xlu0 %v6435_v3, %s4863_s26 }
 0x46b   :  { %v6510_v52 = vpop.permute.xlu1 %2433 }
 0x46c   :  { %v2458_v5 = vsel %vm190_vm12, %v2432_v49, %v6510_v52  ;;  %v3089_v12 = vpop.permute.xlu0 %3088 }
 0x46d   :  { %v3116_v6 = vsel %vm815_vm10, %v6389_v36, %v3089_v12  ;;  %v3117_v38 = vsel %vm815_vm10, %v3089_v12, %v3091_v35  ;;  %2710 = vrot.lane.b32.xlu1 %v6476_v9, %s4857_s19 }
 0x46e   :  { %2708 = vrot.lane.b32.xlu0 %v6483_v56, %s4857_s19  ;;  %v4741_v15 = vpack.c.bf16 %v3117_v38, %v2985_v39  ;;  %v4743_v10 = vpack.c.bf16 %v3116_v6, %v2984_v40 }
 0x46f   :  { %v6521_v46 = vpop.permute.xlu1 %2566 }
 0x470   :  { %v2591_v55 = vsel %vm316_vm8, %v2565_v59, %v6521_v46  ;;  %v2961_v61 = vpop.permute.xlu0 %2960  ;;  %4742 = vmatprep.subr.bf16.mxu0 %v4741_v15 }
 0x471   :  { %v2986_v32 = vsel %vm690_vm14, %v2959_v60, %v2961_v61  ;;  %2842 = vrot.lane.b32.xlu1 %v6476_v9, %s4858_s20  ;;  %4744 = vmatpush1.bf16.msra.mxu0 %v4743_v10  ;;  %v4749_v36 = vpack.c.bf16 %v2591_v55, %v2458_v5 }
 0x472   :  { %2840 = vrot.lane.b32.xlu0 %v6483_v56, %s4858_s20 }
 0x473   :  { %v6531_v25 = vpop.permute.xlu1 %2698  ;;  %4750 = vmatprep.subr.bf16.mxu1 %v4749_v36 }
 0x474   :  { %v2723_v7 = vsel %vm441_vm13, %v2697_v63, %v6531_v25  ;;  %v3093_v34 = vpop.permute.xlu0 %3092  ;;  %4752 = vmatpush1.bf16.msra.mxu1 %v4751_v48 }
 0x475   :  { %v3118_v37 = vsel %vm815_vm10, %v3091_v35, %v3093_v34  ;;  %2974 = vrot.lane.b32.xlu1 %v6476_v9, %s4859_s21  ;;  %v3732_v35 = vld [vmem:[%s6783_s4] sm:$0x7] }
 0x476   :  { %2972 = vrot.lane.b32.xlu0 %v6483_v56, %s4859_s21  ;;  %v4759_v59 = vpack.c.bf16 %v3118_v37, %v2986_v32 }
 0x477   :  { %v6540_v4 = vpop.permute.xlu1 %2830 }
 0x478   :  { %v2855_v13 = vsel %vm566_vm9, %v2829_v22, %v6540_v4  ;;  %v3221_v3 = vpop.permute.xlu0 %3220 }
 0x479   :  { %v3248_v28 = vsel %vm939_vm15, %v6399_v11, %v3221_v3  ;;  %v3249_v58 = vsel %vm939_vm15, %v3221_v3, %v6487_v57  ;;  %3106 = vrot.lane.b32.xlu1 %v6476_v9, %s4861_s23  ;;  %v4753_v43 = vpack.c.bf16 %v2855_v13, %v2723_v7 }
 0x47a   :  { %3104 = vrot.lane.b32.xlu0 %v6483_v56, %s4861_s23 }
 0x47b   :  { %v6552_v44 = vpop.permute.xlu1 %2962  ;;  %4754 = vmatprep.subr.bf16.mxu1 %v4753_v43 }
 0x47c   :  { %v2987_v16 = vsel %vm690_vm14, %v2961_v61, %v6552_v44  ;;  %v3353_v53 = vpop.permute.xlu0 %3352  ;;  %4756 = vmatpush1.bf16.msra.mxu1 %v4755_v24 }
 0x47d   :  { %v3380_v11 = vsel %vm1064_vm11, %v6409_v8, %v3353_v53  ;;  %v3381_v47 = vsel %vm1064_vm11, %v3353_v53, %v6494_v30  ;;  %3238 = vrot.lane.b32.xlu1 %v6476_v9, %s4860_s22 }
 0x47e   :  { %3236 = vrot.lane.b32.xlu0 %v6483_v56, %s4860_s22  ;;  %v4745_v54 = vpack.c.bf16 %v3381_v47, %v3249_v58  ;;  %v4747_v62 = vpack.c.bf16 %v3380_v11, %v3248_v28 }
 0x47f   :  { %v6564_v14 = vpop.permute.xlu1 %3094 }
 0x480   :  { %v3119_v49 = vsel %vm815_vm10, %v3093_v34, %v6564_v14  ;;  %v3225_v33 = vpop.permute.xlu0 %3224  ;;  %4746 = vmatprep.subr.bf16.mxu0 %v4745_v54 }
 0x481   :  { %v3250_v8 = vsel %vm939_vm15, %v6487_v57, %v3225_v33  ;;  %3370 = vrot.lane.b32.xlu1 %v6476_v9, %s4862_s24  ;;  %4748 = vmatpush1.bf16.msra.mxu0 %v4747_v62  ;;  %v4757_v23 = vpack.c.bf16 %v3119_v49, %v2987_v16 }
 0x482   :  { %3368 = vrot.lane.b32.xlu0 %v6483_v56, %s4862_s24 }
 0x483   :  { %v6574_v26 = vpop.permute.xlu1 %3226  ;;  %4758 = vmatprep.subr.bf16.mxu1 %v4757_v23 }
 0x484   :  { %v3251_v60 = vsel %vm939_vm15, %v3225_v33, %v6574_v26  ;;  %v3357_v27 = vpop.permute.xlu0 %3356  ;;  %4760 = vmatpush1.bf16.msra.mxu1 %v4759_v59 }
 0x485   :  { %v3382_v1 = vsel %vm1064_vm11, %v6494_v30, %v3357_v27  ;;  %3502 = vrot.lane.b32.xlu1 %v6476_v9, %s4863_s26 }
 0x486   :  { %3500 = vrot.lane.b32.xlu0 %v6483_v56, %s4863_s26  ;;  %v4763_v19 = vpack.c.bf16 %v3382_v1, %v3250_v8 }
 0x487   :  { %v6584_v18 = vpop.permute.xlu1 %3358 }
 0x488   :  { %v3383_v29 = vsel %vm1064_vm11, %v3357_v27, %v6584_v18  ;;  %v3485_v20 = vpop.permute.xlu0 %3484 }
 0x489   :  { %v3512_v41 = vsel %vm1188_vm0, %v6423_v50, %v3485_v20  ;;  %v3513_v31 = vsel %vm1188_vm0, %v3485_v20, %v6501_v45  ;;  %v4761_v9 = vpack.c.bf16 %v3383_v29, %v3251_v60 }
 0x48a   :  { %4042 = vmatprep.subr.mxu0 %v3513_v31  ;;  %3735 = vperm.xlu0 %4840, %v3732_v35  }
 0x48b   :  { %v2438_v56 = vpop.permute.xlu1 %2437  ;;  %4043 = vmatpush1.msra.mxu0 %v3512_v41  ;;  %4762 = vmatprep.subr.bf16.mxu1 %v4761_v9 }
 0x48c   :  { %v2436_v57 = vpop.permute.xlu0 %2435  ;;  %4764 = vmatpush1.bf16.msra.mxu1 %v4763_v19  ;;  %4535 = vmatmul.mubr.msk.f32.vlgmr.msra.gmra.mrb[14].mxu0 %vm3738_vm1, %v6246_v0 }
 0x48d   :  { %v2459_v63 = vsel %vm190_vm12, %v6510_v52, %v2436_v57  ;;  %v2460_v50 = vsel %vm190_vm12, %v2436_v57, %v2438_v56  ;;  %4232 = vmatprep.mubr.f32.mxu0 %v4853_v2 }
 0x48f   :  { %v2571_v17 = vpop.permute.xlu1 %2570 }
 0x490   :  { %v2569_v30 = vpop.permute.xlu0 %2568 }
 0x491   :  { %v2592_v22 = vsel %vm316_vm8, %v6521_v46, %v2569_v30  ;;  %v2593_v42 = vsel %vm316_vm8, %v2569_v30, %v2571_v17 }
 0x492   :  { %v4765_v21 = vpack.c.bf16 %v2593_v42, %v2460_v50  ;;  %v4767_v40 = vpack.c.bf16 %v2592_v22, %v2459_v63 }
 0x493   :  { %v6604_v39 = vpop.permute.xlu1 %3490 }
 0x494   :  { %v2440_v5 = vpop.permute.xlu0 %2439  ;;  %4766 = vmatprep.subr.bf16.mxu0 %v4765_v21 }
 0x495   :  { %v2461_v12 = vsel %vm190_vm12, %v2438_v56, %v2440_v5  ;;  %4768 = vmatpush1.bf16.msra.mxu0 %v4767_v40 }
 0x497   :  { %v6607_v52 = vpop.permute.xlu1 %2441 }
 0x498   :  { %v2462_v6 = vsel %vm190_vm12, %v2440_v5, %v6607_v52  ;;  %v2573_v38 = vpop.permute.xlu0 %2572 }
 0x499   :  { %v2594_v15 = vsel %vm316_vm8, %v2571_v17, %v2573_v38 }
 0x49a   :  { %v4783_v7 = vpack.c.bf16 %v2594_v15, %v2461_v12 }
 0x49b   :  { %v6612_v10 = vpop.permute.xlu1 %2574 }
 0x49c   :  { %v2595_v46 = vsel %vm316_vm8, %v2573_v38, %v6612_v10  ;;  %v3489_v55 = vpop.permute.xlu0 %3488 }
 0x49d   :  { %v3514_v61 = vsel %vm1188_vm0, %v6501_v45, %v3489_v55  ;;  %v3515_v32 = vsel %vm1188_vm0, %v3489_v55, %v6604_v39  ;;  %v4781_v36 = vpack.c.bf16 %v2595_v46, %v2462_v6 }
 0x49e   :  { %4113 = vmatprep.subr.mxu1 %v3515_v32 }
 0x49f   :  { %v2703_v48 = vpop.permute.xlu1 %2702  ;;  %4114 = vmatpush1.msra.mxu1 %v3514_v61 }
 0x4a0   :  { %v2701_v34 = vpop.permute.xlu0 %2700  ;;  %4782 = vmatprep.subr.bf16.mxu1 %v4781_v36  ;;  %4536 = vmatmul.mubr.msk.f32.vlgmr.msra.gmra.mrb[14].mxu1 %vm3738_vm1, %v6246_v0 }
 0x4a1   :  { %v2724_v37 = vsel %vm441_vm13, %v6531_v25, %v2701_v34  ;;  %v2725_v13 = vsel %vm441_vm13, %v2701_v34, %v2703_v48  ;;  %4784 = vmatpush1.bf16.msra.mxu1 %v4783_v7  ;;  %4303 = vmatprep.mubr.f32.mxu1 %v4853_v2 }
 0x4a3   :  { %v2835_v45 = vpop.permute.xlu1 %2834 }
 0x4a4   :  { %v2833_v3 = vpop.permute.xlu0 %2832 }
 0x4a5   :  { %v2856_v28 = vsel %vm566_vm9, %v6540_v4, %v2833_v3  ;;  %v2857_v58 = vsel %vm566_vm9, %v2833_v3, %v2835_v45 }
 0x4a6   :  { %v4769_v43 = vpack.c.bf16 %v2857_v58, %v2725_v13  ;;  %v4771_v24 = vpack.c.bf16 %v2856_v28, %v2724_v37 }
 0x4a7   :  { %v6629_v16 = vpop.permute.xlu1 %2706 }
 0x4a8   :  { %v2705_v0 = vpop.permute.xlu0 %2704  ;;  %4770 = vmatprep.subr.bf16.mxu0 %v4769_v43 }
 0x4a9   :  { %v2726_v25 = vsel %vm441_vm13, %v2703_v48, %v2705_v0  ;;  %v2727_v53 = vsel %vm441_vm13, %v2705_v0, %v6629_v16  ;;  %4772 = vmatpush1.bf16.msra.mxu0 %v4771_v24 }
 0x4ab   :  { %v6634_v11 = vpop.permute.xlu1 %2838 }
 0x4ac   :  { %v2837_v47 = vpop.permute.xlu0 %2836 }
 0x4ad   :  { %v2858_v54 = vsel %vm566_vm9, %v2835_v45, %v2837_v47  ;;  %v2859_v4 = vsel %vm566_vm9, %v2837_v47, %v6634_v11 }
 0x4ae   :  { %v4785_v62 = vpack.c.bf16 %v2859_v4, %v2727_v53  ;;  %v4787_v49 = vpack.c.bf16 %v2858_v54, %v2726_v25 }
 0x4af   :  { %v2967_v33 = vpop.permute.xlu1 %2966 }
 0x4b0   :  { %v2965_v8 = vpop.permute.xlu0 %2964  ;;  %4786 = vmatprep.subr.bf16.mxu1 %v4785_v62 }
 0x4b1   :  { %v2988_v23 = vsel %vm690_vm14, %v6552_v44, %v2965_v8  ;;  %v2989_v59 = vsel %vm690_vm14, %v2965_v8, %v2967_v33  ;;  %4788 = vmatpush1.bf16.msra.mxu1 %v4787_v49  ;;  %v6695_v8 = vld [vmem:[%s6782_s3] sm:$0x7] }
 0x4b3   :  { %v3099_v60 = vpop.permute.xlu1 %3098 }
 0x4b4   :  { %v3097_v27 = vpop.permute.xlu0 %3096 }
 0x4b5   :  { %v3120_v1 = vsel %vm815_vm10, %v6564_v14, %v3097_v27  ;;  %v3121_v35 = vsel %vm815_vm10, %v3097_v27, %v3099_v60 }
 0x4b6   :  { %v4773_v29 = vpack.c.bf16 %v3121_v35, %v2989_v59  ;;  %v4775_v20 = vpack.c.bf16 %v3120_v1, %v2988_v23 }
 0x4b7   :  { %v6645_v41 = vpop.permute.xlu1 %2970 }
 0x4b8   :  { %v2969_v31 = vpop.permute.xlu0 %2968  ;;  %4774 = vmatprep.subr.bf16.mxu0 %v4773_v29 }
 0x4b9   :  { %v2990_v9 = vsel %vm690_vm14, %v2967_v33, %v2969_v31  ;;  %v2991_v44 = vsel %vm690_vm14, %v2969_v31, %v6645_v41  ;;  %4776 = vmatpush1.bf16.msra.mxu0 %v4775_v20 }
 0x4bb   :  { %v6650_v19 = vpop.permute.xlu1 %3102 }
 0x4bc   :  { %v3101_v56 = vpop.permute.xlu0 %3100 }
 0x4bd   :  { %v3122_v57 = vsel %vm815_vm10, %v3099_v60, %v3101_v56  ;;  %v3123_v14 = vsel %vm815_vm10, %v3101_v56, %v6650_v19 }
 0x4be   :  { %v4789_v63 = vpack.c.bf16 %v3123_v14, %v2991_v44  ;;  %v4791_v50 = vpack.c.bf16 %v3122_v57, %v2990_v9 }
 0x4bf   :  { %v3231_v17 = vpop.permute.xlu1 %3230 }
 0x4c0   :  { %v3229_v30 = vpop.permute.xlu0 %3228  ;;  %4790 = vmatprep.subr.bf16.mxu1 %v4789_v63 }
 0x4c1   :  { %v3252_v22 = vsel %vm939_vm15, %v6574_v26, %v3229_v30  ;;  %v3253_v42 = vsel %vm939_vm15, %v3229_v30, %v3231_v17  ;;  %4792 = vmatpush1.bf16.msra.mxu1 %v4791_v50 }
 0x4c3   :  { %v3363_v21 = vpop.permute.xlu1 %3362 }
 0x4c4   :  { %v3361_v40 = vpop.permute.xlu0 %3360 }
 0x4c5   :  { %v3384_v5 = vsel %vm1064_vm11, %v6584_v18, %v3361_v40  ;;  %v3385_v12 = vsel %vm1064_vm11, %v3361_v40, %v3363_v21 }
 0x4c6   :  { %v4777_v6 = vpack.c.bf16 %v3385_v12, %v3253_v42  ;;  %v4779_v38 = vpack.c.bf16 %v3384_v5, %v3252_v22 }
 0x4c7   :  { %v6661_v15 = vpop.permute.xlu1 %3234 }
 0x4c8   :  { %v3233_v46 = vpop.permute.xlu0 %3232  ;;  %4778 = vmatprep.subr.bf16.mxu0 %v4777_v6 }
 0x4c9   :  { %v3254_v55 = vsel %vm939_vm15, %v3231_v17, %v3233_v46  ;;  %v3255_v26 = vsel %vm939_vm15, %v3233_v46, %v6661_v15  ;;  %4780 = vmatpush1.bf16.msra.mxu0 %v4779_v38 }
 0x4cb   :  { %v6666_v61 = vpop.permute.xlu1 %3366 }
 0x4cc   :  { %v3365_v32 = vpop.permute.xlu0 %3364 }
 0x4cd   :  { %v3386_v36 = vsel %vm1064_vm11, %v3363_v21, %v3365_v32  ;;  %v3387_v18 = vsel %vm1064_vm11, %v3365_v32, %v6666_v61 }
 0x4ce   :  { %v4793_v48 = vpack.c.bf16 %v3387_v18, %v3255_v26  ;;  %v4795_v7 = vpack.c.bf16 %v3386_v36, %v3254_v55 }
 0x4cf   :  { %v2446_v34 = vpop.permute.xlu1 %2445  ;;  %v6671_v37 = vpop.f32.mrb[10].mxu0 }
 0x4d0   :  { %2503 = vst.msk [vmem:[#allocation5 + $0x90] sm:$0xff] %vm2502_vm3, %v2446_v34  ;;  %v2444_v13 = vpop.permute.xlu0 %2443  ;;  %4794 = vmatprep.subr.bf16.mxu1 %v4793_v48  ;;  %v6674_v45 = vpop.f32.mrb[11].mxu0 }
 0x4d1   :  { %v2463_v3 = vsel %vm190_vm12, %v6607_v52, %v2444_v13  ;;  %v2464_v28 = vsel %vm190_vm12, %v2444_v13, %v2446_v34  ;;  %4796 = vmatpush1.bf16.msra.mxu1 %v4795_v7 }
 0x4d3   :  { %v2579_v58 = vpop.permute.xlu1 %2578 }
 0x4d4   :  { %2635 = vst.msk [vmem:[#allocation5 + $0x128] sm:$0xff] %vm2502_vm3, %v2579_v58  ;;  %v2577_v43 = vpop.permute.xlu0 %2576 }
 0x4d5   :  { %v2596_v24 = vsel %vm316_vm8, %v6612_v10, %v2577_v43  ;;  %v2597_v0 = vsel %vm316_vm8, %v2577_v43, %v2579_v58  ;;  %vm4496_vm8 = vcmask 59392  }
 0x4d6   :  { %v4797_v4 = vpack.c.bf16 %v2597_v0, %v2464_v28  ;;  %v4799_v33 = vpack.c.bf16 %v2596_v24, %v2463_v3 }
 0x4d7   :  { %v3495_v25 = vpop.permute.xlu1 %3494  ;;  %v3579_v60 = vld [vmem:[#allocation5 + $0x90] sm:$0xff] }
 0x4d8   :  { %v3493_v53 = vpop.permute.xlu0 %3492 }
 0x4d9   :  { %v3516_v47 = vsel %vm1188_vm0, %v6604_v39, %v3493_v53  ;;  %v3517_v54 = vsel %vm1188_vm0, %v3493_v53, %v3495_v25  ;;  %v6686_v52 = vpop.f32.mrb[10].mxu1 }
 0x4da   :  { %4184 = vmatprep.subr.mxu0 %v3517_v54  ;;  %v6688_v62 = vpop.f32.mrb[11].mxu1 }
 0x4db   :  { %v6690_v49 = vpop.permute.xlu1 %3498  ;;  %4185 = vmatpush1.msra.mxu0 %v3516_v47  ;;  %v3598_v39 = vld [vmem:[#allocation5 + $0x128] sm:$0xff] }
 0x4dc   :  { %v3497_v10 = vpop.permute.xlu0 %3496  ;;  %4798 = vmatprep.subr.bf16.mxu0 %v4797_v4  ;;  %4537 = vmatmul.mubr.msk.f32.vlgmr.msra.gmra.mrb[16].mxu0 %vm3738_vm1, %v6695_v8  ;;  %v4814_v1 = vpack.c.bf16 %v3598_v39, %v3579_v60 }
 0x4dd   :  { %v3518_v23 = vsel %vm1188_vm0, %v3495_v25, %v3497_v10  ;;  %v3519_v59 = vsel %vm1188_vm0, %v3497_v10, %v6690_v49  ;;  %4800 = vmatpush1.bf16.msra.mxu0 %v4799_v33  ;;  %4374 = vmatprep.mubr.f32.mxu0 %v4853_v2 }
 0x4de   :  { %4255 = vmatprep.subr.mxu1 %v3519_v59 }
 0x4df   :  { %v2711_v27 = vpop.permute.xlu1 %2710  ;;  %4256 = vmatpush1.msra.mxu1 %v3518_v23 }
 0x4e0   :  { %2767 = vst.msk [vmem:[#allocation5 + $0x1c0] sm:$0xff] %vm2502_vm3, %v2711_v27  ;;  %v2709_v35 = vpop.permute.xlu0 %2708  ;;  %4813 = vmatprep.subr.bf16.mxu1 %v4865_v51  ;;  %4538 = vmatmul.mubr.msk.f32.vlgmr.msra.gmra.mrb[16].mxu1 %vm3738_vm1, %v6695_v8 }
 0x4e1   :  { %v2728_v29 = vsel %vm441_vm13, %v6629_v16, %v2709_v35  ;;  %v2729_v20 = vsel %vm441_vm13, %v2709_v35, %v2711_v27  ;;  %4815 = vmatpush3.bf16.msra.mxu1 %v4814_v1  ;;  %4588 = vmatprep.mubr.msk.f32.mxu1 %vm4866_vm5, %v4853_v2 }
 0x4e2   :  { %4816 = vmatprep.subr.bf16.mxu1 %v4865_v51 }
 0x4e3   :  { %v2843_v31 = vpop.permute.xlu1 %2842 }
 0x4e4   :  { %2899 = vst.msk [vmem:[#allocation5 + $0x258] sm:$0xff] %vm2502_vm3, %v2843_v31  ;;  %v2841_v9 = vpop.permute.xlu0 %2840 }
 0x4e5   :  { %v2860_v44 = vsel %vm566_vm9, %v6634_v11, %v2841_v9  ;;  %v2861_v56 = vsel %vm566_vm9, %v2841_v9, %v2843_v31 }
 0x4e6   :  { %v4801_v57 = vpack.c.bf16 %v2861_v56, %v2729_v20  ;;  %v4803_v14 = vpack.c.bf16 %v2860_v44, %v2728_v29 }
 0x4e7   :  { %v2975_v16 = vpop.permute.xlu1 %2974  ;;  %v3617_v22 = vld [vmem:[#allocation5 + $0x1c0] sm:$0xff] }
 0x4e8   :  { %3031 = vst.msk [vmem:[#allocation5 + $0x2f0] sm:$0xff] %vm2502_vm3, %v2975_v16  ;;  %v2973_v63 = vpop.permute.xlu0 %2972  ;;  %4802 = vmatprep.subr.bf16.mxu0 %v4801_v57 }
 0x4e9   :  { %v2992_v50 = vsel %vm690_vm14, %v6645_v41, %v2973_v63  ;;  %v2993_v17 = vsel %vm690_vm14, %v2973_v63, %v2975_v16  ;;  %4804 = vmatpush1.bf16.msra.mxu0 %v4803_v14 }
 0x4eb   :  { %v3107_v30 = vpop.permute.xlu1 %3106  ;;  %v3636_v42 = vld [vmem:[#allocation5 + $0x258] sm:$0xff] }
 0x4ec   :  { %3163 = vst.msk [vmem:[#allocation5 + $0x388] sm:$0xff] %vm2502_vm3, %v3107_v30  ;;  %v3105_v11 = vpop.permute.xlu0 %3104  ;;  %v4817_v21 = vpack.c.bf16 %v3636_v42, %v3617_v22 }
 0x4ed   :  { %v3124_v40 = vsel %vm815_vm10, %v6650_v19, %v3105_v11  ;;  %v3125_v5 = vsel %vm815_vm10, %v3105_v11, %v3107_v30 }
 0x4ee   :  { %4818 = vmatpush3.bf16.msra.mxu1 %v4817_v21  ;;  %v4805_v12 = vpack.c.bf16 %v3125_v5, %v2993_v17  ;;  %v4807_v6 = vpack.c.bf16 %v3124_v40, %v2992_v50 }
 0x4ef   :  { %v3239_v38 = vpop.permute.xlu1 %3238  ;;  %4819 = vmatprep.subr.bf16.mxu1 %v4865_v51  ;;  %v3655_v19 = vld [vmem:[#allocation5 + $0x2f0] sm:$0xff] }
 0x4f0   :  { %3295 = vst.msk [vmem:[#allocation5 + $0x420] sm:$0xff] %vm2502_vm3, %v3239_v38  ;;  %v3237_v41 = vpop.permute.xlu0 %3236  ;;  %4806 = vmatprep.subr.bf16.mxu0 %v4805_v12 }
 0x4f1   :  { %v3256_v46 = vsel %vm939_vm15, %v6661_v15, %v3237_v41  ;;  %v3257_v55 = vsel %vm939_vm15, %v3237_v41, %v3239_v38  ;;  %4808 = vmatpush1.bf16.msra.mxu0 %v4807_v6 }
 0x4f3   :  { %v3371_v26 = vpop.permute.xlu1 %3370  ;;  %v3674_v32 = vld [vmem:[#allocation5 + $0x388] sm:$0xff] }
 0x4f4   :  { %3427 = vst.msk [vmem:[#allocation5 + $0x4b8] sm:$0xff] %vm2502_vm3, %v3371_v26  ;;  %v3369_v36 = vpop.permute.xlu0 %3368  ;;  %v4820_v18 = vpack.c.bf16 %v3674_v32, %v3655_v19 }
 0x4f5   :  { %v3388_v48 = vsel %vm1064_vm11, %v6666_v61, %v3369_v36  ;;  %v3389_v7 = vsel %vm1064_vm11, %v3369_v36, %v3371_v26 }
 0x4f6   :  { %4821 = vmatpush3.bf16.msra.mxu1 %v4820_v18  ;;  %v4809_v34 = vpack.c.bf16 %v3389_v7, %v3257_v55  ;;  %v4811_v13 = vpack.c.bf16 %v3388_v48, %v3256_v46 }
 0x4f7   :  { %v3503_v3 = vpop.permute.xlu1 %3502  ;;  %4822 = vmatprep.subr.bf16.mxu1 %v4865_v51  ;;  %v3693_v61 = vld [vmem:[#allocation5 + $0x420] sm:$0xff] }
 0x4f8   :  { %3559 = vst.msk [vmem:[#allocation5 + $0x550] sm:$0xff] %vm2502_vm3, %v3503_v3  ;;  %v3501_v15 = vpop.permute.xlu0 %3500  ;;  %4810 = vmatprep.subr.bf16.mxu0 %v4809_v34 }
 0x4f9   :  { %v3520_v28 = vsel %vm1188_vm0, %v6690_v49, %v3501_v15  ;;  %v3521_v58 = vsel %vm1188_vm0, %v3501_v15, %v3503_v3  ;;  %4812 = vmatpush1.bf16.msra.mxu0 %v4811_v13 }
 0x4fa   :  { %4326 = vmatprep.subr.mxu0 %v3521_v58 }
 0x4fb   :  { %v3712_v43 = vld [vmem:[#allocation5 + $0x4b8] sm:$0xff] }
 0x4fc   :  { %v4823_v24 = vpack.c.bf16 %v3712_v43, %v3693_v61 }
 0x4fd   :  { %4327 = vmatpush1.msra.mxu0 %v3520_v28 }
 0x4fe   :  { %4824 = vmatpush3.bf16.msra.mxu1 %v4823_v24  ;;  %4539 = vmatmul.mubr.msk.f32.vlgmr.msra.gmra.mrb[18].mxu0 %vm3738_vm1, %v6695_v8 }
 0x4ff   :  { %4586 = vmatprep.subr.mxu1 %v4853_v2  ;;  %v3731_v51 = vld [vmem:[#allocation5 + $0x550] sm:$0xff] }
 0x502   :  { %4587 = vmatpush3.msra.mxu1 %v3731_v51 }
 0x503   :  { %4589 = vmatmul.mubr.msk.f32.vlgmr.msra.gmra.mrb[18].mxu1 %vm3738_vm1, %v6695_v8 }
 0x509   :  { %v3736_v0 = vpop.permute.xlu0 %3735 }
 0x50a   :  { %v3880_v25 = vadd.f32 %v6686_v52, %v3736_v0  ;;  %v3809_v53 = vadd.f32 %v6671_v37, %v3736_v0  ;;  %v3811_v47 = vadd.f32 %v6674_v45, %v3736_v0  ;;  %v3882_v54 = vadd.f32 %v6688_v62, %v3736_v0 }
 0x50c   :  { %v4469_v4 = vcombine.low %v3809_v53, %v3811_v47  ;;  %v4470_v49 = vcombine.low %v3880_v25, %v3882_v54 }
 0x50e   :  { %4487 = vst [vmem:[%s6784_s6] sm:$0x77] %v4469_v4  ;;  %4488 = vst [vmem:[%s6784_s6 + $0x8] sm:$0x77] %v4470_v49 }
 0x517   :  { %v3950_v2 = vpop.f32.mrb[12].mxu0 }
 0x518   :  { %v3951_v33 = vadd.f32 %v3950_v2, %v3736_v0  ;;  %v3952_v10 = vpop.f32.mrb[13].mxu0 }
 0x519   :  { %v3953_v52 = vadd.f32 %v3952_v10, %v3736_v0 }
 0x51b   :  { %v4471_v8 = vcombine.low %v3951_v33, %v3953_v52 }
 0x51c   :  { %v4021_v37 = vpop.f32.mrb[12].mxu1 }
 0x51d   :  { %4489 = vst [vmem:[%s6784_s6 + $0x10] sm:$0x77] %v4471_v8  ;;  %v4022_v45 = vadd.f32 %v4021_v37, %v3736_v0  ;;  %v4023_v62 = vpop.f32.mrb[13].mxu1 }
 0x51e   :  { %v4024_v39 = vadd.f32 %v4023_v62, %v3736_v0 }
 0x520   :  { %v4472_v23 = vcombine.low %v4022_v45, %v4024_v39 }
 0x522   :  { %4490 = vst [vmem:[%s6784_s6 + $0x18] sm:$0x77] %v4472_v23 }
 0x55f   :  { %v4092_v59 = vpop.f32.mrb[14].mxu0 }
 0x560   :  { %v4093_v60 = vadd.f32 %v4092_v59, %v3736_v0  ;;  %v4094_v27 = vpop.f32.mrb[15].mxu0 }
 0x561   :  { %v4095_v1 = vadd.f32 %v4094_v27, %v3736_v0 }
 0x563   :  { %v4473_v35 = vcombine.low %v4093_v60, %v4095_v1 }
 0x565   :  { %4491 = vst [vmem:[%s6784_s6 + $0x20] sm:$0x77] %v4473_v35 }
 0x573   :  { %v4163_v29 = vpop.f32.mrb[14].mxu1 }
 0x574   :  { %v4164_v20 = vadd.f32 %v4163_v29, %v3736_v0  ;;  %v4165_v31 = vpop.f32.mrb[15].mxu1 }
 0x575   :  { %v4166_v9 = vadd.f32 %v4165_v31, %v3736_v0 }
 0x577   :  { %v4474_v44 = vcombine.low %v4164_v20, %v4166_v9 }
 0x579   :  { %4492 = vst [vmem:[%s6784_s6 + $0x28] sm:$0x77] %v4474_v44 }
 0x5af   :  { %v4234_v56 = vpop.f32.mrb[16].mxu0 }
 0x5b0   :  { %v4235_v57 = vadd.f32 %v4234_v56, %v3736_v0  ;;  %v4236_v14 = vpop.f32.mrb[17].mxu0 }
 0x5b1   :  { %v4237_v16 = vadd.f32 %v4236_v14, %v3736_v0 }
 0x5b3   :  { %v4475_v63 = vcombine.low %v4235_v57, %v4237_v16  ;;  %v4305_v50 = vpop.f32.mrb[16].mxu1 }
 0x5b4   :  { %v4306_v17 = vadd.f32 %v4305_v50, %v3736_v0  ;;  %v4307_v30 = vpop.f32.mrb[17].mxu1 }
 0x5b5   :  { %4493 = vst [vmem:[%s6784_s6 + $0x30] sm:$0x77] %v4475_v63  ;;  %v4308_v22 = vadd.f32 %v4307_v30, %v3736_v0 }
 0x5b7   :  { %v4476_v42 = vcombine.low %v4306_v17, %v4308_v22 }
 0x5b9   :  { %4494 = vst [vmem:[%s6784_s6 + $0x38] sm:$0x77] %v4476_v42 }
 0x5d1   :  { %v4376_v11 = vpop.f32.mrb[18].mxu0 }
 0x5d2   :  { %v4377_v21 = vadd.f32 %v4376_v11, %v3736_v0  ;;  %v4378_v40 = vpop.f32.mrb[19].mxu0 }
 0x5d3   :  { %v4379_v5 = vadd.f32 %v4378_v40, %v3736_v0 }
 0x5d5   :  { %v4477_v12 = vcombine.low %v4377_v21, %v4379_v5 }
 0x5d6   :  { %v4447_v6 = vpop.f32.mrb[18].mxu1 }
 0x5d7   :  { %4495 = vst [vmem:[%s6784_s6 + $0x40] sm:$0x77] %v4477_v12  ;;  %v4448_v38 = vadd.f32 %v4447_v6, %v3736_v0  ;;  %v4590_v41 = vpop.f32.mrb[19].mxu1 }
 0x5d9   :  { %4497 = vst.msk [vmem:[%s6784_s6 + $0x48] sm:$0x7] %vm4496_vm8, %v4448_v38 }

</bundles_post_ra>
